<compile_context>
chip_gen: v7x
topology: tpu7x:2x2x1
jax: 0.10.0
libtpu: 0.0.40
codegen_flags: <defaults>
</compile_context>

<pallas_src>
import jax
import jax.numpy as jnp
from jax import lax
from jax.experimental import pallas as pl
from jax.experimental.pallas import tpu as pltpu


# ---------------------------------------------------------------------------
# Fused multi-block BasicBlock stage kernel.
# ---------------------------------------------------------------------------
def _stage_kernel(x_ref, w1_ref, b1_ref, w2_ref, b2_ref, out_ref,
                  act_ref, shift_ref):
    """grid = (batch, block); block axis innermost ("arbitrary").

    x_ref:     (1, H, W, C)    f32  input image (same block across block axis)
    w1_ref:    (nblk, 9*C, C)  bf16 conv1 weights, BN1 scale folded (resident)
    b1_ref:    (nblk, 1, C)    f32  folded BN1 bias (resident)
    w2_ref:    (nblk, 9*C, C)  bf16 conv2 weights, BN2 scale folded (resident)
    b2_ref:    (nblk, 1, C)    f32  folded BN2 bias (resident)
    out_ref:   (1, H, W, C)    f32  stage output (written at the last block)
    act_ref:   (H, W, C)       f32  VMEM-resident activation carried across blocks
    shift_ref: (3, H+2, W, C)  bf16 H-padded, W-shifted conv-input buffers
    """
    blk = pl.program_id(1)
    n_blk = pl.num_programs(1)
    H, W, C = act_ref.shape

    # First block of every image: bring the input activation into the carry.
    @pl.when(blk == 0)
    def _():
        act_ref[...] = x_ref[0]

    # Zero only the 1-row H halo; interiors are fully overwritten below and
    # the halo rows are never touched by the interior stores.
    zrow = jnp.zeros((1, W, C), jnp.bfloat16)
    for dx in range(3):
        shift_ref[dx, 0:1] = zrow
        shift_ref[dx, H + 1:H + 2] = zrow

    w_idx = lax.broadcasted_iota(jnp.int32, (H, W, C), 1)

    def conv3x3(src, w_blk):
        """'same' 3x3 conv: 9 accumulating MXU matmuls (bf16 in, f32 acc).

        src:   (H, W, C) f32 value (conv input)
        w_blk: (9*C, C)  bf16 ref view (current block's folded weights)
        """
        # Build the three W-shifted copies once (XLU roll + VPU select) so all
        # nine taps below are sublane-aligned outer-dim slices of shift_ref.
        left = jnp.where(w_idx == 0, 0.0,
                         pltpu.roll(src, shift=1, axis=1))        # src[:, j-1]
        right = jnp.where(w_idx == W - 1, 0.0,
                          pltpu.roll(src, shift=W - 1, axis=1))   # src[:, j+1]
        shift_ref[0, 1:H + 1] = left.astype(jnp.bfloat16)
        shift_ref[1, 1:H + 1] = src.astype(jnp.bfloat16)
        shift_ref[2, 1:H + 1] = right.astype(jnp.bfloat16)

        acc = None
        for dy in range(3):
            for dx in range(3):
                tap = shift_ref[dx, dy:dy + H].reshape(H * W, C)   # aligned
                t = dy * 3 + dx
                d = jnp.dot(tap, w_blk[t * C:(t + 1) * C, :],
                            preferred_element_type=jnp.float32)
                acc = d if acc is None else acc + d
        return acc                                                 # (H*W, C) f32

    residual = act_ref[...]                                        # (H, W, C) f32

    # conv1 + folded BN1 + ReLU (intermediate never leaves VMEM).
    y1 = jnp.maximum(conv3x3(residual, w1_ref.at[blk]) + b1_ref[blk], 0.0)

    # conv2 + folded BN2 + residual (kept f32) + ReLU.
    y2 = conv3x3(y1.reshape(H, W, C), w2_ref.at[blk]) + b2_ref[blk]
    y2 = jnp.maximum(y2 + residual.reshape(H * W, C), 0.0).reshape(H, W, C)

    act_ref[...] = y2                                              # carry to next block

    @pl.when(blk == n_blk - 1)
    def _():
        out_ref[0] = y2.astype(out_ref.dtype)


def resnet_stage_pallas(x, block_params):
    """Run a stack of stride-1 BasicBlocks (tail of a _make_layer stage) in a
    single pallas_call; the activation stays VMEM-resident across blocks."""
    N, H, W, C = x.shape
    nblk = len(block_params)
    w1 = jnp.stack([p["w1"] for p in block_params])      # (nblk, 9*C, C) bf16
    b1 = jnp.stack([p["b1"] for p in block_params])      # (nblk, 1, C)   f32
    w2 = jnp.stack([p["w2"] for p in block_params])
    b2 = jnp.stack([p["b2"] for p in block_params])
    K9 = w1.shape[1]

    grid_spec = pltpu.PrefetchScalarGridSpec(
        num_scalar_prefetch=0,
        grid=(N, nblk),                                   # block axis innermost
        in_specs=[
            pl.BlockSpec((1, H, W, C), lambda n, b: (n, 0, 0, 0)),
            pl.BlockSpec((nblk, K9, C), lambda n, b: (0, 0, 0)),   # resident
            pl.BlockSpec((nblk, 1, C), lambda n, b: (0, 0, 0)),    # resident
            pl.BlockSpec((nblk, K9, C), lambda n, b: (0, 0, 0)),   # resident
            pl.BlockSpec((nblk, 1, C), lambda n, b: (0, 0, 0)),    # resident
        ],
        out_specs=pl.BlockSpec((1, H, W, C), lambda n, b: (n, 0, 0, 0)),
        scratch_shapes=[
            pltpu.VMEM((H, W, C), jnp.float32),           # activation carry
            pltpu.VMEM((3, H + 2, W, C), jnp.bfloat16),   # shifted conv inputs
        ],
    )
    return pl.pallas_call(
        _stage_kernel,
        out_shape=jax.ShapeDtypeStruct((N, H, W, C), jnp.float32),
        grid_spec=grid_spec,
        compiler_params=pltpu.CompilerParams(
            dimension_semantics=("parallel", "arbitrary"),
            vmem_limit_bytes=32 * 1024 * 1024),
    )(x, w1, b1, w2, b2)


# ---------------------------------------------------------------------------
# Parameter construction: raw conv + BatchNorm(inference) -> folded form.
# ---------------------------------------------------------------------------
def _fold_bn_into_conv(w9, gamma, beta, mean, var, eps=1e-5):
    """Fold BN scale into conv weights; return (bf16 weights, f32 bias)."""
    scale = gamma / jnp.sqrt(var + eps)
    bias = beta - mean * scale
    w_folded = (w9 * scale[None, None, :]).reshape(-1, w9.shape[-1])
    return w_folded.astype(jnp.bfloat16), bias.reshape(1, -1).astype(jnp.float32)


def _init_block_params(key, planes, eps=1e-5):
    k = jax.random.split(key, 10)
    std = (2.0 / (9 * planes)) ** 0.5          # kaiming_normal_, fan_out, relu
    w1 = std * jax.random.normal(k[0], (9, planes, planes), jnp.float32)
    w2 = std * jax.random.normal(k[1], (9, planes, planes), jnp.float32)
    g1 = 1.0 + 0.1 * jax.random.normal(k[2], (planes,), jnp.float32)
    b1 = 0.1 * jax.random.normal(k[3], (planes,), jnp.float32)
    m1 = 0.05 * jax.random.normal(k[4], (planes,), jnp.float32)
    v1 = jnp.abs(1.0 + 0.1 * jax.random.normal(k[5], (planes,), jnp.float32))
    g2 = 1.0 + 0.1 * jax.random.normal(k[6], (planes,), jnp.float32)
    b2 = 0.1 * jax.random.normal(k[7], (planes,), jnp.float32)
    m2 = 0.05 * jax.random.normal(k[8], (planes,), jnp.float32)
    v2 = jnp.abs(1.0 + 0.1 * jax.random.normal(k[9], (planes,), jnp.float32))
    fw1, fb1 = _fold_bn_into_conv(w1, g1, b1, m1, v1, eps)
    fw2, fb2 = _fold_bn_into_conv(w2, g2, b2, m2, v2, eps)
    return dict(w1=fw1, b1=fb1, w2=fw2, b2=fb2)


# ---------------------------------------------------------------------------
# Pure-JAX reference (lax.conv) with matching bf16 operand quantization.
# ---------------------------------------------------------------------------
def _reference_block(x, p):
    C = x.shape[-1]

    def conv(inp, w_folded_bf16):
        w = w_folded_bf16.astype(jnp.float32).reshape(3, 3, C, C)
        xq = inp.astype(jnp.bfloat16).astype(jnp.float32)
        return lax.conv_general_dilated(
            xq, w, window_strides=(1, 1), padding=((1, 1), (1, 1)),
            dimension_numbers=("NHWC", "HWIO", "NHWC"),
            precision=lax.Precision.HIGHEST)

    mid = jnp.maximum(conv(x, p["w1"]) + p["b1"].reshape(1, 1, 1, C), 0.0)
    out = conv(mid, p["w2"]) + p["b2"].reshape(1, 1, 1, C) + x
    return jnp.maximum(out, 0.0)


def _reference_stage(x, block_params):
    for p in block_params:
        x = _reference_block(x, p)
    return x


if __name__ == "__main__":
    key = jax.random.PRNGKey(0)
    kx, k1, k2 = jax.random.split(key, 3)

    # Small but module-consistent shapes: 128 channels (the encoder's inplanes
    # after the stem / layer2 planes), 16x16 spatial, batch 2, two blocks.
    N, Hs, Ws, C = 2, 16, 16, 128
    x = jax.random.normal(kx, (N, Hs, Ws, C), jnp.float32)
    params = [_init_block_params(k1, C), _init_block_params(k2, C)]

    out = jax.block_until_ready(resnet_stage_pallas(x, params))
    ref = _reference_stage(x, params)

    assert out.shape == (N, Hs, Ws, C)
    max_err = float(jnp.max(jnp.abs(out - ref)))
    assert jnp.allclose(out, ref, atol=1e-2, rtol=1e-2), max_err

    print("KERNEL_OK")
</pallas_src>

<mosaic_0001>
module attributes {stable_mosaic.version = 11 : i64} {
  func.func @_stage_kernel(%arg0: i32, %arg1: i32, %arg2: memref<1x16x16x128xf32, #tpu.memory_space<vmem>>, %arg3: memref<2x1152x128xbf16, #tpu.memory_space<vmem>>, %arg4: memref<2x1x128xf32, #tpu.memory_space<vmem>>, %arg5: memref<2x1152x128xbf16, #tpu.memory_space<vmem>>, %arg6: memref<2x1x128xf32, #tpu.memory_space<vmem>>, %arg7: memref<1x16x16x128xf32, #tpu.memory_space<vmem>>, %arg8: memref<16x16x128xf32, #tpu.memory_space<vmem>>, %arg9: memref<3x18x16x128xbf16, #tpu.memory_space<vmem>>) attributes {dimension_semantics = [#tpu.dimension_semantics<parallel>, #tpu.dimension_semantics<arbitrary>], iteration_bounds = array<i64: 2, 2>, scalar_prefetch = 0 : i64, scratch_operands = 2 : i64, tpu.core_type = #tpu.core_type<tc>, window_params = [{transform_indices = @transform_0, window_bounds = array<i64: 1, 16, 16, 128>}, {pipeline_mode = #tpu.pipeline_mode<synchronous>, transform_indices = @transform_1, window_bounds = array<i64: 2, 1152, 128>}, {pipeline_mode = #tpu.pipeline_mode<synchronous>, transform_indices = @transform_2, window_bounds = array<i64: 2, 1, 128>}, {pipeline_mode = #tpu.pipeline_mode<synchronous>, transform_indices = @transform_3, window_bounds = array<i64: 2, 1152, 128>}, {pipeline_mode = #tpu.pipeline_mode<synchronous>, transform_indices = @transform_4, window_bounds = array<i64: 2, 1, 128>}, {transform_indices = @transform_5, window_bounds = array<i64: 1, 16, 16, 128>}]} {
    %c0_i32 = arith.constant 0 : i32
    %0 = arith.cmpi eq, %arg1, %c0_i32 : i32
    %1 = arith.extui %0 : i1 to i32
    %c0_i32_0 = arith.constant 0 : i32
    %2 = arith.cmpi ne, %1, %c0_i32_0 : i32
    scf.if %2 {
      %c0_223 = arith.constant 0 : index
      %c0_224 = arith.constant 0 : index
      %c0_225 = arith.constant 0 : index
      %c0_226 = arith.constant 0 : index
      %232 = vector.load %arg2[%c0_223, %c0_224, %c0_225, %c0_226] : memref<1x16x16x128xf32, #tpu.memory_space<vmem>>, vector<1x16x16x128xf32>
      %233 = vector.shape_cast %232 : vector<1x16x16x128xf32> to vector<16x16x128xf32>
      %c0_227 = arith.constant 0 : index
      %c0_228 = arith.constant 0 : index
      %c0_229 = arith.constant 0 : index
      %234 = vector.load %arg8[%c0_227, %c0_228, %c0_229] : memref<16x16x128xf32, #tpu.memory_space<vmem>>, vector<16x16x128xf32>
      tpu.vector_store %arg8[%c0_227, %c0_228, %c0_229], %233 {strides = array<i32>} : memref<16x16x128xf32, #tpu.memory_space<vmem>>, vector<16x16x128xf32>,
    } else {
    }
    %cst = arith.constant 0.000000e+00 : bf16
    %3 = vector.broadcast %cst : bf16 to vector<1x16x128xbf16>
    %c0 = arith.constant 0 : index
    %c0_1 = arith.constant 0 : index
    %c0_2 = arith.constant 0 : index
    %c0_3 = arith.constant 0 : index
    %4 = vector.load %arg9[%c0, %c0_1, %c0_2, %c0_3] : memref<3x18x16x128xbf16, #tpu.memory_space<vmem>>, vector<1x1x16x128xbf16>
    %5 = vector.shape_cast %4 : vector<1x1x16x128xbf16> to vector<1x16x128xbf16>
    %6 = vector.shape_cast %3 : vector<1x16x128xbf16> to vector<1x1x16x128xbf16>
    tpu.vector_store %arg9[%c0, %c0_1, %c0_2, %c0_3], %6 {strides = array<i32>} : memref<3x18x16x128xbf16, #tpu.memory_space<vmem>>, vector<1x1x16x128xbf16>,
    %c0_4 = arith.constant 0 : index
    %c17 = arith.constant 17 : index
    %c0_5 = arith.constant 0 : index
    %c0_6 = arith.constant 0 : index
    %7 = vector.load %arg9[%c0_4, %c17, %c0_5, %c0_6] : memref<3x18x16x128xbf16, #tpu.memory_space<vmem>>, vector<1x1x16x128xbf16>
    %8 = vector.shape_cast %7 : vector<1x1x16x128xbf16> to vector<1x16x128xbf16>
    %9 = vector.shape_cast %3 : vector<1x16x128xbf16> to vector<1x1x16x128xbf16>
    tpu.vector_store %arg9[%c0_4, %c17, %c0_5, %c0_6], %9 {strides = array<i32>} : memref<3x18x16x128xbf16, #tpu.memory_space<vmem>>, vector<1x1x16x128xbf16>,
    %c1 = arith.constant 1 : index
    %c0_7 = arith.constant 0 : index
    %c0_8 = arith.constant 0 : index
    %c0_9 = arith.constant 0 : index
    %10 = vector.load %arg9[%c1, %c0_7, %c0_8, %c0_9] : memref<3x18x16x128xbf16, #tpu.memory_space<vmem>>, vector<1x1x16x128xbf16>
    %11 = vector.shape_cast %10 : vector<1x1x16x128xbf16> to vector<1x16x128xbf16>
    %12 = vector.shape_cast %3 : vector<1x16x128xbf16> to vector<1x1x16x128xbf16>
    tpu.vector_store %arg9[%c1, %c0_7, %c0_8, %c0_9], %12 {strides = array<i32>} : memref<3x18x16x128xbf16, #tpu.memory_space<vmem>>, vector<1x1x16x128xbf16>,
    %c1_10 = arith.constant 1 : index
    %c17_11 = arith.constant 17 : index
    %c0_12 = arith.constant 0 : index
    %c0_13 = arith.constant 0 : index
    %13 = vector.load %arg9[%c1_10, %c17_11, %c0_12, %c0_13] : memref<3x18x16x128xbf16, #tpu.memory_space<vmem>>, vector<1x1x16x128xbf16>
    %14 = vector.shape_cast %13 : vector<1x1x16x128xbf16> to vector<1x16x128xbf16>
    %15 = vector.shape_cast %3 : vector<1x16x128xbf16> to vector<1x1x16x128xbf16>
    tpu.vector_store %arg9[%c1_10, %c17_11, %c0_12, %c0_13], %15 {strides = array<i32>} : memref<3x18x16x128xbf16, #tpu.memory_space<vmem>>, vector<1x1x16x128xbf16>,
    %c2 = arith.constant 2 : index
    %c0_14 = arith.constant 0 : index
    %c0_15 = arith.constant 0 : index
    %c0_16 = arith.constant 0 : index
    %16 = vector.load %arg9[%c2, %c0_14, %c0_15, %c0_16] : memref<3x18x16x128xbf16, #tpu.memory_space<vmem>>, vector<1x1x16x128xbf16>
    %17 = vector.shape_cast %16 : vector<1x1x16x128xbf16> to vector<1x16x128xbf16>
    %18 = vector.shape_cast %3 : vector<1x16x128xbf16> to vector<1x1x16x128xbf16>
    tpu.vector_store %arg9[%c2, %c0_14, %c0_15, %c0_16], %18 {strides = array<i32>} : memref<3x18x16x128xbf16, #tpu.memory_space<vmem>>, vector<1x1x16x128xbf16>,
    %c2_17 = arith.constant 2 : index
    %c17_18 = arith.constant 17 : index
    %c0_19 = arith.constant 0 : index
    %c0_20 = arith.constant 0 : index
    %19 = vector.load %arg9[%c2_17, %c17_18, %c0_19, %c0_20] : memref<3x18x16x128xbf16, #tpu.memory_space<vmem>>, vector<1x1x16x128xbf16>
    %20 = vector.shape_cast %19 : vector<1x1x16x128xbf16> to vector<1x16x128xbf16>
    %21 = vector.shape_cast %3 : vector<1x16x128xbf16> to vector<1x1x16x128xbf16>
    tpu.vector_store %arg9[%c2_17, %c17_18, %c0_19, %c0_20], %21 {strides = array<i32>} : memref<3x18x16x128xbf16, #tpu.memory_space<vmem>>, vector<1x1x16x128xbf16>,
    %22 = tpu.iota {dimensions = array<i32: 1>} : vector<16x16x128xi32>
    %c0_21 = arith.constant 0 : index
    %c0_22 = arith.constant 0 : index
    %c0_23 = arith.constant 0 : index
    %23 = vector.load %arg8[%c0_21, %c0_22, %c0_23] : memref<16x16x128xf32, #tpu.memory_space<vmem>>, vector<16x16x128xf32>
    %c0_i32_24 = arith.constant 0 : i32
    %24 = vector.broadcast %c0_i32_24 : i32 to vector<16x16x128xi32>
    %25 = arith.cmpi eq, %22, %24 : vector<16x16x128xi32>
    %c1_i32 = arith.constant 1 : i32
    %26 = tpu.dynamic_rotate %23 by %c1_i32 dim 1 : vector<16x16x128xf32>, i32 -> vector<16x16x128xf32>
    %cst_25 = arith.constant 0.000000e+00 : f32
    %27 = vector.broadcast %cst_25 : f32 to vector<16x16x128xf32>
    %28 = arith.select %25, %27, %26 : vector<16x16x128xi1>, vector<16x16x128xf32>
    %c15_i32 = arith.constant 15 : i32
    %29 = vector.broadcast %c15_i32 : i32 to vector<16x16x128xi32>
    %30 = arith.cmpi eq, %22, %29 : vector<16x16x128xi32>
    %c15_i32_26 = arith.constant 15 : i32
    %31 = tpu.dynamic_rotate %23 by %c15_i32_26 dim 1 : vector<16x16x128xf32>, i32 -> vector<16x16x128xf32>
    %cst_27 = arith.constant 0.000000e+00 : f32
    %32 = vector.broadcast %cst_27 : f32 to vector<16x16x128xf32>
    %33 = arith.select %30, %32, %31 : vector<16x16x128xi1>, vector<16x16x128xf32>
    %34 = arith.truncf %28 : vector<16x16x128xf32> to vector<16x16x128xbf16>
    %c0_28 = arith.constant 0 : index
    %c1_29 = arith.constant 1 : index
    %c0_30 = arith.constant 0 : index
    %c0_31 = arith.constant 0 : index
    %35 = vector.load %arg9[%c0_28, %c1_29, %c0_30, %c0_31] : memref<3x18x16x128xbf16, #tpu.memory_space<vmem>>, vector<1x16x16x128xbf16>
    %36 = vector.shape_cast %35 : vector<1x16x16x128xbf16> to vector<16x16x128xbf16>
    %37 = vector.shape_cast %34 : vector<16x16x128xbf16> to vector<1x16x16x128xbf16>
    tpu.vector_store %arg9[%c0_28, %c1_29, %c0_30, %c0_31], %37 {strides = array<i32>} : memref<3x18x16x128xbf16, #tpu.memory_space<vmem>>, vector<1x16x16x128xbf16>,
    %38 = arith.truncf %23 : vector<16x16x128xf32> to vector<16x16x128xbf16>
    %c1_32 = arith.constant 1 : index
    %c1_33 = arith.constant 1 : index
    %c0_34 = arith.constant 0 : index
    %c0_35 = arith.constant 0 : index
    %39 = vector.load %arg9[%c1_32, %c1_33, %c0_34, %c0_35] : memref<3x18x16x128xbf16, #tpu.memory_space<vmem>>, vector<1x16x16x128xbf16>
    %40 = vector.shape_cast %39 : vector<1x16x16x128xbf16> to vector<16x16x128xbf16>
    %41 = vector.shape_cast %38 : vector<16x16x128xbf16> to vector<1x16x16x128xbf16>
    tpu.vector_store %arg9[%c1_32, %c1_33, %c0_34, %c0_35], %41 {strides = array<i32>} : memref<3x18x16x128xbf16, #tpu.memory_space<vmem>>, vector<1x16x16x128xbf16>,
    %42 = arith.truncf %33 : vector<16x16x128xf32> to vector<16x16x128xbf16>
    %c2_36 = arith.constant 2 : index
    %c1_37 = arith.constant 1 : index
    %c0_38 = arith.constant 0 : index
    %c0_39 = arith.constant 0 : index
    %43 = vector.load %arg9[%c2_36, %c1_37, %c0_38, %c0_39] : memref<3x18x16x128xbf16, #tpu.memory_space<vmem>>, vector<1x16x16x128xbf16>
    %44 = vector.shape_cast %43 : vector<1x16x16x128xbf16> to vector<16x16x128xbf16>
    %45 = vector.shape_cast %42 : vector<16x16x128xbf16> to vector<1x16x16x128xbf16>
    tpu.vector_store %arg9[%c2_36, %c1_37, %c0_38, %c0_39], %45 {strides = array<i32>} : memref<3x18x16x128xbf16, #tpu.memory_space<vmem>>, vector<1x16x16x128xbf16>,
    %c0_40 = arith.constant 0 : index
    %c0_41 = arith.constant 0 : index
    %c0_42 = arith.constant 0 : index
    %c0_43 = arith.constant 0 : index
    %46 = vector.load %arg9[%c0_40, %c0_41, %c0_42, %c0_43] : memref<3x18x16x128xbf16, #tpu.memory_space<vmem>>, vector<1x16x16x128xbf16>
    %47 = vector.shape_cast %46 : vector<1x16x16x128xbf16> to vector<16x16x128xbf16>
    %48 = vector.shape_cast %47 : vector<16x16x128xbf16> to vector<256x128xbf16>
    %c0_i32_44 = arith.constant 0 : i32
    %c0_i32_45 = arith.constant 0 : i32
    %49 = tpu.memref_slice %arg3[%arg1, %c0_i32_44, %c0_i32_45] : memref<2x1152x128xbf16, #tpu.memory_space<vmem>> -> memref<1x1152x128xbf16, #tpu.memory_space<vmem>>
    %50 = tpu.memref_squeeze %49 : memref<1x1152x128xbf16, #tpu.memory_space<vmem>> -> memref<1152x128xbf16, #tpu.memory_space<vmem>>
    %c0_46 = arith.constant 0 : index
    %c0_47 = arith.constant 0 : index
    %51 = vector.load %50[%c0_46, %c0_47] : memref<1152x128xbf16, #tpu.memory_space<vmem>>, vector<128x128xbf16>
    %cst_48 = arith.constant dense<0.000000e+00> : vector<256x128xf32>
    %52 = tpu.matmul %48, %51, %cst_48 {dimension_numbers = #tpu.dot_dimension_numbers<[1], [0], [0], [1], [0, 0, 1, 1], [], []>} : vector<256x128xbf16>, vector<128x128xbf16>, vector<256x128xf32> -> vector<256x128xf32>
    %c1_49 = arith.constant 1 : index
    %c0_50 = arith.constant 0 : index
    %c0_51 = arith.constant 0 : index
    %c0_52 = arith.constant 0 : index
    %53 = vector.load %arg9[%c1_49, %c0_50, %c0_51, %c0_52] : memref<3x18x16x128xbf16, #tpu.memory_space<vmem>>, vector<1x16x16x128xbf16>
    %54 = vector.shape_cast %53 : vector<1x16x16x128xbf16> to vector<16x16x128xbf16>
    %55 = vector.shape_cast %54 : vector<16x16x128xbf16> to vector<256x128xbf16>
    %c0_i32_53 = arith.constant 0 : i32
    %c0_i32_54 = arith.constant 0 : i32
    %56 = tpu.memref_slice %arg3[%arg1, %c0_i32_53, %c0_i32_54] : memref<2x1152x128xbf16, #tpu.memory_space<vmem>> -> memref<1x1152x128xbf16, #tpu.memory_space<vmem>>
    %57 = tpu.memref_squeeze %56 : memref<1x1152x128xbf16, #tpu.memory_space<vmem>> -> memref<1152x128xbf16, #tpu.memory_space<vmem>>
    %c128 = arith.constant 128 : index
    %c0_55 = arith.constant 0 : index
    %58 = vector.load %57[%c128, %c0_55] : memref<1152x128xbf16, #tpu.memory_space<vmem>>, vector<128x128xbf16>
    %cst_56 = arith.constant dense<0.000000e+00> : vector<256x128xf32>
    %59 = tpu.matmul %55, %58, %cst_56 {dimension_numbers = #tpu.dot_dimension_numbers<[1], [0], [0], [1], [0, 0, 1, 1], [], []>} : vector<256x128xbf16>, vector<128x128xbf16>, vector<256x128xf32> -> vector<256x128xf32>
    %60 = arith.addf %52, %59 : vector<256x128xf32>
    %c2_57 = arith.constant 2 : index
    %c0_58 = arith.constant 0 : index
    %c0_59 = arith.constant 0 : index
    %c0_60 = arith.constant 0 : index
    %61 = vector.load %arg9[%c2_57, %c0_58, %c0_59, %c0_60] : memref<3x18x16x128xbf16, #tpu.memory_space<vmem>>, vector<1x16x16x128xbf16>
    %62 = vector.shape_cast %61 : vector<1x16x16x128xbf16> to vector<16x16x128xbf16>
    %63 = vector.shape_cast %62 : vector<16x16x128xbf16> to vector<256x128xbf16>
    %c0_i32_61 = arith.constant 0 : i32
    %c0_i32_62 = arith.constant 0 : i32
    %64 = tpu.memref_slice %arg3[%arg1, %c0_i32_61, %c0_i32_62] : memref<2x1152x128xbf16, #tpu.memory_space<vmem>> -> memref<1x1152x128xbf16, #tpu.memory_space<vmem>>
    %65 = tpu.memref_squeeze %64 : memref<1x1152x128xbf16, #tpu.memory_space<vmem>> -> memref<1152x128xbf16, #tpu.memory_space<vmem>>
    %c256 = arith.constant 256 : index
    %c0_63 = arith.constant 0 : index
    %66 = vector.load %65[%c256, %c0_63] : memref<1152x128xbf16, #tpu.memory_space<vmem>>, vector<128x128xbf16>
    %cst_64 = arith.constant dense<0.000000e+00> : vector<256x128xf32>
    %67 = tpu.matmul %63, %66, %cst_64 {dimension_numbers = #tpu.dot_dimension_numbers<[1], [0], [0], [1], [0, 0, 1, 1], [], []>} : vector<256x128xbf16>, vector<128x128xbf16>, vector<256x128xf32> -> vector<256x128xf32>
    %68 = arith.addf %60, %67 : vector<256x128xf32>
    %c0_65 = arith.constant 0 : index
    %c1_66 = arith.constant 1 : index
    %c0_67 = arith.constant 0 : index
    %c0_68 = arith.constant 0 : index
    %69 = vector.load %arg9[%c0_65, %c1_66, %c0_67, %c0_68] : memref<3x18x16x128xbf16, #tpu.memory_space<vmem>>, vector<1x16x16x128xbf16>
    %70 = vector.shape_cast %69 : vector<1x16x16x128xbf16> to vector<16x16x128xbf16>
    %71 = vector.shape_cast %70 : vector<16x16x128xbf16> to vector<256x128xbf16>
    %c0_i32_69 = arith.constant 0 : i32
    %c0_i32_70 = arith.constant 0 : i32
    %72 = tpu.memref_slice %arg3[%arg1, %c0_i32_69, %c0_i32_70] : memref<2x1152x128xbf16, #tpu.memory_space<vmem>> -> memref<1x1152x128xbf16, #tpu.memory_space<vmem>>
    %73 = tpu.memref_squeeze %72 : memref<1x1152x128xbf16, #tpu.memory_space<vmem>> -> memref<1152x128xbf16, #tpu.memory_space<vmem>>
    %c384 = arith.constant 384 : index
    %c0_71 = arith.constant 0 : index
    %74 = vector.load %73[%c384, %c0_71] : memref<1152x128xbf16, #tpu.memory_space<vmem>>, vector<128x128xbf16>
    %cst_72 = arith.constant dense<0.000000e+00> : vector<256x128xf32>
    %75 = tpu.matmul %71, %74, %cst_72 {dimension_numbers = #tpu.dot_dimension_numbers<[1], [0], [0], [1], [0, 0, 1, 1], [], []>} : vector<256x128xbf16>, vector<128x128xbf16>, vector<256x128xf32> -> vector<256x128xf32>
    %76 = arith.addf %68, %75 : vector<256x128xf32>
    %c1_73 = arith.constant 1 : index
    %c1_74 = arith.constant 1 : index
    %c0_75 = arith.constant 0 : index
    %c0_76 = arith.constant 0 : index
    %77 = vector.load %arg9[%c1_73, %c1_74, %c0_75, %c0_76] : memref<3x18x16x128xbf16, #tpu.memory_space<vmem>>, vector<1x16x16x128xbf16>
    %78 = vector.shape_cast %77 : vector<1x16x16x128xbf16> to vector<16x16x128xbf16>
    %79 = vector.shape_cast %78 : vector<16x16x128xbf16> to vector<256x128xbf16>
    %c0_i32_77 = arith.constant 0 : i32
    %c0_i32_78 = arith.constant 0 : i32
    %80 = tpu.memref_slice %arg3[%arg1, %c0_i32_77, %c0_i32_78] : memref<2x1152x128xbf16, #tpu.memory_space<vmem>> -> memref<1x1152x128xbf16, #tpu.memory_space<vmem>>
    %81 = tpu.memref_squeeze %80 : memref<1x1152x128xbf16, #tpu.memory_space<vmem>> -> memref<1152x128xbf16, #tpu.memory_space<vmem>>
    %c512 = arith.constant 512 : index
    %c0_79 = arith.constant 0 : index
    %82 = vector.load %81[%c512, %c0_79] : memref<1152x128xbf16, #tpu.memory_space<vmem>>, vector<128x128xbf16>
    %cst_80 = arith.constant dense<0.000000e+00> : vector<256x128xf32>
    %83 = tpu.matmul %79, %82, %cst_80 {dimension_numbers = #tpu.dot_dimension_numbers<[1], [0], [0], [1], [0, 0, 1, 1], [], []>} : vector<256x128xbf16>, vector<128x128xbf16>, vector<256x128xf32> -> vector<256x128xf32>
    %84 = arith.addf %76, %83 : vector<256x128xf32>
    %c2_81 = arith.constant 2 : index
    %c1_82 = arith.constant 1 : index
    %c0_83 = arith.constant 0 : index
    %c0_84 = arith.constant 0 : index
    %85 = vector.load %arg9[%c2_81, %c1_82, %c0_83, %c0_84] : memref<3x18x16x128xbf16, #tpu.memory_space<vmem>>, vector<1x16x16x128xbf16>
    %86 = vector.shape_cast %85 : vector<1x16x16x128xbf16> to vector<16x16x128xbf16>
    %87 = vector.shape_cast %86 : vector<16x16x128xbf16> to vector<256x128xbf16>
    %c0_i32_85 = arith.constant 0 : i32
    %c0_i32_86 = arith.constant 0 : i32
    %88 = tpu.memref_slice %arg3[%arg1, %c0_i32_85, %c0_i32_86] : memref<2x1152x128xbf16, #tpu.memory_space<vmem>> -> memref<1x1152x128xbf16, #tpu.memory_space<vmem>>
    %89 = tpu.memref_squeeze %88 : memref<1x1152x128xbf16, #tpu.memory_space<vmem>> -> memref<1152x128xbf16, #tpu.memory_space<vmem>>
    %c640 = arith.constant 640 : index
    %c0_87 = arith.constant 0 : index
    %90 = vector.load %89[%c640, %c0_87] : memref<1152x128xbf16, #tpu.memory_space<vmem>>, vector<128x128xbf16>
    %cst_88 = arith.constant dense<0.000000e+00> : vector<256x128xf32>
    %91 = tpu.matmul %87, %90, %cst_88 {dimension_numbers = #tpu.dot_dimension_numbers<[1], [0], [0], [1], [0, 0, 1, 1], [], []>} : vector<256x128xbf16>, vector<128x128xbf16>, vector<256x128xf32> -> vector<256x128xf32>
    %92 = arith.addf %84, %91 : vector<256x128xf32>
    %c0_89 = arith.constant 0 : index
    %c2_90 = arith.constant 2 : index
    %c0_91 = arith.constant 0 : index
    %c0_92 = arith.constant 0 : index
    %93 = vector.load %arg9[%c0_89, %c2_90, %c0_91, %c0_92] : memref<3x18x16x128xbf16, #tpu.memory_space<vmem>>, vector<1x16x16x128xbf16>
    %94 = vector.shape_cast %93 : vector<1x16x16x128xbf16> to vector<16x16x128xbf16>
    %95 = vector.shape_cast %94 : vector<16x16x128xbf16> to vector<256x128xbf16>
    %c0_i32_93 = arith.constant 0 : i32
    %c0_i32_94 = arith.constant 0 : i32
    %96 = tpu.memref_slice %arg3[%arg1, %c0_i32_93, %c0_i32_94] : memref<2x1152x128xbf16, #tpu.memory_space<vmem>> -> memref<1x1152x128xbf16, #tpu.memory_space<vmem>>
    %97 = tpu.memref_squeeze %96 : memref<1x1152x128xbf16, #tpu.memory_space<vmem>> -> memref<1152x128xbf16, #tpu.memory_space<vmem>>
    %c768 = arith.constant 768 : index
    %c0_95 = arith.constant 0 : index
    %98 = vector.load %97[%c768, %c0_95] : memref<1152x128xbf16, #tpu.memory_space<vmem>>, vector<128x128xbf16>
    %cst_96 = arith.constant dense<0.000000e+00> : vector<256x128xf32>
    %99 = tpu.matmul %95, %98, %cst_96 {dimension_numbers = #tpu.dot_dimension_numbers<[1], [0], [0], [1], [0, 0, 1, 1], [], []>} : vector<256x128xbf16>, vector<128x128xbf16>, vector<256x128xf32> -> vector<256x128xf32>
    %100 = arith.addf %92, %99 : vector<256x128xf32>
    %c1_97 = arith.constant 1 : index
    %c2_98 = arith.constant 2 : index
    %c0_99 = arith.constant 0 : index
    %c0_100 = arith.constant 0 : index
    %101 = vector.load %arg9[%c1_97, %c2_98, %c0_99, %c0_100] : memref<3x18x16x128xbf16, #tpu.memory_space<vmem>>, vector<1x16x16x128xbf16>
    %102 = vector.shape_cast %101 : vector<1x16x16x128xbf16> to vector<16x16x128xbf16>
    %103 = vector.shape_cast %102 : vector<16x16x128xbf16> to vector<256x128xbf16>
    %c0_i32_101 = arith.constant 0 : i32
    %c0_i32_102 = arith.constant 0 : i32
    %104 = tpu.memref_slice %arg3[%arg1, %c0_i32_101, %c0_i32_102] : memref<2x1152x128xbf16, #tpu.memory_space<vmem>> -> memref<1x1152x128xbf16, #tpu.memory_space<vmem>>
    %105 = tpu.memref_squeeze %104 : memref<1x1152x128xbf16, #tpu.memory_space<vmem>> -> memref<1152x128xbf16, #tpu.memory_space<vmem>>
    %c896 = arith.constant 896 : index
    %c0_103 = arith.constant 0 : index
    %106 = vector.load %105[%c896, %c0_103] : memref<1152x128xbf16, #tpu.memory_space<vmem>>, vector<128x128xbf16>
    %cst_104 = arith.constant dense<0.000000e+00> : vector<256x128xf32>
    %107 = tpu.matmul %103, %106, %cst_104 {dimension_numbers = #tpu.dot_dimension_numbers<[1], [0], [0], [1], [0, 0, 1, 1], [], []>} : vector<256x128xbf16>, vector<128x128xbf16>, vector<256x128xf32> -> vector<256x128xf32>
    %108 = arith.addf %100, %107 : vector<256x128xf32>
    %c2_105 = arith.constant 2 : index
    %c2_106 = arith.constant 2 : index
    %c0_107 = arith.constant 0 : index
    %c0_108 = arith.constant 0 : index
    %109 = vector.load %arg9[%c2_105, %c2_106, %c0_107, %c0_108] : memref<3x18x16x128xbf16, #tpu.memory_space<vmem>>, vector<1x16x16x128xbf16>
    %110 = vector.shape_cast %109 : vector<1x16x16x128xbf16> to vector<16x16x128xbf16>
    %111 = vector.shape_cast %110 : vector<16x16x128xbf16> to vector<256x128xbf16>
    %c0_i32_109 = arith.constant 0 : i32
    %c0_i32_110 = arith.constant 0 : i32
    %112 = tpu.memref_slice %arg3[%arg1, %c0_i32_109, %c0_i32_110] : memref<2x1152x128xbf16, #tpu.memory_space<vmem>> -> memref<1x1152x128xbf16, #tpu.memory_space<vmem>>
    %113 = tpu.memref_squeeze %112 : memref<1x1152x128xbf16, #tpu.memory_space<vmem>> -> memref<1152x128xbf16, #tpu.memory_space<vmem>>
    %c1024 = arith.constant 1024 : index
    %c0_111 = arith.constant 0 : index
    %114 = vector.load %113[%c1024, %c0_111] : memref<1152x128xbf16, #tpu.memory_space<vmem>>, vector<128x128xbf16>
    %cst_112 = arith.constant dense<0.000000e+00> : vector<256x128xf32>
    %115 = tpu.matmul %111, %114, %cst_112 {dimension_numbers = #tpu.dot_dimension_numbers<[1], [0], [0], [1], [0, 0, 1, 1], [], []>} : vector<256x128xbf16>, vector<128x128xbf16>, vector<256x128xf32> -> vector<256x128xf32>
    %116 = arith.addf %108, %115 : vector<256x128xf32>
    %117 = arith.index_cast %arg1 : i32 to index
    %c0_113 = arith.constant 0 : index
    %c0_114 = arith.constant 0 : index
    %118 = vector.load %arg4[%117, %c0_113, %c0_114] : memref<2x1x128xf32, #tpu.memory_space<vmem>>, vector<1x1x128xf32>
    %119 = vector.shape_cast %118 : vector<1x1x128xf32> to vector<1x128xf32>
    %120 = vector.broadcast %119 : vector<1x128xf32> to vector<256x128xf32>
    %121 = arith.addf %116, %120 : vector<256x128xf32>
    %cst_115 = arith.constant 0.000000e+00 : f32
    %122 = vector.broadcast %cst_115 : f32 to vector<256x128xf32>
    %123 = arith.maximumf %121, %122 : vector<256x128xf32>
    %124 = vector.shape_cast %123 : vector<256x128xf32> to vector<16x16x128xf32>
    %c0_i32_116 = arith.constant 0 : i32
    %125 = vector.broadcast %c0_i32_116 : i32 to vector<16x16x128xi32>
    %126 = arith.cmpi eq, %22, %125 : vector<16x16x128xi32>
    %c1_i32_117 = arith.constant 1 : i32
    %127 = tpu.dynamic_rotate %124 by %c1_i32_117 dim 1 : vector<16x16x128xf32>, i32 -> vector<16x16x128xf32>
    %cst_118 = arith.constant 0.000000e+00 : f32
    %128 = vector.broadcast %cst_118 : f32 to vector<16x16x128xf32>
    %129 = arith.select %126, %128, %127 : vector<16x16x128xi1>, vector<16x16x128xf32>
    %c15_i32_119 = arith.constant 15 : i32
    %130 = vector.broadcast %c15_i32_119 : i32 to vector<16x16x128xi32>
    %131 = arith.cmpi eq, %22, %130 : vector<16x16x128xi32>
    %c15_i32_120 = arith.constant 15 : i32
    %132 = tpu.dynamic_rotate %124 by %c15_i32_120 dim 1 : vector<16x16x128xf32>, i32 -> vector<16x16x128xf32>
    %cst_121 = arith.constant 0.000000e+00 : f32
    %133 = vector.broadcast %cst_121 : f32 to vector<16x16x128xf32>
    %134 = arith.select %131, %133, %132 : vector<16x16x128xi1>, vector<16x16x128xf32>
    %135 = arith.truncf %129 : vector<16x16x128xf32> to vector<16x16x128xbf16>
    %c0_122 = arith.constant 0 : index
    %c1_123 = arith.constant 1 : index
    %c0_124 = arith.constant 0 : index
    %c0_125 = arith.constant 0 : index
    %136 = vector.load %arg9[%c0_122, %c1_123, %c0_124, %c0_125] : memref<3x18x16x128xbf16, #tpu.memory_space<vmem>>, vector<1x16x16x128xbf16>
    %137 = vector.shape_cast %136 : vector<1x16x16x128xbf16> to vector<16x16x128xbf16>
    %138 = vector.shape_cast %135 : vector<16x16x128xbf16> to vector<1x16x16x128xbf16>
    tpu.vector_store %arg9[%c0_122, %c1_123, %c0_124, %c0_125], %138 {strides = array<i32>} : memref<3x18x16x128xbf16, #tpu.memory_space<vmem>>, vector<1x16x16x128xbf16>,
    %139 = arith.truncf %124 : vector<16x16x128xf32> to vector<16x16x128xbf16>
    %c1_126 = arith.constant 1 : index
    %c1_127 = arith.constant 1 : index
    %c0_128 = arith.constant 0 : index
    %c0_129 = arith.constant 0 : index
    %140 = vector.load %arg9[%c1_126, %c1_127, %c0_128, %c0_129] : memref<3x18x16x128xbf16, #tpu.memory_space<vmem>>, vector<1x16x16x128xbf16>
    %141 = vector.shape_cast %140 : vector<1x16x16x128xbf16> to vector<16x16x128xbf16>
    %142 = vector.shape_cast %139 : vector<16x16x128xbf16> to vector<1x16x16x128xbf16>
    tpu.vector_store %arg9[%c1_126, %c1_127, %c0_128, %c0_129], %142 {strides = array<i32>} : memref<3x18x16x128xbf16, #tpu.memory_space<vmem>>, vector<1x16x16x128xbf16>,
    %143 = arith.truncf %134 : vector<16x16x128xf32> to vector<16x16x128xbf16>
    %c2_130 = arith.constant 2 : index
    %c1_131 = arith.constant 1 : index
    %c0_132 = arith.constant 0 : index
    %c0_133 = arith.constant 0 : index
    %144 = vector.load %arg9[%c2_130, %c1_131, %c0_132, %c0_133] : memref<3x18x16x128xbf16, #tpu.memory_space<vmem>>, vector<1x16x16x128xbf16>
    %145 = vector.shape_cast %144 : vector<1x16x16x128xbf16> to vector<16x16x128xbf16>
    %146 = vector.shape_cast %143 : vector<16x16x128xbf16> to vector<1x16x16x128xbf16>
    tpu.vector_store %arg9[%c2_130, %c1_131, %c0_132, %c0_133], %146 {strides = array<i32>} : memref<3x18x16x128xbf16, #tpu.memory_space<vmem>>, vector<1x16x16x128xbf16>,
    %c0_134 = arith.constant 0 : index
    %c0_135 = arith.constant 0 : index
    %c0_136 = arith.constant 0 : index
    %c0_137 = arith.constant 0 : index
    %147 = vector.load %arg9[%c0_134, %c0_135, %c0_136, %c0_137] : memref<3x18x16x128xbf16, #tpu.memory_space<vmem>>, vector<1x16x16x128xbf16>
    %148 = vector.shape_cast %147 : vector<1x16x16x128xbf16> to vector<16x16x128xbf16>
    %149 = vector.shape_cast %148 : vector<16x16x128xbf16> to vector<256x128xbf16>
    %c0_i32_138 = arith.constant 0 : i32
    %c0_i32_139 = arith.constant 0 : i32
    %150 = tpu.memref_slice %arg5[%arg1, %c0_i32_138, %c0_i32_139] : memref<2x1152x128xbf16, #tpu.memory_space<vmem>> -> memref<1x1152x128xbf16, #tpu.memory_space<vmem>>
    %151 = tpu.memref_squeeze %150 : memref<1x1152x128xbf16, #tpu.memory_space<vmem>> -> memref<1152x128xbf16, #tpu.memory_space<vmem>>
    %c0_140 = arith.constant 0 : index
    %c0_141 = arith.constant 0 : index
    %152 = vector.load %151[%c0_140, %c0_141] : memref<1152x128xbf16, #tpu.memory_space<vmem>>, vector<128x128xbf16>
    %cst_142 = arith.constant dense<0.000000e+00> : vector<256x128xf32>
    %153 = tpu.matmul %149, %152, %cst_142 {dimension_numbers = #tpu.dot_dimension_numbers<[1], [0], [0], [1], [0, 0, 1, 1], [], []>} : vector<256x128xbf16>, vector<128x128xbf16>, vector<256x128xf32> -> vector<256x128xf32>
    %c1_143 = arith.constant 1 : index
    %c0_144 = arith.constant 0 : index
    %c0_145 = arith.constant 0 : index
    %c0_146 = arith.constant 0 : index
    %154 = vector.load %arg9[%c1_143, %c0_144, %c0_145, %c0_146] : memref<3x18x16x128xbf16, #tpu.memory_space<vmem>>, vector<1x16x16x128xbf16>
    %155 = vector.shape_cast %154 : vector<1x16x16x128xbf16> to vector<16x16x128xbf16>
    %156 = vector.shape_cast %155 : vector<16x16x128xbf16> to vector<256x128xbf16>
    %c0_i32_147 = arith.constant 0 : i32
    %c0_i32_148 = arith.constant 0 : i32
    %157 = tpu.memref_slice %arg5[%arg1, %c0_i32_147, %c0_i32_148] : memref<2x1152x128xbf16, #tpu.memory_space<vmem>> -> memref<1x1152x128xbf16, #tpu.memory_space<vmem>>
    %158 = tpu.memref_squeeze %157 : memref<1x1152x128xbf16, #tpu.memory_space<vmem>> -> memref<1152x128xbf16, #tpu.memory_space<vmem>>
    %c128_149 = arith.constant 128 : index
    %c0_150 = arith.constant 0 : index
    %159 = vector.load %158[%c128_149, %c0_150] : memref<1152x128xbf16, #tpu.memory_space<vmem>>, vector<128x128xbf16>
    %cst_151 = arith.constant dense<0.000000e+00> : vector<256x128xf32>
    %160 = tpu.matmul %156, %159, %cst_151 {dimension_numbers = #tpu.dot_dimension_numbers<[1], [0], [0], [1], [0, 0, 1, 1], [], []>} : vector<256x128xbf16>, vector<128x128xbf16>, vector<256x128xf32> -> vector<256x128xf32>
    %161 = arith.addf %153, %160 : vector<256x128xf32>
    %c2_152 = arith.constant 2 : index
    %c0_153 = arith.constant 0 : index
    %c0_154 = arith.constant 0 : index
    %c0_155 = arith.constant 0 : index
    %162 = vector.load %arg9[%c2_152, %c0_153, %c0_154, %c0_155] : memref<3x18x16x128xbf16, #tpu.memory_space<vmem>>, vector<1x16x16x128xbf16>
    %163 = vector.shape_cast %162 : vector<1x16x16x128xbf16> to vector<16x16x128xbf16>
    %164 = vector.shape_cast %163 : vector<16x16x128xbf16> to vector<256x128xbf16>
    %c0_i32_156 = arith.constant 0 : i32
    %c0_i32_157 = arith.constant 0 : i32
    %165 = tpu.memref_slice %arg5[%arg1, %c0_i32_156, %c0_i32_157] : memref<2x1152x128xbf16, #tpu.memory_space<vmem>> -> memref<1x1152x128xbf16, #tpu.memory_space<vmem>>
    %166 = tpu.memref_squeeze %165 : memref<1x1152x128xbf16, #tpu.memory_space<vmem>> -> memref<1152x128xbf16, #tpu.memory_space<vmem>>
    %c256_158 = arith.constant 256 : index
    %c0_159 = arith.constant 0 : index
    %167 = vector.load %166[%c256_158, %c0_159] : memref<1152x128xbf16, #tpu.memory_space<vmem>>, vector<128x128xbf16>
    %cst_160 = arith.constant dense<0.000000e+00> : vector<256x128xf32>
    %168 = tpu.matmul %164, %167, %cst_160 {dimension_numbers = #tpu.dot_dimension_numbers<[1], [0], [0], [1], [0, 0, 1, 1], [], []>} : vector<256x128xbf16>, vector<128x128xbf16>, vector<256x128xf32> -> vector<256x128xf32>
    %169 = arith.addf %161, %168 : vector<256x128xf32>
    %c0_161 = arith.constant 0 : index
    %c1_162 = arith.constant 1 : index
    %c0_163 = arith.constant 0 : index
    %c0_164 = arith.constant 0 : index
    %170 = vector.load %arg9[%c0_161, %c1_162, %c0_163, %c0_164] : memref<3x18x16x128xbf16, #tpu.memory_space<vmem>>, vector<1x16x16x128xbf16>
    %171 = vector.shape_cast %170 : vector<1x16x16x128xbf16> to vector<16x16x128xbf16>
    %172 = vector.shape_cast %171 : vector<16x16x128xbf16> to vector<256x128xbf16>
    %c0_i32_165 = arith.constant 0 : i32
    %c0_i32_166 = arith.constant 0 : i32
    %173 = tpu.memref_slice %arg5[%arg1, %c0_i32_165, %c0_i32_166] : memref<2x1152x128xbf16, #tpu.memory_space<vmem>> -> memref<1x1152x128xbf16, #tpu.memory_space<vmem>>
    %174 = tpu.memref_squeeze %173 : memref<1x1152x128xbf16, #tpu.memory_space<vmem>> -> memref<1152x128xbf16, #tpu.memory_space<vmem>>
    %c384_167 = arith.constant 384 : index
    %c0_168 = arith.constant 0 : index
    %175 = vector.load %174[%c384_167, %c0_168] : memref<1152x128xbf16, #tpu.memory_space<vmem>>, vector<128x128xbf16>
    %cst_169 = arith.constant dense<0.000000e+00> : vector<256x128xf32>
    %176 = tpu.matmul %172, %175, %cst_169 {dimension_numbers = #tpu.dot_dimension_numbers<[1], [0], [0], [1], [0, 0, 1, 1], [], []>} : vector<256x128xbf16>, vector<128x128xbf16>, vector<256x128xf32> -> vector<256x128xf32>
    %177 = arith.addf %169, %176 : vector<256x128xf32>
    %c1_170 = arith.constant 1 : index
    %c1_171 = arith.constant 1 : index
    %c0_172 = arith.constant 0 : index
    %c0_173 = arith.constant 0 : index
    %178 = vector.load %arg9[%c1_170, %c1_171, %c0_172, %c0_173] : memref<3x18x16x128xbf16, #tpu.memory_space<vmem>>, vector<1x16x16x128xbf16>
    %179 = vector.shape_cast %178 : vector<1x16x16x128xbf16> to vector<16x16x128xbf16>
    %180 = vector.shape_cast %179 : vector<16x16x128xbf16> to vector<256x128xbf16>
    %c0_i32_174 = arith.constant 0 : i32
    %c0_i32_175 = arith.constant 0 : i32
    %181 = tpu.memref_slice %arg5[%arg1, %c0_i32_174, %c0_i32_175] : memref<2x1152x128xbf16, #tpu.memory_space<vmem>> -> memref<1x1152x128xbf16, #tpu.memory_space<vmem>>
    %182 = tpu.memref_squeeze %181 : memref<1x1152x128xbf16, #tpu.memory_space<vmem>> -> memref<1152x128xbf16, #tpu.memory_space<vmem>>
    %c512_176 = arith.constant 512 : index
    %c0_177 = arith.constant 0 : index
    %183 = vector.load %182[%c512_176, %c0_177] : memref<1152x128xbf16, #tpu.memory_space<vmem>>, vector<128x128xbf16>
    %cst_178 = arith.constant dense<0.000000e+00> : vector<256x128xf32>
    %184 = tpu.matmul %180, %183, %cst_178 {dimension_numbers = #tpu.dot_dimension_numbers<[1], [0], [0], [1], [0, 0, 1, 1], [], []>} : vector<256x128xbf16>, vector<128x128xbf16>, vector<256x128xf32> -> vector<256x128xf32>
    %185 = arith.addf %177, %184 : vector<256x128xf32>
    %c2_179 = arith.constant 2 : index
    %c1_180 = arith.constant 1 : index
    %c0_181 = arith.constant 0 : index
    %c0_182 = arith.constant 0 : index
    %186 = vector.load %arg9[%c2_179, %c1_180, %c0_181, %c0_182] : memref<3x18x16x128xbf16, #tpu.memory_space<vmem>>, vector<1x16x16x128xbf16>
    %187 = vector.shape_cast %186 : vector<1x16x16x128xbf16> to vector<16x16x128xbf16>
    %188 = vector.shape_cast %187 : vector<16x16x128xbf16> to vector<256x128xbf16>
    %c0_i32_183 = arith.constant 0 : i32
    %c0_i32_184 = arith.constant 0 : i32
    %189 = tpu.memref_slice %arg5[%arg1, %c0_i32_183, %c0_i32_184] : memref<2x1152x128xbf16, #tpu.memory_space<vmem>> -> memref<1x1152x128xbf16, #tpu.memory_space<vmem>>
    %190 = tpu.memref_squeeze %189 : memref<1x1152x128xbf16, #tpu.memory_space<vmem>> -> memref<1152x128xbf16, #tpu.memory_space<vmem>>
    %c640_185 = arith.constant 640 : index
    %c0_186 = arith.constant 0 : index
    %191 = vector.load %190[%c640_185, %c0_186] : memref<1152x128xbf16, #tpu.memory_space<vmem>>, vector<128x128xbf16>
    %cst_187 = arith.constant dense<0.000000e+00> : vector<256x128xf32>
    %192 = tpu.matmul %188, %191, %cst_187 {dimension_numbers = #tpu.dot_dimension_numbers<[1], [0], [0], [1], [0, 0, 1, 1], [], []>} : vector<256x128xbf16>, vector<128x128xbf16>, vector<256x128xf32> -> vector<256x128xf32>
    %193 = arith.addf %185, %192 : vector<256x128xf32>
    %c0_188 = arith.constant 0 : index
    %c2_189 = arith.constant 2 : index
    %c0_190 = arith.constant 0 : index
    %c0_191 = arith.constant 0 : index
    %194 = vector.load %arg9[%c0_188, %c2_189, %c0_190, %c0_191] : memref<3x18x16x128xbf16, #tpu.memory_space<vmem>>, vector<1x16x16x128xbf16>
    %195 = vector.shape_cast %194 : vector<1x16x16x128xbf16> to vector<16x16x128xbf16>
    %196 = vector.shape_cast %195 : vector<16x16x128xbf16> to vector<256x128xbf16>
    %c0_i32_192 = arith.constant 0 : i32
    %c0_i32_193 = arith.constant 0 : i32
    %197 = tpu.memref_slice %arg5[%arg1, %c0_i32_192, %c0_i32_193] : memref<2x1152x128xbf16, #tpu.memory_space<vmem>> -> memref<1x1152x128xbf16, #tpu.memory_space<vmem>>
    %198 = tpu.memref_squeeze %197 : memref<1x1152x128xbf16, #tpu.memory_space<vmem>> -> memref<1152x128xbf16, #tpu.memory_space<vmem>>
    %c768_194 = arith.constant 768 : index
    %c0_195 = arith.constant 0 : index
    %199 = vector.load %198[%c768_194, %c0_195] : memref<1152x128xbf16, #tpu.memory_space<vmem>>, vector<128x128xbf16>
    %cst_196 = arith.constant dense<0.000000e+00> : vector<256x128xf32>
    %200 = tpu.matmul %196, %199, %cst_196 {dimension_numbers = #tpu.dot_dimension_numbers<[1], [0], [0], [1], [0, 0, 1, 1], [], []>} : vector<256x128xbf16>, vector<128x128xbf16>, vector<256x128xf32> -> vector<256x128xf32>
    %201 = arith.addf %193, %200 : vector<256x128xf32>
    %c1_197 = arith.constant 1 : index
    %c2_198 = arith.constant 2 : index
    %c0_199 = arith.constant 0 : index
    %c0_200 = arith.constant 0 : index
    %202 = vector.load %arg9[%c1_197, %c2_198, %c0_199, %c0_200] : memref<3x18x16x128xbf16, #tpu.memory_space<vmem>>, vector<1x16x16x128xbf16>
    %203 = vector.shape_cast %202 : vector<1x16x16x128xbf16> to vector<16x16x128xbf16>
    %204 = vector.shape_cast %203 : vector<16x16x128xbf16> to vector<256x128xbf16>
    %c0_i32_201 = arith.constant 0 : i32
    %c0_i32_202 = arith.constant 0 : i32
    %205 = tpu.memref_slice %arg5[%arg1, %c0_i32_201, %c0_i32_202] : memref<2x1152x128xbf16, #tpu.memory_space<vmem>> -> memref<1x1152x128xbf16, #tpu.memory_space<vmem>>
    %206 = tpu.memref_squeeze %205 : memref<1x1152x128xbf16, #tpu.memory_space<vmem>> -> memref<1152x128xbf16, #tpu.memory_space<vmem>>
    %c896_203 = arith.constant 896 : index
    %c0_204 = arith.constant 0 : index
    %207 = vector.load %206[%c896_203, %c0_204] : memref<1152x128xbf16, #tpu.memory_space<vmem>>, vector<128x128xbf16>
    %cst_205 = arith.constant dense<0.000000e+00> : vector<256x128xf32>
    %208 = tpu.matmul %204, %207, %cst_205 {dimension_numbers = #tpu.dot_dimension_numbers<[1], [0], [0], [1], [0, 0, 1, 1], [], []>} : vector<256x128xbf16>, vector<128x128xbf16>, vector<256x128xf32> -> vector<256x128xf32>
    %209 = arith.addf %201, %208 : vector<256x128xf32>
    %c2_206 = arith.constant 2 : index
    %c2_207 = arith.constant 2 : index
    %c0_208 = arith.constant 0 : index
    %c0_209 = arith.constant 0 : index
    %210 = vector.load %arg9[%c2_206, %c2_207, %c0_208, %c0_209] : memref<3x18x16x128xbf16, #tpu.memory_space<vmem>>, vector<1x16x16x128xbf16>
    %211 = vector.shape_cast %210 : vector<1x16x16x128xbf16> to vector<16x16x128xbf16>
    %212 = vector.shape_cast %211 : vector<16x16x128xbf16> to vector<256x128xbf16>
    %c0_i32_210 = arith.constant 0 : i32
    %c0_i32_211 = arith.constant 0 : i32
    %213 = tpu.memref_slice %arg5[%arg1, %c0_i32_210, %c0_i32_211] : memref<2x1152x128xbf16, #tpu.memory_space<vmem>> -> memref<1x1152x128xbf16, #tpu.memory_space<vmem>>
    %214 = tpu.memref_squeeze %213 : memref<1x1152x128xbf16, #tpu.memory_space<vmem>> -> memref<1152x128xbf16, #tpu.memory_space<vmem>>
    %c1024_212 = arith.constant 1024 : index
    %c0_213 = arith.constant 0 : index
    %215 = vector.load %214[%c1024_212, %c0_213] : memref<1152x128xbf16, #tpu.memory_space<vmem>>, vector<128x128xbf16>
    %cst_214 = arith.constant dense<0.000000e+00> : vector<256x128xf32>
    %216 = tpu.matmul %212, %215, %cst_214 {dimension_numbers = #tpu.dot_dimension_numbers<[1], [0], [0], [1], [0, 0, 1, 1], [], []>} : vector<256x128xbf16>, vector<128x128xbf16>, vector<256x128xf32> -> vector<256x128xf32>
    %217 = arith.addf %209, %216 : vector<256x128xf32>
    %218 = arith.index_cast %arg1 : i32 to index
    %c0_215 = arith.constant 0 : index
    %c0_216 = arith.constant 0 : index
    %219 = vector.load %arg6[%218, %c0_215, %c0_216] : memref<2x1x128xf32, #tpu.memory_space<vmem>>, vector<1x1x128xf32>
    %220 = vector.shape_cast %219 : vector<1x1x128xf32> to vector<1x128xf32>
    %221 = vector.broadcast %220 : vector<1x128xf32> to vector<256x128xf32>
    %222 = arith.addf %217, %221 : vector<256x128xf32>
    %223 = vector.shape_cast %23 : vector<16x16x128xf32> to vector<256x128xf32>
    %224 = arith.addf %222, %223 : vector<256x128xf32>
    %cst_217 = arith.constant 0.000000e+00 : f32
    %225 = vector.broadcast %cst_217 : f32 to vector<256x128xf32>
    %226 = arith.maximumf %224, %225 : vector<256x128xf32>
    %227 = vector.shape_cast %226 : vector<256x128xf32> to vector<16x16x128xf32>
    %c0_218 = arith.constant 0 : index
    %c0_219 = arith.constant 0 : index
    %c0_220 = arith.constant 0 : index
    %228 = vector.load %arg8[%c0_218, %c0_219, %c0_220] : memref<16x16x128xf32, #tpu.memory_space<vmem>>, vector<16x16x128xf32>
    tpu.vector_store %arg8[%c0_218, %c0_219, %c0_220], %227 {strides = array<i32>} : memref<16x16x128xf32, #tpu.memory_space<vmem>>, vector<16x16x128xf32>,
    %c1_i32_221 = arith.constant 1 : i32
    %229 = arith.cmpi eq, %arg1, %c1_i32_221 : i32
    %230 = arith.extui %229 : i1 to i32
    %c0_i32_222 = arith.constant 0 : i32
    %231 = arith.cmpi ne, %230, %c0_i32_222 : i32
    scf.if %231 {
      %c0_223 = arith.constant 0 : index
      %c0_224 = arith.constant 0 : index
      %c0_225 = arith.constant 0 : index
      %c0_226 = arith.constant 0 : index
      %232 = vector.load %arg7[%c0_223, %c0_224, %c0_225, %c0_226] : memref<1x16x16x128xf32, #tpu.memory_space<vmem>>, vector<1x16x16x128xf32>
      %233 = vector.shape_cast %232 : vector<1x16x16x128xf32> to vector<16x16x128xf32>
      %234 = vector.shape_cast %227 : vector<16x16x128xf32> to vector<1x16x16x128xf32>
      tpu.vector_store %arg7[%c0_223, %c0_224, %c0_225, %c0_226], %234 {strides = array<i32>} : memref<1x16x16x128xf32, #tpu.memory_space<vmem>>, vector<1x16x16x128xf32>,
    } else {
    }
    return
  }
  func.func @transform_0(%arg0: i32, %arg1: i32) -> (i32, i32, i32, i32) {
    %c0_i32 = arith.constant 0 : i32
    %c0_i32_0 = arith.constant 0 : i32
    %c0_i32_1 = arith.constant 0 : i32
    %c0_i32_2 = arith.constant 0 : i32
    return %arg0, %c0_i32, %c0_i32_0, %c0_i32_1 : i32, i32, i32, i32
  }
  func.func @transform_1(%arg0: i32, %arg1: i32) -> (i32, i32, i32) {
    %c0_i32 = arith.constant 0 : i32
    %c0_i32_0 = arith.constant 0 : i32
    %c0_i32_1 = arith.constant 0 : i32
    %c0_i32_2 = arith.constant 0 : i32
    return %c0_i32, %c0_i32_0, %c0_i32_1 : i32, i32, i32
  }
  func.func @transform_2(%arg0: i32, %arg1: i32) -> (i32, i32, i32) {
    %c0_i32 = arith.constant 0 : i32
    %c0_i32_0 = arith.constant 0 : i32
    %c0_i32_1 = arith.constant 0 : i32
    %c0_i32_2 = arith.constant 0 : i32
    return %c0_i32, %c0_i32_0, %c0_i32_1 : i32, i32, i32
  }
  func.func @transform_3(%arg0: i32, %arg1: i32) -> (i32, i32, i32) {
    %c0_i32 = arith.constant 0 : i32
    %c0_i32_0 = arith.constant 0 : i32
    %c0_i32_1 = arith.constant 0 : i32
    %c0_i32_2 = arith.constant 0 : i32
    return %c0_i32, %c0_i32_0, %c0_i32_1 : i32, i32, i32
  }
  func.func @transform_4(%arg0: i32, %arg1: i32) -> (i32, i32, i32) {
    %c0_i32 = arith.constant 0 : i32
    %c0_i32_0 = arith.constant 0 : i32
    %c0_i32_1 = arith.constant 0 : i32
    %c0_i32_2 = arith.constant 0 : i32
    return %c0_i32, %c0_i32_0, %c0_i32_1 : i32, i32, i32
  }
  func.func @transform_5(%arg0: i32, %arg1: i32) -> (i32, i32, i32, i32) {
    %c0_i32 = arith.constant 0 : i32
    %c0_i32_0 = arith.constant 0 : i32
    %c0_i32_1 = arith.constant 0 : i32
    %c0_i32_2 = arith.constant 0 : i32
    return %arg0, %c0_i32, %c0_i32_0, %c0_i32_1 : i32, i32, i32, i32
  }
}

</mosaic_0001>

<bundles_post_ra>
// kernel: tpu_custom_call.1
= control target key start
LH: loop header
LB: loop body
LE: loop exit
PB: predicated region body
PF: predicated region fallthrough
CT: control target
= control target key end

     0   :  { %s11424_s0 = inlined_call_operand.hbm [shape: f32[2,16,16,128], index: 0, kind: input, shape index: {}]   ;;  %s11425_s1 = inlined_call_operand.hbm [shape: bf16[2,1152,128], index: 1, kind: input, shape index: {}]   ;;  %s11426_s2 = inlined_call_operand.vmem [shape: f32[2,1,128], index: 2, kind: input, shape index: {}]   ;;  %s11427_s3 = inlined_call_operand.hbm [shape: bf16[2,1152,128], index: 3, kind: input, shape index: {}]   ;;  %s11428_s4 = inlined_call_operand.vmem [shape: f32[2,1,128], index: 4, kind: input, shape index: {}]   ;;  %s11429_s5 = inlined_call_operand.hbm [shape: f32[2,16,16,128], index: 5, kind: output, shape index: {}]  }
   0x1   :  { %11478 = sst [smem:[#allocation26_spill]] %s11425_s1 }
   0x2   :  { %10 = vsyncpa [#allocation5], 0 }
   0x3   :  { %12 = vsyncpa [#allocation5 + $0x1], 0 }
   0x4   :  { %13 = vsyncpa [#allocation8], 0 }
   0x5   :  { %14 = vsyncpa [#allocation6], 0 }
   0x6   :  { %16 = vsyncpa [#allocation6 + $0x1], 0  ;;  %s9379_s18 = smov 0   ;;  %s9381_s19 = smov 0  }
   0x7   :  { %s9383_s20 = smov 0   ;;  %s9385_s21 = smov 0  }
   0x8   :  { %s9387_s22 = smov 0   ;;  %s9389_s23 = smov 0  }
   0x9   :  { %s9391_s24 = smov 0   ;;  %s9393_s25 = smov 0  }
   0xa LB: > { %11479 = sst [smem:[#allocation14_spill]] %s9307_s18  ;;  %s6145_s26 = sadd.s32 4294967295, %s9335_s25   ;;  %s9335_s25 = sphi %s9393_s25, %s22_s25   ;;  %s9331_s24 = sphi %s9391_s24, %s11550_s24   ;;  %s9327_s23 = sphi %s9389_s23, %s11549_s23   ;;  %s9323_s22 = sphi %s9387_s22, %s11548_s22   ;;  %s9319_s21 = sphi %s9385_s21, %s11547_s21   ;;  %s9315_s20 = sphi %s9383_s20, %s11546_s20   ;;  %s9311_s19 = sphi %s9381_s19, %s11545_s19   ;;  %s9307_s18 = sphi %s9379_s18, %s11544_s18  }
   0xb   : > { %s6146_s27 = sadd.s32 4294967294, %s9335_s25   ;;  %p54_p0 = scmp.ne.s32.totalorder %s9311_s19, %s9307_s18 }
   0xc   : > { %p9423_p1 = scmp.eq.s32.totalorder %s6145_s26, 0  ;;  %p9427_p2 = scmp.eq.s32.totalorder %s6145_s26, 3 }
   0xd   : > { %p168_p3 = scmp.eq.s32.totalorder %s6146_s27, 3  ;;  %p6147_p5 = scmp.ge.s32.totalorder %s9335_s25, 1 }
   0xe   : > { %s11480_s28 = scalar_select %p9423_p1, 1, 0 }
   0xf   : > { %s11481_s29 = scalar_select %p9427_p2, 1, 0 }
  0x10   : > { %p9433_p4 = por %p9423_p1, %p54_p0  ;;  %p9438_p6 = por %p168_p3, %p54_p0 }
  0x11   : > { %p175_p7 = scmp.lt.s32.totalorder %s9335_s25, 5  ;;  %s9337_s8 = smov [#allocation7]  }
  0x12   : > { %s11482_s30 = scalar_select %p9433_p4, 1, 0 }
  0x13   : > { %s11483_s6 = scalar_select %p9438_p6, 1, 0 }
  0x14   : > { %p9443_p8 = pnand %p6147_p5, %p175_p7  ;;  %s187_s9 = sshll.u32 %s9337_s8, 4  ;;  %s188_s9 = int_to_ptr.vmem [resolvable:$true] %s187_s9 }
  0x15   : > { %11484 = sst [smem:[#allocation15_spill]] %s11483_s6  ;;  %s9338_s11 = smov [#allocation9]  }
  0x16   : > { %s11485_s7 = scalar_select %p9443_p8, 1, 0 }
  0x17   : > { %p8874_p9 = pneg %p9443_p8  ;;  %s203_s12 = sshll.u32 %s9338_s11, 4  ;;  %s9455_s12 = int_to_ptr.vmem [resolvable:$true] %s203_s12 }
  0x18   : > { %s11487_s1 = sld [smem:[#allocation26_spill]] }
  0x19   : > { %p9451_p10 = pnand %p8874_p9, %p9423_p1 }
  0x1b   : > { %p9149_p12 = pneg %p9451_p10 }
  0x1e   : > { %s9147_s15 = scalar_lea.hbm %s11487_s1, 18432 }
  0x1f   : > { %p9148_p11 = scmp.ne.s32.totalorder %s11487_s1, %s9147_s15  ;;  %p9154_p3 = scmp.lt.u32.totalorder %s9147_s15, %s11487_s1 }
  0x21   : > { %p9150_p13 = pnand %p9149_p12, %p9148_p11 }
  0x23   : > { %p9151_p0 = pneg %p9150_p13 }
  0x25   : > { %p9156_p5 = pnand %p9154_p3, %p9151_p0 }
  0x27   : > { %9159 = shalt.err (!%p9156_p5)
}
  0x28   : > { %s9160_s8 = scalar_lea.vmem %s188_s9, 18432  ;;  %p9168_p1 = scmp.lt.s32.totalorder %s188_s9, %s188_s9 }
  0x29   : > { %p9161_p7 = scmp.ne.s32.totalorder %s188_s9, %s9160_s8  ;;  %p9169_p4 = scmp.lt.s32.totalorder %s9160_s8, %s9160_s8 }
  0x2b   : > { %p9163_p9 = pnand %p9161_p7, %p9149_p12  ;;  %p9170_p8 = por %p9169_p4, %p9168_p1 }
  0x2d   : > { %p9164_p6 = pneg %p9163_p9 }
  0x2f   : > { %p9171_p2 = pnand %p9170_p8, %p9164_p6 }
  0x31   : > { %9174 = shalt.err (!%p9171_p2)
}
  0x32   : > { %s9339_s11 = smov 64   ;;  %s9340_s13 = smov 4  }
  0x33   : > { %8877 = dma.hbm_to_vmem [thread:$0]  (!%p9451_p10), %s11487_s1, 18432, %s188_s9, [#allocation8], %s9339_s11, %s9339_s11, %s9340_s13  }
  0x34   : > { %s9175_s26 = scalar_lea.hbm %s11427_s3, 18432 }
  0x35   : > { %p9176_p11 = scmp.ne.s32.totalorder %s11427_s3, %s9175_s26  ;;  %p9182_p4 = scmp.lt.u32.totalorder %s9175_s26, %s11427_s3 }
  0x37   : > { %p9178_p1 = pnand %p9176_p11, %p9149_p12 }
  0x39   : > { %p9179_p2 = pneg %p9178_p1 }
  0x3b   : > { %p9184_p6 = pnand %p9182_p4, %p9179_p2 }
  0x3d   : > { %9187 = shalt.err (!%p9184_p6)
}
  0x3e   : > { %s9188_s9 = scalar_lea.vmem %s9455_s12, 18432  ;;  %p9196_p3 = scmp.lt.s32.totalorder %s9455_s12, %s9455_s12 }
  0x3f   : > { %p9189_p8 = scmp.ne.s32.totalorder %s9455_s12, %s9188_s9  ;;  %p9197_p5 = scmp.lt.s32.totalorder %s9188_s9, %s9188_s9 }
  0x41   : > { %p9191_p13 = pnand %p9189_p8, %p9149_p12  ;;  %p9198_p7 = por %p9197_p5, %p9196_p3 }
  0x43   : > { %p9192_p0 = pneg %p9191_p13 }
  0x45   : > { %p9199_p9 = pnand %p9198_p7, %p9192_p0 }
  0x47   : > { %9202 = shalt.err (!%p9199_p9)
}
  0x48   : > { %8880 = dma.hbm_to_vmem [thread:$0]  (!%p9451_p10), %s11427_s3, 18432, %s9455_s12, [#allocation8], %s9339_s11, %s9339_s11, %s9340_s13  }
  0x49   : > { %s31_s14 = sadd.s32 1, %s9327_s23  ;;  %s34_s15 = sadd.s32 1, %s9331_s24 }
  0x4a   : > { %p32_p12 = scmp.ge.s32.totalorder %s31_s14, 2  ;;  %s41_s10 = sadd.s32 1, %s9315_s20 }
  0x4b   : > { %p48_p11 = scmp.ne.s32.totalorder %s9315_s20, %s9311_s19  ;;  %p49_p1 = scmp.eq.s32.totalorder %s9335_s25, 0 }
  0x4c   : > { %s11552_s14 = smov (%p32_p12, %s31_s14), 0  ;;  %s11554_s15 = smov (!%p32_p12, %s34_s15), %s9331_s24 }
  0x4d   : > { %p9513_p2 = por %p49_p1, %p48_p11  ;;  %p11489_p4 = scmp.ne.s32.totalorder %s11481_s29, 0 }
  0x4e   : > { %p36_p10 = scmp.ge.s32.totalorder %s11554_s15, 2  ;;  %p8891_p8 = scmp.lt.s32.totalorder %s9335_s25, 4 }
  0x4f   : > { %p9519_p6 = por %p11489_p4, %p48_p11  ;;  %s220_s12 = sand.u32 1, %s9315_s20  }
  0x50   : > { %s6314_s11 = sshll.u32 %s9331_s24, 12  ;;  %s11556_s15 = smov (%p36_p10, %s11554_s15), 0 }
  0x51   : > { %s6151_s13 = sshll.u32 %s220_s12, 8  ;;  %s38_s26 = ssub.s32 %s9331_s24, %s11556_s15 }
  0x52   : > { %p39_p13 = scmp.eq.s32.totalorder %s38_s26, 0  ;;  %s9533_s9 = scalar_lea.hbm %s11424_s0, %s6314_s11 }
  0x53   : > { %s224_s29 = scalar_lea.vmem [#allocation4], %s6151_s13  ;;  %p9537_p0 = pnand %p8891_p8, %p9513_p2 }
  0x54   : > { %s231_s18 = sshll.u32 %s224_s29, 4  ;;  %s9546_s26 = scalar_lea.sflag [#allocation5], %s220_s12  ;;  %s9544_s18 = int_to_ptr.vmem [resolvable:$true] %s231_s18 }
  0x55   : > { %s9542_s1 = scalar_select %p39_p13, %s9315_s20, %s41_s10  }
  0x56   : > { %s9203_s11 = scalar_lea.hbm %s9533_s9, 4096  ;;  %p9205_p5 = pneg %p9537_p0 }
  0x57   : > { %p9204_p3 = scmp.ne.s32.totalorder %s9533_s9, %s9203_s11  ;;  %s9208_s27 = scalar_lea.hbm %s11424_s0, 8192 }
  0x58   : > { %p9209_p12 = scmp.lt.u32.totalorder %s9533_s9, %s11424_s0  ;;  %p9210_p11 = scmp.lt.u32.totalorder %s9208_s27, %s9203_s11 }
  0x59   : > { %p9206_p7 = pnand %p9205_p5, %p9204_p3  ;;  %p9212_p2 = scmp.lt.u32.totalorder %s9203_s11, %s9533_s9 }
  0x5a   : > { %p9211_p1 = por %p9210_p11, %p9209_p12 }
  0x5b   : > { %p9207_p9 = pneg %p9206_p7 }
  0x5c   : > { %p9213_p4 = por %p9212_p2, %p9211_p1 }
  0x5e   : > { %p9214_p10 = pnand %p9213_p4, %p9207_p9 }
  0x60   : > { %9217 = shalt.err (!%p9214_p10)
}
  0x61   : > { %s9218_s10 = scalar_lea.vmem %s9544_s18, 4096  ;;  %s9341_s12 = smov [#allocation4]  }
  0x62   : > { %p9219_p8 = scmp.ne.s32.totalorder %s9544_s18, %s9218_s10  ;;  %s9223_s16 = sshll.u32 %s9341_s12, 4  ;;  %s9224_s16 = int_to_ptr.vmem [resolvable:$false] %s9223_s16 }
  0x63   : > { %s9225_s13 = scalar_lea.vmem %s9224_s16, 8192  ;;  %p9226_p7 = scmp.lt.s32.totalorder %s9544_s18, %s9224_s16 }
  0x64   : > { %p9221_p13 = pnand %p9219_p8, %p9205_p5  ;;  %p9227_p12 = scmp.lt.s32.totalorder %s9225_s13, %s9218_s10 }
  0x66   : > { %p9222_p3 = pneg %p9221_p13  ;;  %p9228_p11 = por %p9227_p12, %p9226_p7 }
  0x68   : > { %p9229_p1 = pnand %p9228_p11, %p9222_p3 }
  0x6a   : > { %9232 = shalt.err (!%p9229_p1)
}
  0x6b   : > { %s9342_s11 = smov 128   ;;  %s9343_s27 = smov 8  }
  0x6c   : > { %8884 = dma.hbm_to_vmem [thread:$0]  (!%p9537_p0), %s9533_s9, 4096, %s9544_s18, %s9546_s26, %s9342_s11, %s9342_s11, %s9343_s27  }
  0x6d   : > { %p11492_p5 = scmp.ne.s32.totalorder %s11485_s7, 0 }
  0x6f   : > { %243 = sbr.rel (%p11492_p5) target bundleno = 1728 (0x6c0), region = 40 }
  0x76   : > { %s9577_s8 = sand.u32 1, %s9311_s19   ;;  %p11493_p9 = scmp.ne.s32.totalorder %s11482_s30, 0 }
  0x77   : > { %s6155_s29 = sshll.u32 %s9577_s8, 8  ;;  %s246_s10 = scalar_lea.sflag [#allocation5], %s9577_s8 }
  0x78   : > { %s9581_s12 = scalar_lea.vmem [#allocation4], %s6155_s29 }
  0x79   : > { %9294 = dma.done.wait (%p11493_p9), %s246_s10, 4096  }
  0x7a   : > { %9296 = vsyncadd (%p11493_p9), %s246_s10, 4294963200  ;;  %p11494_p0 = scmp.ne.s32.totalorder %s11480_s28, 0 }
  0x7c   : > { %9298 = dma.done.wait (%p11494_p0), [#allocation8], 36864  }
  0x7d   : > { %9300 = vsyncadd (%p11494_p0), [#allocation8], 4294930432  ;;  %s9591_s7 = scalar_lea.vmem [#allocation10], %s6155_s29  ;;  %p6159_p2 = scmp.ne.s32.totalorder %s9319_s21, 0 }
  0x7e   : > { %v289_v0 = vld [vmem:[%s9581_s12] sm:$0xff] (!%p6159_p2)  ;;  %v290_v1 = vld [vmem:[%s9581_s12 + $0x8] sm:$0xff] (!%p6159_p2)  ;;  %v291_v2 = vld [vmem:[%s9581_s12 + $0x10] sm:$0xff] (!%p6159_p2) }
  0x7f   : > { %288 = sbr.rel (%p6159_p2) target bundleno = 143 (0x8f), region = 56  ;;  %321 = vst [vmem:[#allocation2] sm:$0xff] (!%p6159_p2), %v289_v0  ;;  %322 = vst [vmem:[#allocation2 + $0x8] sm:$0xff] (!%p6159_p2), %v290_v1  ;;  %v292_v3 = vld [vmem:[%s9581_s12 + $0x18] sm:$0xff] (!%p6159_p2)  ;;  %v293_v4 = vld [vmem:[%s9581_s12 + $0x20] sm:$0xff] (!%p6159_p2) }
  0x80   : > { %323 = vst [vmem:[#allocation2 + $0x10] sm:$0xff] (!%p6159_p2), %v291_v2  ;;  %v294_v5 = vld [vmem:[%s9581_s12 + $0x28] sm:$0xff] (!%p6159_p2)  ;;  %324 = vst [vmem:[#allocation2 + $0x18] sm:$0xff] (!%p6159_p2), %v292_v3  ;;  %v295_v6 = vld [vmem:[%s9581_s12 + $0x30] sm:$0xff] (!%p6159_p2) }
  0x81   : > { %325 = vst [vmem:[#allocation2 + $0x20] sm:$0xff] (!%p6159_p2), %v293_v4  ;;  %326 = vst [vmem:[#allocation2 + $0x28] sm:$0xff] (!%p6159_p2), %v294_v5  ;;  %v296_v7 = vld [vmem:[%s9581_s12 + $0x38] sm:$0xff] (!%p6159_p2)  ;;  %v297_v8 = vld [vmem:[%s9581_s12 + $0x40] sm:$0xff] (!%p6159_p2) }
  0x82   : > { %327 = vst [vmem:[#allocation2 + $0x30] sm:$0xff] (!%p6159_p2), %v295_v6  ;;  %328 = vst [vmem:[#allocation2 + $0x38] sm:$0xff] (!%p6159_p2), %v296_v7  ;;  %v298_v9 = vld [vmem:[%s9581_s12 + $0x48] sm:$0xff] (!%p6159_p2)  ;;  %v299_v10 = vld [vmem:[%s9581_s12 + $0x50] sm:$0xff] (!%p6159_p2) }
  0x83   : > { %329 = vst [vmem:[#allocation2 + $0x40] sm:$0xff] (!%p6159_p2), %v297_v8  ;;  %v300_v11 = vld [vmem:[%s9581_s12 + $0x58] sm:$0xff] (!%p6159_p2)  ;;  %330 = vst [vmem:[#allocation2 + $0x48] sm:$0xff] (!%p6159_p2), %v298_v9  ;;  %v301_v12 = vld [vmem:[%s9581_s12 + $0x60] sm:$0xff] (!%p6159_p2) }
  0x84   : > { %331 = vst [vmem:[#allocation2 + $0x50] sm:$0xff] (!%p6159_p2), %v299_v10  ;;  %332 = vst [vmem:[#allocation2 + $0x58] sm:$0xff] (!%p6159_p2), %v300_v11  ;;  %v302_v13 = vld [vmem:[%s9581_s12 + $0x68] sm:$0xff] (!%p6159_p2)  ;;  %v303_v14 = vld [vmem:[%s9581_s12 + $0x70] sm:$0xff] (!%p6159_p2) }
  0x85   : > { %333 = vst [vmem:[#allocation2 + $0x60] sm:$0xff] (!%p6159_p2), %v301_v12  ;;  %334 = vst [vmem:[#allocation2 + $0x68] sm:$0xff] (!%p6159_p2), %v302_v13  ;;  %v304_v15 = vld [vmem:[%s9581_s12 + $0x78] sm:$0xff] (!%p6159_p2)  ;;  %v305_v16 = vld [vmem:[%s9581_s12 + $0x80] sm:$0xff] (!%p6159_p2) }
  0x86   : > { %335 = vst [vmem:[#allocation2 + $0x70] sm:$0xff] %v303_v14  ;;  %v306_v17 = vld [vmem:[%s9581_s12 + $0x88] sm:$0xff]  ;;  %336 = vst [vmem:[#allocation2 + $0x78] sm:$0xff] %v304_v15  ;;  %v307_v18 = vld [vmem:[%s9581_s12 + $0x90] sm:$0xff] }
  0x87   : > { %337 = vst [vmem:[#allocation2 + $0x80] sm:$0xff] %v305_v16  ;;  %338 = vst [vmem:[#allocation2 + $0x88] sm:$0xff] %v306_v17  ;;  %v308_v19 = vld [vmem:[%s9581_s12 + $0x98] sm:$0xff]  ;;  %v309_v20 = vld [vmem:[%s9581_s12 + $0xa0] sm:$0xff] }
  0x88   : > { %339 = vst [vmem:[#allocation2 + $0x90] sm:$0xff] %v307_v18  ;;  %340 = vst [vmem:[#allocation2 + $0x98] sm:$0xff] %v308_v19  ;;  %v310_v21 = vld [vmem:[%s9581_s12 + $0xa8] sm:$0xff]  ;;  %v311_v22 = vld [vmem:[%s9581_s12 + $0xb0] sm:$0xff] }
  0x89   : > { %341 = vst [vmem:[#allocation2 + $0xa0] sm:$0xff] %v309_v20  ;;  %v312_v23 = vld [vmem:[%s9581_s12 + $0xb8] sm:$0xff]  ;;  %342 = vst [vmem:[#allocation2 + $0xa8] sm:$0xff] %v310_v21  ;;  %v313_v24 = vld [vmem:[%s9581_s12 + $0xc0] sm:$0xff] }
  0x8a   : > { %343 = vst [vmem:[#allocation2 + $0xb0] sm:$0xff] %v311_v22  ;;  %344 = vst [vmem:[#allocation2 + $0xb8] sm:$0xff] %v312_v23  ;;  %v314_v25 = vld [vmem:[%s9581_s12 + $0xc8] sm:$0xff]  ;;  %v315_v26 = vld [vmem:[%s9581_s12 + $0xd0] sm:$0xff] }
  0x8b   : > { %345 = vst [vmem:[#allocation2 + $0xc0] sm:$0xff] %v313_v24  ;;  %346 = vst [vmem:[#allocation2 + $0xc8] sm:$0xff] %v314_v25  ;;  %v316_v27 = vld [vmem:[%s9581_s12 + $0xd8] sm:$0xff]  ;;  %v317_v28 = vld [vmem:[%s9581_s12 + $0xe0] sm:$0xff] }
  0x8c   : > { %347 = vst [vmem:[#allocation2 + $0xd0] sm:$0xff] %v315_v26  ;;  %v318_v29 = vld [vmem:[%s9581_s12 + $0xe8] sm:$0xff]  ;;  %348 = vst [vmem:[#allocation2 + $0xd8] sm:$0xff] %v316_v27  ;;  %v319_v30 = vld [vmem:[%s9581_s12 + $0xf0] sm:$0xff] }
  0x8d   : > { %349 = vst [vmem:[#allocation2 + $0xe0] sm:$0xff] %v317_v28  ;;  %350 = vst [vmem:[#allocation2 + $0xe8] sm:$0xff] %v318_v29  ;;  %v320_v31 = vld [vmem:[%s9581_s12 + $0xf8] sm:$0xff] }
  0x8e   : > { %351 = vst [vmem:[#allocation2 + $0xf0] sm:$0xff] %v319_v30  ;;  %352 = vst [vmem:[#allocation2 + $0xf8] sm:$0xff] %v320_v31 }
  0x8f PF: > { %s6315_s28 = smul.u32 576, %s9319_s21  ;;  %v364_v32 = vlaneseq  ;;  %v11436_v33 = vmov 0   ;;  %vm9345_vm1 = vmmov 1   ;;  %v9649_v45 = vld [vmem:[#allocation2] sm:$0xff]  ;;  %v9651_v46 = vld [vmem:[#allocation2 + $0x8] sm:$0xff]  ;;  %v9732_v15 = vld [vmem:[#allocation2 + $0x90] sm:$0xff]  ;;  %s3095_s26 = scalar_lea.vmem %s11426_s2, %s9319_s21 }
  0x90   : > { %7502 = vmatprep.mubr.bf16.mxu0 %v11436_v33  ;;  %7934 = vmatprep.mubr.bf16.mxu1 %v11436_v33  ;;  %v9653_v47 = vld [vmem:[#allocation2 + $0x10] sm:$0xff]  ;;  %v9655_v48 = vld [vmem:[#allocation2 + $0x18] sm:$0xff]  ;;  %v9660_v50 = vpack.c.bf16 %v9651_v46, %v9649_v45  ;;  %v9727_v13 = vld [vmem:[#allocation2 + $0x80] sm:$0xff]  ;;  %s5850_s11 = scalar_lea.vmem %s11428_s4, %s9319_s21  ;;  %p6308_p4 = scmp.ne.s32.totalorder %s9319_s21, 1 }
  0x91   : > { %s9631_s30 = scalar_lea.vmem [#allocation7], %s6315_s28  ;;  %v9634_v35 = vshrl.u32 %v364_v32, 7  ;;  %v9664_v51 = vpack.c.bf16 %v9655_v48, %v9653_v47  ;;  %v9667_v53 = vld [vmem:[#allocation2 + $0x20] sm:$0xff]  ;;  %v9669_v54 = vld [vmem:[#allocation2 + $0x28] sm:$0xff]  ;;  %v9734_v16 = vld [vmem:[#allocation2 + $0x98] sm:$0xff]  ;;  %s10366_s9 = scalar_lea.vmem [#allocation9], %s6315_s28 }
  0x92   : > { %v8971_v34 = vld [vmem:[%s9631_s30 + $0x40] sm:$0xff]   ;;  %v8972_v36 = vld [vmem:[%s9631_s30 + $0x48] sm:$0xff]   ;;  %v8973_v38 = vld [vmem:[%s9631_s30 + $0x50] sm:$0xff]   ;;  %v9680_v58 = vpack.c.bf16 %v9669_v54, %v9667_v53  ;;  %v9744_v19 = vpack.c.bf16 %v9734_v16, %v9732_v15 }
  0x93   : > { %7486 = vmatprep.subr.bf16.mxu0 %v8971_v34  ;;  %v366_v37 = vadd.s32 8, %v9634_v35  ;;  %v8974_v39 = vld [vmem:[%s9631_s30 + $0x58] sm:$0xff]   ;;  %v8975_v40 = vld [vmem:[%s9631_s30 + $0x60] sm:$0xff]   ;;  %v8976_v41 = vld [vmem:[%s9631_s30 + $0x68] sm:$0xff]   ;;  %vm433_vm3 = vcmp.lt.s32.totalorder %v9634_v35, 1  ;;  %vm8894_vm4 = vcmp.ne.s32.totalorder %v9634_v35, 0 }
  0x94   : > { %7487 = vmatpush3.bf16.msra.mxu0 %v8971_v34  ;;  %v8977_v42 = vld [vmem:[%s9631_s30 + $0x70] sm:$0xff]   ;;  %v8978_v43 = vld [vmem:[%s9631_s30 + $0x78] sm:$0xff]   ;;  %v8979_v49 = vld [vmem:[%s9631_s30] sm:$0xff]   ;;  %11501 = vst [vmem:[#allocation20_spill] sm:$0xff] %v9744_v19  ;;  %vm532_vm6 = vcmp.lt.s32.totalorder %v9634_v35, 7 }
  0x95   : > { %7488 = vmatprep.subr.bf16.mxu0 %v8972_v36  ;;  %vm8895_vm0 = vcmp.ne.s32.totalorder %v366_v37, 15  ;;  %v8980_v52 = vld [vmem:[%s9631_s30 + $0x8] sm:$0xff]   ;;  %v9672_v55 = vld [vmem:[#allocation2 + $0x30] sm:$0xff]  ;;  %v9675_v56 = vld [vmem:[#allocation2 + $0x38] sm:$0xff]  ;;  %v401_v37 = vrot.slane %v9649_v45, 7 }
  0x96   : > { %vm9645_vm2 = vmpackc.low %vm8895_vm0, %vm9345_vm1  ;;  %v8981_v57 = vld [vmem:[%s9631_s30 + $0x10] sm:$0xff]   ;;  %v8982_v59 = vld [vmem:[%s9631_s30 + $0x18] sm:$0xff]   ;;  %v9685_v60 = vpack.c.bf16 %v9675_v56, %v9672_v55 }
  0x97   : > { %v9687_v61 = vld [vmem:[#allocation2 + $0x40] sm:$0xff]  ;;  %v9689_v62 = vld [vmem:[#allocation2 + $0x48] sm:$0xff]  ;;  %v9692_v63 = vld [vmem:[#allocation2 + $0x50] sm:$0xff] }
  0x98   : > { %7489 = vmatpush3.bf16.msra.mxu0 %v8972_v36  ;;  %v9694_v0 = vld [vmem:[#allocation2 + $0x58] sm:$0xff]  ;;  %v8983_v1 = vld [vmem:[%s9631_s30 + $0x20] sm:$0xff]   ;;  %v9700_v2 = vpack.c.bf16 %v9689_v62, %v9687_v61  ;;  %v8984_v3 = vld [vmem:[%s9631_s30 + $0x28] sm:$0xff]  }
  0x99   : > { %7490 = vmatprep.subr.bf16.mxu0 %v8973_v38  ;;  %v9705_v4 = vpack.c.bf16 %v9694_v0, %v9692_v63  ;;  %v9707_v5 = vld [vmem:[#allocation2 + $0x60] sm:$0xff]  ;;  %v9709_v6 = vld [vmem:[#allocation2 + $0x68] sm:$0xff]  ;;  %v9712_v7 = vld [vmem:[#allocation2 + $0x70] sm:$0xff] }
  0x9a   : > { %v9714_v8 = vld [vmem:[#allocation2 + $0x78] sm:$0xff]  ;;  %v8985_v9 = vld [vmem:[%s9631_s30 + $0x30] sm:$0xff]   ;;  %v9720_v10 = vpack.c.bf16 %v9709_v6, %v9707_v5  ;;  %v9729_v14 = vld [vmem:[#allocation2 + $0x88] sm:$0xff] }
  0x9b   : > { %11497 = vst [vmem:[#allocation16_spill] sm:$0xff] %v9705_v4  ;;  %v8986_v11 = vld [vmem:[%s9631_s30 + $0x38] sm:$0xff]   ;;  %v9725_v12 = vpack.c.bf16 %v9714_v8, %v9712_v7  ;;  %v8987_v17 = vld [vmem:[%s9631_s30 + $0x80] sm:$0xff]   ;;  %v9740_v18 = vpack.c.bf16 %v9729_v14, %v9727_v13  ;;  %v9749_v21 = vld [vmem:[#allocation2 + $0xa8] sm:$0xff] }
  0x9c   : > { %7491 = vmatpush3.bf16.msra.mxu0 %v8973_v38  ;;  %11498 = vst [vmem:[#allocation17_spill] sm:$0xff] %v9720_v10  ;;  %v9746_v20 = vld [vmem:[#allocation2 + $0xa0] sm:$0xff]  ;;  %v9751_v22 = vld [vmem:[#allocation2 + $0xb0] sm:$0xff]  ;;  %v9754_v23 = vld [vmem:[#allocation2 + $0xb8] sm:$0xff]  ;;  %v417_v38 = vrot.slane %v9651_v46, 7 }
  0x9d   : > { %7492 = vmatprep.subr.bf16.mxu0 %v8974_v39  ;;  %11499 = vst [vmem:[#allocation18_spill] sm:$0xff] %v9725_v12  ;;  %11500 = vst [vmem:[#allocation19_spill] sm:$0xff] %v9740_v18  ;;  %v9758_v24 = vpack.c.bf16 %v9749_v21, %v9746_v20  ;;  %v9762_v25 = vpack.c.bf16 %v9754_v23, %v9751_v22  ;;  %v9766_v26 = vld [vmem:[#allocation2 + $0xc0] sm:$0xff]  ;;  %v9768_v27 = vld [vmem:[#allocation2 + $0xc8] sm:$0xff] }
  0x9e   : > { %v9770_v28 = vld [vmem:[#allocation2 + $0xd0] sm:$0xff]  ;;  %v9772_v29 = vld [vmem:[#allocation2 + $0xd8] sm:$0xff]  ;;  %v9776_v30 = vpack.c.bf16 %v9768_v27, %v9766_v26  ;;  %v9784_v32 = vld [vmem:[#allocation2 + $0xe0] sm:$0xff] }
  0x9f   : > { %11502 = vst [vmem:[#allocation21_spill] sm:$0xff] %v9758_v24  ;;  %11503 = vst [vmem:[#allocation22_spill] sm:$0xff] %v9762_v25  ;;  %v9780_v31 = vpack.c.bf16 %v9772_v29, %v9770_v28  ;;  %v9786_v34 = vld [vmem:[#allocation2 + $0xe8] sm:$0xff]  ;;  %v9061_v35 = vld [vmem:[%s10366_s9 + $0x90] sm:$0xff]  }
  0xa0   : > { %7493 = vmatpush3.bf16.msra.mxu0 %v8974_v39  ;;  %11504 = vst [vmem:[#allocation23_spill] sm:$0xff] %v9776_v30  ;;  %v9790_v36 = vpack.c.bf16 %v9786_v34, %v9784_v32  ;;  %v402_v39 = vrot.slane %v9653_v47, 7  ;;  %vm9811_vm5 = vmpackc.low %vm9345_vm1, %vm8894_vm4 }
  0xa1   : > { %7494 = vmatprep.subr.bf16.mxu0 %v8975_v40  ;;  %11505 = vst [vmem:[#allocation24_spill] sm:$0xff] %v9780_v31 }
  0xa2   : > { %11506 = vst [vmem:[#allocation25_spill] sm:$0xff] %v9790_v36 }
  0xa4   : > { %7495 = vmatpush3.bf16.msra.mxu0 %v8975_v40  ;;  %v418_v40 = vrot.slane %v9655_v48, 7 }
  0xa5   : > { %7496 = vmatprep.subr.bf16.mxu0 %v8976_v41 }
  0xa8   : > { %7497 = vmatpush3.bf16.msra.mxu0 %v8976_v41  ;;  %v434_v41 = vsel %vm433_vm3, %v401_v37, %v417_v38 }
  0xa9   : > { %7498 = vmatprep.subr.bf16.mxu0 %v8977_v42 }
  0xac   : > { %7499 = vmatpush3.bf16.msra.mxu0 %v8977_v42  ;;  %v450_v42 = vsel %vm433_vm3, %v417_v38, %v401_v37  ;;  %v420_v37 = vrot.slane %v9675_v56, 7 }
  0xad   : > { %7500 = vmatprep.subr.bf16.mxu0 %v8978_v43 }
  0xb0   : > { %7501 = vmatpush3.bf16.msra.mxu0 %v8978_v43  ;;  %v435_v43 = vsel %vm433_vm3, %v402_v39, %v418_v40 }
  0xb1   : > { %7534 = vmatprep.subr.bf16.mxu0 %v8979_v49 }
  0xb3   : > { %7503 = vmatmul.mubr.bf16.vlgmr.msra.gmra.mrb[0].mxu0 %v9660_v50 }
  0xb4   : > { %7535 = vmatpush3.bf16.msra.mxu0 %v8979_v49  ;;  %7506 = vmatprep.mubr.bf16.mxu0 %v9664_v51  ;;  %v451_v49 = vsel %vm433_vm3, %v418_v40, %v402_v39 }
  0xb5   : > { %7536 = vmatprep.subr.bf16.mxu0 %v8980_v52 }
  0xb8   : > { %7537 = vmatpush3.bf16.msra.mxu0 %v8980_v52  ;;  %v9808_v52 = vpack.c.bf16 %v434_v41, %v450_v42  ;;  %v8989_v42 = vld [vmem:[%s9631_s30 + $0x90] sm:$0xff]  }
  0xb9   : > { %7538 = vmatprep.subr.bf16.mxu0 %v8981_v57 }
  0xbb   : > { %7507 = vmatmul.mubr.bf16.gmra.mrb[4].mxu0 %v9680_v58 }
  0xbc   : > { %7510 = vmatprep.mubr.bf16.mxu0 %v9685_v60  ;;  %7539 = vmatpush3.bf16.msra.mxu0 %v8981_v57  ;;  %v9111_v57 = vld [vmem:[%s10366_s9 + $0x220] sm:$0xff]  }
  0xbd   : > { %7540 = vmatprep.subr.bf16.mxu0 %v8982_v59 }
  0xc0   : > { %7541 = vmatpush3.bf16.msra.mxu0 %v8982_v59  ;;  %v9815_v59 = vpack.c.bf16 %v435_v43, %v451_v49  ;;  %v405_v49 = vrot.slane %v9687_v61, 7 }
  0xc1   : > { %7542 = vmatprep.subr.bf16.mxu0 %v8983_v1 }
  0xc3   : > { %7511 = vmatmul.mubr.bf16.gmra.mrb[8].mxu0 %v9700_v2 }
  0xc4   : > { %7514 = vmatprep.mubr.bf16.mxu0 %v9705_v4  ;;  %7543 = vmatpush3.bf16.msra.mxu0 %v8983_v1  ;;  %v403_v1 = vrot.slane %v9667_v53, 7  ;;  %v503_v4 = vrot.slane %v9672_v55, 1 }
  0xc5   : > { %7544 = vmatprep.subr.bf16.mxu0 %v8984_v3 }
  0xc8   : > { %7545 = vmatpush3.bf16.msra.mxu0 %v8984_v3  ;;  %v419_v3 = vrot.slane %v9669_v54, 7 }
  0xc9   : > { %7546 = vmatprep.subr.bf16.mxu0 %v8985_v9 }
  0xca   : > { %v436_v38 = vsel %vm433_vm3, %v403_v1, %v419_v3  ;;  %v452_v39 = vsel %vm433_vm3, %v419_v3, %v403_v1  ;;  %v406_v1 = vrot.slane %v9692_v63, 7  ;;  %v422_v3 = vrot.slane %v9694_v0, 7 }
  0xcb   : > { %7515 = vmatmul.mubr.bf16.gmra.mrb[12].mxu0 %v9720_v10  ;;  %v430_v10 = vrot.slane %v9772_v29, 7 }
  0xcc   : > { %7518 = vmatprep.mubr.bf16.mxu0 %v9725_v12  ;;  %7547 = vmatpush3.bf16.msra.mxu0 %v8985_v9  ;;  %v8988_v9 = vld [vmem:[%s9631_s30 + $0x88] sm:$0xff]   ;;  %v414_v12 = vrot.slane %v9770_v28, 7 }
  0xcd   : > { %7548 = vmatprep.subr.bf16.mxu0 %v8986_v11 }
  0xd0   : > { %7549 = vmatpush3.bf16.msra.mxu0 %v8986_v11  ;;  %v404_v11 = vrot.slane %v9672_v55, 7 }
  0xd1   : > { %7582 = vmatprep.subr.bf16.mxu0 %v8987_v17 }
  0xd2   : > { %v437_v40 = vsel %vm433_vm3, %v404_v11, %v420_v37  ;;  %v453_v41 = vsel %vm433_vm3, %v420_v37, %v404_v11  ;;  %v439_v37 = vsel %vm433_vm3, %v406_v1, %v422_v3 }
  0xd3   : > { %7519 = vmatmul.mubr.bf16.gmra.mrb[16].mxu0 %v9740_v18  ;;  %v9839_v43 = vpack.c.bf16 %v437_v40, %v453_v41  ;;  %v427_v18 = vrot.slane %v9749_v21, 7 }
  0xd4   : > { %7522 = vmatprep.mubr.bf16.mxu0 %v9744_v19  ;;  %v411_v19 = vrot.slane %v9746_v20, 7 }
  0xdb   : > { %7523 = vmatmul.mubr.bf16.gmra.mrb[20].mxu0 %v9758_v24  ;;  %v425_v24 = vrot.slane %v9729_v14, 7 }
  0xdc   : > { %7526 = vmatprep.mubr.bf16.mxu0 %v9762_v25  ;;  %v409_v25 = vrot.slane %v9727_v13, 7 }
  0xe3   : > { %7527 = vmatmul.mubr.bf16.gmra.mrb[24].mxu0 %v9776_v30  ;;  %v423_v30 = vrot.slane %v9709_v6, 7 }
  0xe4   : > { %7530 = vmatprep.mubr.bf16.mxu0 %v9780_v31  ;;  %v407_v31 = vrot.slane %v9707_v5, 7 }
  0xeb   : > { %7531 = vmatmul.mubr.bf16.gmra.mrb[28].mxu0 %v9790_v36  ;;  %v8990_v36 = vld [vmem:[%s9631_s30 + $0x98] sm:$0xff]  }
  0xec   : > { %7550 = vmatprep.mubr.bf16.mxu0 %v11436_v33  ;;  %v421_v33 = vrot.slane %v9689_v62, 7 }
  0xee   : > { %v454_v11 = vsel %vm433_vm3, %v421_v33, %v405_v49 }
  0xf3   : > { %7551 = vmatmul.mubr.msk.bf16.vlgmr.msra.gmra.mrb[0].mxu0 %vm9811_vm5, %v9808_v52 }
  0xf4   : > { %7583 = vmatpush3.bf16.msra.mxu0 %v8987_v17  ;;  %7554 = vmatprep.mubr.msk.bf16.mxu0 %vm9811_vm5, %v9815_v59  ;;  %v9837_v17 = vpack.c.bf16 %v436_v38, %v452_v39  ;;  %v455_v38 = vsel %vm433_vm3, %v422_v3, %v406_v1  ;;  %v8991_v39 = vld [vmem:[%s9631_s30 + $0xa0] sm:$0xff]   ;;  %v440_v1 = vsel %vm433_vm3, %v407_v31, %v423_v30 }
  0xf5   : > { %7584 = vmatprep.subr.bf16.mxu0 %v8988_v9  ;;  %v9863_v41 = vpack.c.bf16 %v439_v37, %v455_v38 }
  0xf8   : > { %7585 = vmatpush3.bf16.msra.mxu0 %v8988_v9  ;;  %v438_v9 = vsel %vm433_vm3, %v405_v49, %v421_v33  ;;  %v408_v33 = vrot.slane %v9712_v7, 7  ;;  %v8992_v49 = vld [vmem:[%s9631_s30 + $0xa8] sm:$0xff]  }
  0xf9   : > { %7586 = vmatprep.subr.bf16.mxu0 %v8989_v42  ;;  %v9861_v40 = vpack.c.bf16 %v438_v9, %v454_v11  ;;  %v8993_v11 = vld [vmem:[%s9631_s30 + $0xb0] sm:$0xff]  }
  0xfb   : > { %7555 = vmatmul.mubr.msk.bf16.gmra.mrb[4].mxu0 %vm9811_vm5, %v9837_v17 }
  0xfc   : > { %7558 = vmatprep.mubr.msk.bf16.mxu0 %vm9811_vm5, %v9839_v43  ;;  %7587 = vmatpush3.bf16.msra.mxu0 %v8989_v42  ;;  %v424_v42 = vrot.slane %v9714_v8, 7 }
  0xfd   : > { %7588 = vmatprep.subr.bf16.mxu0 %v8990_v36 }
  0xfe   : > { %v441_v3 = vsel %vm433_vm3, %v408_v33, %v424_v42  ;;  %v457_v9 = vsel %vm433_vm3, %v424_v42, %v408_v33  ;;  %v442_v33 = vsel %vm433_vm3, %v409_v25, %v425_v24  ;;  %v458_v42 = vsel %vm433_vm3, %v425_v24, %v409_v25 }
  0xff   : > { %v9887_v38 = vpack.c.bf16 %v441_v3, %v457_v9  ;;  %v9909_v3 = vpack.c.bf16 %v442_v33, %v458_v42  ;;  %v412_v24 = vrot.slane %v9751_v22, 7  ;;  %v428_v25 = vrot.slane %v9754_v23, 7 }
 0x100   : > { %7589 = vmatpush3.bf16.msra.mxu0 %v8990_v36  ;;  %v456_v36 = vsel %vm433_vm3, %v423_v30, %v407_v31  ;;  %v410_v30 = vrot.slane %v9732_v15, 7  ;;  %v426_v31 = vrot.slane %v9734_v16, 7 }
 0x101   : > { %7590 = vmatprep.subr.bf16.mxu0 %v8991_v39  ;;  %v9885_v37 = vpack.c.bf16 %v440_v1, %v456_v36  ;;  %v8995_v36 = vld [vmem:[%s9631_s30 + $0xc0] sm:$0xff]  }
 0x102   : > { %v459_v1 = vsel %vm433_vm3, %v426_v31, %v410_v30 }
 0x103   : > { %7559 = vmatmul.mubr.msk.bf16.gmra.mrb[8].mxu0 %vm9811_vm5, %v9861_v40 }
 0x104   : > { %7562 = vmatprep.mubr.msk.bf16.mxu0 %vm9811_vm5, %v9863_v41  ;;  %7591 = vmatpush3.bf16.msra.mxu0 %v8991_v39  ;;  %v8994_v39 = vld [vmem:[%s9631_s30 + $0xb8] sm:$0xff]  }
 0x105   : > { %7592 = vmatprep.subr.bf16.mxu0 %v8992_v49 }
 0x108   : > { %7593 = vmatpush3.bf16.msra.mxu0 %v8992_v49  ;;  %v443_v49 = vsel %vm433_vm3, %v410_v30, %v426_v31  ;;  %v460_v30 = vsel %vm433_vm3, %v427_v18, %v411_v19  ;;  %v445_v31 = vsel %vm433_vm3, %v412_v24, %v428_v25 }
 0x109   : > { %7594 = vmatprep.subr.bf16.mxu0 %v8993_v11  ;;  %v9911_v9 = vpack.c.bf16 %v443_v49, %v459_v1  ;;  %v413_v49 = vrot.slane %v9766_v26, 7  ;;  %v429_v1 = vrot.slane %v9768_v27, 7 }
 0x10b   : > { %7563 = vmatmul.mubr.msk.bf16.gmra.mrb[12].mxu0 %vm9811_vm5, %v9885_v37 }
 0x10c   : > { %7566 = vmatprep.mubr.msk.bf16.mxu0 %vm9811_vm5, %v9887_v38  ;;  %7595 = vmatpush3.bf16.msra.mxu0 %v8993_v11  ;;  %v444_v11 = vsel %vm433_vm3, %v411_v19, %v427_v18  ;;  %v446_v18 = vsel %vm433_vm3, %v413_v49, %v429_v1  ;;  %v462_v19 = vsel %vm433_vm3, %v429_v1, %v413_v49  ;;  %v500_v1 = vrot.slane %v9649_v45, 1 }
 0x10d   : > { %7596 = vmatprep.subr.bf16.mxu0 %v8994_v39  ;;  %v9931_v33 = vpack.c.bf16 %v444_v11, %v460_v30  ;;  %v9953_v11 = vpack.c.bf16 %v446_v18, %v462_v19  ;;  %v516_v18 = vrot.slane %v9651_v46, 1  ;;  %v501_v19 = vrot.slane %v9653_v47, 1 }
 0x10f   : > { %v549_v45 = vsel %vm532_vm6, %v516_v18, %v500_v1 }
 0x110   : > { %7597 = vmatpush3.bf16.msra.mxu0 %v8994_v39  ;;  %v461_v39 = vsel %vm433_vm3, %v428_v25, %v412_v24  ;;  %v447_v24 = vsel %vm433_vm3, %v414_v12, %v430_v10  ;;  %v463_v25 = vsel %vm433_vm3, %v430_v10, %v414_v12 }
 0x111   : > { %7630 = vmatprep.subr.bf16.mxu0 %v8995_v36  ;;  %v9933_v42 = vpack.c.bf16 %v445_v31, %v461_v39  ;;  %v9955_v30 = vpack.c.bf16 %v447_v24, %v463_v25  ;;  %v415_v31 = vrot.slane %v9784_v32, 7  ;;  %v431_v39 = vrot.slane %v9786_v34, 7 }
 0x112   : > { %v517_v24 = vrot.slane %v9655_v48, 1  ;;  %v11509_v25 = vmov 0  }
 0x113   : > { %7567 = vmatmul.mubr.msk.bf16.gmra.mrb[16].mxu0 %vm9811_vm5, %v9909_v3  ;;  %v448_v49 = vsel %vm433_vm3, %v415_v31, %v431_v39  ;;  %v464_v10 = vsel %vm433_vm3, %v431_v39, %v415_v31  ;;  %v533_v31 = vsel %vm532_vm6, %v500_v1, %v516_v18  ;;  %v519_v1 = vrot.slane %v9675_v56, 1  ;;  %v8997_v18 = vld [vmem:[%s9631_s30 + $0xd0] sm:$0xff]  }
 0x114   : > { %7570 = vmatprep.mubr.msk.bf16.mxu0 %vm9811_vm5, %v9911_v9  ;;  %v9969_v12 = vpack.c.bf16 %v448_v49, %v464_v10  ;;  %v534_v46 = vsel %vm532_vm6, %v501_v19, %v517_v24  ;;  %v550_v47 = vsel %vm532_vm6, %v517_v24, %v501_v19  ;;  %v9988_v48 = vpack.c.bf16 %v549_v45, %v533_v31 }
 0x115   : > { %v9990_v39 = vpack.c.bf16 %v550_v47, %v534_v46  ;;  %v502_v49 = vrot.slane %v9667_v53, 1  ;;  %v518_v10 = vrot.slane %v9669_v54, 1  ;;  %v536_v55 = vsel %vm532_vm6, %v503_v4, %v519_v1  ;;  %v8998_v47 = vld [vmem:[%s9631_s30 + $0xd8] sm:$0xff]  }
 0x116   : > { %v552_v56 = vsel %vm532_vm6, %v519_v1, %v503_v4  ;;  %v504_v24 = vrot.slane %v9687_v61, 1  ;;  %v520_v31 = vrot.slane %v9689_v62, 1  ;;  %v505_v45 = vrot.slane %v9692_v63, 1  ;;  %v8999_v4 = vld [vmem:[%s9631_s30 + $0xe0] sm:$0xff]  }
 0x117   : > { %v535_v53 = vsel %vm532_vm6, %v502_v49, %v518_v10  ;;  %v551_v54 = vsel %vm532_vm6, %v518_v10, %v502_v49  ;;  %v10014_v19 = vpack.c.bf16 %v552_v56, %v536_v55  ;;  %v521_v46 = vrot.slane %v9694_v0, 1  ;;  %v9000_v55 = vld [vmem:[%s9631_s30 + $0xe8] sm:$0xff]   ;;  %v9001_v56 = vld [vmem:[%s9631_s30 + $0xf0] sm:$0xff]  }
 0x118   : > { %v537_v61 = vsel %vm532_vm6, %v504_v24, %v520_v31  ;;  %v553_v62 = vsel %vm532_vm6, %v520_v31, %v504_v24  ;;  %v506_v10 = vrot.slane %v9707_v5, 1  ;;  %v522_v1 = vrot.slane %v9709_v6, 1 }
 0x119   : > { %v538_v63 = vsel %vm532_vm6, %v505_v45, %v521_v46  ;;  %v554_v0 = vsel %vm532_vm6, %v521_v46, %v505_v45  ;;  %v508_v31 = vrot.slane %v9727_v13, 1  ;;  %v524_v45 = vrot.slane %v9729_v14, 1 }
 0x11a   : > { %v10038_v49 = vpack.c.bf16 %v554_v0, %v538_v63  ;;  %v539_v5 = vsel %vm532_vm6, %v506_v10, %v522_v1  ;;  %v555_v6 = vsel %vm532_vm6, %v522_v1, %v506_v10  ;;  %v509_v46 = vrot.slane %v9732_v15, 1 }
 0x11b   : > { %7571 = vmatmul.mubr.msk.bf16.gmra.mrb[20].mxu0 %vm9811_vm5, %v9931_v33  ;;  %v541_v13 = vsel %vm532_vm6, %v508_v31, %v524_v45  ;;  %v557_v14 = vsel %vm532_vm6, %v524_v45, %v508_v31  ;;  %v526_v10 = vrot.slane %v9749_v21, 1  ;;  %v511_v1 = vrot.slane %v9751_v22, 1 }
 0x11c   : > { %7574 = vmatprep.mubr.msk.bf16.mxu0 %vm9811_vm5, %v9933_v42  ;;  %v10084_v63 = vpack.c.bf16 %v557_v14, %v541_v13  ;;  %v514_v45 = vrot.slane %v9784_v32, 1  ;;  %v9004_v32 = vld [vmem:[%s9631_s30 + $0x108] sm:$0xff]   ;;  %v9006_v14 = vld [vmem:[%s9631_s30 + $0x118] sm:$0xff]  }
 0x123   : > { %7575 = vmatmul.mubr.msk.bf16.gmra.mrb[24].mxu0 %vm9811_vm5, %v9953_v11 }
 0x124   : > { %7578 = vmatprep.mubr.msk.bf16.mxu0 %vm9811_vm5, %v9955_v30 }
 0x12b   : > { %7579 = vmatmul.mubr.msk.bf16.gmra.mrb[28].mxu0 %vm9811_vm5, %v9969_v12 }
 0x12c   : > { %7598 = vmatprep.mubr.bf16.mxu0 %v11509_v25  ;;  %v8996_v25 = vld [vmem:[%s9631_s30 + $0xc8] sm:$0xff]  }
 0x133   : > { %7599 = vmatmul.mubr.msk.bf16.vlgmr.msra.gmra.mrb[0].mxu0 %vm9645_vm2, %v9988_v48 }
 0x134   : > { %7631 = vmatpush3.bf16.msra.mxu0 %v8995_v36  ;;  %7602 = vmatprep.mubr.msk.bf16.mxu0 %vm9645_vm2, %v9990_v39  ;;  %v10012_v36 = vpack.c.bf16 %v551_v54, %v535_v53  ;;  %v507_v53 = vrot.slane %v9712_v7, 1  ;;  %v523_v54 = vrot.slane %v9714_v8, 1 }
 0x135   : > { %7632 = vmatprep.subr.bf16.mxu0 %v8996_v25 }
 0x136   : > { %v540_v7 = vsel %vm532_vm6, %v507_v53, %v523_v54  ;;  %v556_v8 = vsel %vm532_vm6, %v523_v54, %v507_v53  ;;  %v527_v53 = vrot.slane %v9754_v23, 1 }
 0x137   : > { %v10062_v24 = vpack.c.bf16 %v556_v8, %v540_v7  ;;  %v513_v7 = vrot.slane %v9770_v28, 1  ;;  %v529_v8 = vrot.slane %v9772_v29, 1 }
 0x138   : > { %7633 = vmatpush3.bf16.msra.mxu0 %v8996_v25  ;;  %v10036_v25 = vpack.c.bf16 %v553_v62, %v537_v61  ;;  %v9002_v61 = vld [vmem:[%s9631_s30 + $0xf8] sm:$0xff]   ;;  %v9003_v62 = vld [vmem:[%s9631_s30 + $0x100] sm:$0xff]   ;;  %v544_v21 = vsel %vm532_vm6, %v511_v1, %v527_v53  ;;  %v560_v22 = vsel %vm532_vm6, %v527_v53, %v511_v1 }
 0x139   : > { %7634 = vmatprep.subr.bf16.mxu0 %v8997_v18  ;;  %v562_v28 = vsel %vm532_vm6, %v529_v8, %v513_v7  ;;  %v10198_v1 = vld [vmem:[#allocation2 + $0xf8] sm:$0xff] }
 0x13b   : > { %7603 = vmatmul.mubr.msk.bf16.gmra.mrb[4].mxu0 %vm9645_vm2, %v10012_v36 }
 0x13c   : > { %7606 = vmatprep.mubr.msk.bf16.mxu0 %vm9645_vm2, %v10014_v19  ;;  %7635 = vmatpush3.bf16.msra.mxu0 %v8997_v18  ;;  %v10060_v18 = vpack.c.bf16 %v555_v6, %v539_v5  ;;  %v512_v5 = vrot.slane %v9766_v26, 1  ;;  %v528_v6 = vrot.slane %v9768_v27, 1  ;;  %v546_v27 = vsel %vm532_vm6, %v513_v7, %v529_v8  ;;  %v9014_v7 = vld [vmem:[%s9631_s30 + $0x158] sm:$0xff]   ;;  %v9016_v8 = vld [vmem:[%s9631_s30 + $0x168] sm:$0xff]  }
 0x13d   : > { %7636 = vmatprep.subr.bf16.mxu0 %v8998_v47  ;;  %v10130_v31 = vpack.c.bf16 %v562_v28, %v546_v27  ;;  %v9017_v27 = vld [vmem:[%s9631_s30 + $0x170] sm:$0xff]   ;;  %v9018_v28 = vld [vmem:[%s9631_s30 + $0x178] sm:$0xff]  }
 0x13e   : > { %v561_v26 = vsel %vm532_vm6, %v528_v6, %v512_v5 }
 0x140   : > { %7637 = vmatpush3.bf16.msra.mxu0 %v8998_v47  ;;  %v525_v47 = vrot.slane %v9734_v16, 1 }
 0x141   : > { %7638 = vmatprep.subr.bf16.mxu0 %v8999_v4 }
 0x142   : > { %v542_v15 = vsel %vm532_vm6, %v509_v46, %v525_v47  ;;  %v558_v16 = vsel %vm532_vm6, %v525_v47, %v509_v46  ;;  %v530_v46 = vrot.slane %v9786_v34, 1  ;;  %v9005_v34 = vld [vmem:[%s9631_s30 + $0x110] sm:$0xff]  }
 0x143   : > { %7607 = vmatmul.mubr.msk.bf16.gmra.mrb[8].mxu0 %vm9645_vm2, %v10036_v25  ;;  %v10086_v0 = vpack.c.bf16 %v558_v16, %v542_v15  ;;  %v9008_v15 = vld [vmem:[%s9631_s30 + $0x128] sm:$0xff]   ;;  %v9009_v16 = vld [vmem:[%s9631_s30 + $0x130] sm:$0xff]  }
 0x144   : > { %7610 = vmatprep.mubr.msk.bf16.mxu0 %vm9645_vm2, %v10038_v49  ;;  %7639 = vmatpush3.bf16.msra.mxu0 %v8999_v4  ;;  %v510_v4 = vrot.slane %v9746_v20, 1  ;;  %v547_v47 = vsel %vm532_vm6, %v514_v45, %v530_v46 }
 0x145   : > { %7640 = vmatprep.subr.bf16.mxu0 %v9000_v55 }
 0x146   : > { %v543_v54 = vsel %vm532_vm6, %v510_v4, %v526_v10  ;;  %v559_v20 = vsel %vm532_vm6, %v526_v10, %v510_v4  ;;  %v9011_v4 = vld [vmem:[%s9631_s30 + $0x140] sm:$0xff]   ;;  %v10196_v10 = vld [vmem:[#allocation2 + $0xf0] sm:$0xff] }
 0x147   : > { %v10106_v23 = vpack.c.bf16 %v559_v20, %v543_v54  ;;  %v416_v53 = vrot.slane %v10196_v10, 7  ;;  %v432_v54 = vrot.slane %v10198_v1, 7 }
 0x148   : > { %7641 = vmatpush3.bf16.msra.mxu0 %v9000_v55  ;;  %v10108_v55 = vpack.c.bf16 %v560_v22, %v544_v21 }
 0x149   : > { %7642 = vmatprep.subr.bf16.mxu0 %v9001_v56  ;;  %v449_v20 = vsel %vm433_vm3, %v416_v53, %v432_v54  ;;  %v465_v21 = vsel %vm433_vm3, %v432_v54, %v416_v53  ;;  %v9022_v53 = vld [vmem:[%s9631_s30 + $0x198] sm:$0xff]   ;;  %v9024_v54 = vld [vmem:[%s9631_s30 + $0x1a8] sm:$0xff]  }
 0x14a   : > { %v10212_v22 = vpack.c.bf16 %v449_v20, %v465_v21  ;;  %v9025_v20 = vld [vmem:[%s9631_s30 + $0x1b0] sm:$0xff]   ;;  %v9026_v21 = vld [vmem:[%s9631_s30 + $0x1b8] sm:$0xff]  }
 0x14b   : > { %7611 = vmatmul.mubr.msk.bf16.gmra.mrb[12].mxu0 %vm9645_vm2, %v10060_v18 }
 0x14c   : > { %7614 = vmatprep.mubr.msk.bf16.mxu0 %vm9645_vm2, %v10062_v24  ;;  %7643 = vmatpush3.bf16.msra.mxu0 %v9001_v56  ;;  %v545_v56 = vsel %vm532_vm6, %v512_v5, %v528_v6  ;;  %v9012_v5 = vld [vmem:[%s9631_s30 + $0x148] sm:$0xff]   ;;  %v9013_v6 = vld [vmem:[%s9631_s30 + $0x150] sm:$0xff]  }
 0x14d   : > { %7644 = vmatprep.subr.bf16.mxu0 %v9002_v61  ;;  %v10128_v29 = vpack.c.bf16 %v561_v26, %v545_v56  ;;  %v11510_v56 = vld [vmem:[#allocation16_spill] sm:$0xff]  ;;  %v11511_v26 = vld [vmem:[#allocation17_spill] sm:$0xff] }
 0x150   : > { %7645 = vmatpush3.bf16.msra.mxu0 %v9002_v61  ;;  %v563_v61 = vsel %vm532_vm6, %v530_v46, %v514_v45  ;;  %v11512_v45 = vld [vmem:[#allocation18_spill] sm:$0xff]  ;;  %v11513_v46 = vld [vmem:[#allocation19_spill] sm:$0xff] }
 0x151   : > { %7678 = vmatprep.subr.bf16.mxu0 %v9003_v62  ;;  %v10144_v13 = vpack.c.bf16 %v563_v61, %v547_v47  ;;  %v9019_v47 = vld [vmem:[%s9631_s30 + $0x180] sm:$0xff]  }
 0x152   : > { %v11514_v61 = vld [vmem:[#allocation20_spill] sm:$0xff] }
 0x153   : > { %7615 = vmatmul.mubr.msk.bf16.gmra.mrb[16].mxu0 %vm9645_vm2, %v10084_v63 }
 0x154   : > { %7618 = vmatprep.mubr.msk.bf16.mxu0 %vm9645_vm2, %v10086_v0 }
 0x15b   : > { %7619 = vmatmul.mubr.msk.bf16.gmra.mrb[20].mxu0 %vm9645_vm2, %v10106_v23 }
 0x15c   : > { %7622 = vmatprep.mubr.msk.bf16.mxu0 %vm9645_vm2, %v10108_v55 }
 0x163   : > { %7623 = vmatmul.mubr.msk.bf16.gmra.mrb[24].mxu0 %vm9645_vm2, %v10128_v29 }
 0x164   : > { %7626 = vmatprep.mubr.msk.bf16.mxu0 %vm9645_vm2, %v10130_v31 }
 0x16b   : > { %7627 = vmatmul.mubr.msk.bf16.gmra.mrb[28].mxu0 %vm9645_vm2, %v10144_v13 }
 0x16c   : > { %7646 = vmatprep.mubr.msk.bf16.mxu0 %vm9811_vm5, %v9808_v52  ;;  %v9007_v52 = vld [vmem:[%s9631_s30 + $0x120] sm:$0xff]  }
 0x173   : > { %7647 = vmatmul.mubr.msk.bf16.vlgmr.msra.gmra.mrb[0].mxu0 %vm9811_vm5, %v9815_v59 }
 0x174   : > { %7679 = vmatpush3.bf16.msra.mxu0 %v9003_v62  ;;  %7650 = vmatprep.mubr.msk.bf16.mxu0 %vm9811_vm5, %v9837_v17  ;;  %v9010_v62 = vld [vmem:[%s9631_s30 + $0x138] sm:$0xff]  }
 0x175   : > { %7680 = vmatprep.subr.bf16.mxu0 %v9004_v32 }
 0x178   : > { %7681 = vmatpush3.bf16.msra.mxu0 %v9004_v32  ;;  %v11515_v32 = vld [vmem:[#allocation21_spill] sm:$0xff] }
 0x179   : > { %7682 = vmatprep.subr.bf16.mxu0 %v9005_v34 }
 0x17b   : > { %7651 = vmatmul.mubr.msk.bf16.gmra.mrb[4].mxu0 %vm9811_vm5, %v9839_v43 }
 0x17c   : > { %7654 = vmatprep.mubr.msk.bf16.mxu0 %vm9811_vm5, %v9861_v40  ;;  %7683 = vmatpush3.bf16.msra.mxu0 %v9005_v34  ;;  %v11516_v34 = vld [vmem:[#allocation22_spill] sm:$0xff] }
 0x17d   : > { %7684 = vmatprep.subr.bf16.mxu0 %v9006_v14 }
 0x180   : > { %7685 = vmatpush3.bf16.msra.mxu0 %v9006_v14  ;;  %v11517_v14 = vld [vmem:[#allocation23_spill] sm:$0xff] }
 0x181   : > { %7686 = vmatprep.subr.bf16.mxu0 %v9007_v52 }
 0x183   : > { %7655 = vmatmul.mubr.msk.bf16.gmra.mrb[8].mxu0 %vm9811_vm5, %v9863_v41 }
 0x184   : > { %7658 = vmatprep.mubr.msk.bf16.mxu0 %vm9811_vm5, %v9885_v37  ;;  %7687 = vmatpush3.bf16.msra.mxu0 %v9007_v52  ;;  %v11518_v52 = vld [vmem:[#allocation24_spill] sm:$0xff] }
 0x185   : > { %7688 = vmatprep.subr.bf16.mxu0 %v9008_v15 }
 0x188   : > { %7689 = vmatpush3.bf16.msra.mxu0 %v9008_v15  ;;  %v11519_v15 = vld [vmem:[#allocation25_spill] sm:$0xff] }
 0x189   : > { %7690 = vmatprep.subr.bf16.mxu0 %v9009_v16 }
 0x18b   : > { %7659 = vmatmul.mubr.msk.bf16.gmra.mrb[12].mxu0 %vm9811_vm5, %v9887_v38 }
 0x18c   : > { %7662 = vmatprep.mubr.msk.bf16.mxu0 %vm9811_vm5, %v9909_v3  ;;  %7691 = vmatpush3.bf16.msra.mxu0 %v9009_v16  ;;  %v10242_v16 = vpack.c.bf16 %v10198_v1, %v10196_v10 }
 0x18d   : > { %7692 = vmatprep.subr.bf16.mxu0 %v9010_v62 }
 0x190   : > { %7693 = vmatpush3.bf16.msra.mxu0 %v9010_v62  ;;  %v9020_v62 = vld [vmem:[%s9631_s30 + $0x188] sm:$0xff]  }
 0x191   : > { %7726 = vmatprep.subr.bf16.mxu0 %v9011_v4 }
 0x193   : > { %7663 = vmatmul.mubr.msk.bf16.gmra.mrb[16].mxu0 %vm9811_vm5, %v9911_v9 }
 0x194   : > { %7666 = vmatprep.mubr.msk.bf16.mxu0 %vm9811_vm5, %v9931_v33 }
 0x19b   : > { %7667 = vmatmul.mubr.msk.bf16.gmra.mrb[20].mxu0 %vm9811_vm5, %v9933_v42 }
 0x19c   : > { %7670 = vmatprep.mubr.msk.bf16.mxu0 %vm9811_vm5, %v9953_v11 }
 0x1a3   : > { %7671 = vmatmul.mubr.msk.bf16.gmra.mrb[24].mxu0 %vm9811_vm5, %v9955_v30 }
 0x1a4   : > { %7674 = vmatprep.mubr.msk.bf16.mxu0 %vm9811_vm5, %v9969_v12 }
 0x1ab   : > { %7675 = vmatmul.mubr.msk.bf16.gmra.mrb[28].mxu0 %vm9811_vm5, %v10212_v22 }
 0x1ac   : > { %7694 = vmatprep.mubr.bf16.mxu0 %v9660_v50  ;;  %v9015_v50 = vld [vmem:[%s9631_s30 + $0x160] sm:$0xff]  }
 0x1b3   : > { %7695 = vmatmul.mubr.bf16.vlgmr.msra.gmra.mrb[0].mxu0 %v9664_v51 }
 0x1b4   : > { %7727 = vmatpush3.bf16.msra.mxu0 %v9011_v4  ;;  %7698 = vmatprep.mubr.bf16.mxu0 %v9680_v58  ;;  %v9021_v4 = vld [vmem:[%s9631_s30 + $0x190] sm:$0xff]  }
 0x1b5   : > { %7728 = vmatprep.subr.bf16.mxu0 %v9012_v5 }
 0x1b8   : > { %7729 = vmatpush3.bf16.msra.mxu0 %v9012_v5  ;;  %v9027_v5 = vld [vmem:[%s9631_s30 + $0x1c0] sm:$0xff]  }
 0x1b9   : > { %7730 = vmatprep.subr.bf16.mxu0 %v9013_v6 }
 0x1bb   : > { %7699 = vmatmul.mubr.bf16.gmra.mrb[4].mxu0 %v9685_v60 }
 0x1bc   : > { %7702 = vmatprep.mubr.bf16.mxu0 %v9700_v2  ;;  %7731 = vmatpush3.bf16.msra.mxu0 %v9013_v6  ;;  %v515_v6 = vrot.slane %v10196_v10, 1  ;;  %v9028_v10 = vld [vmem:[%s9631_s30 + $0x1c8] sm:$0xff]  }
 0x1bd   : > { %7732 = vmatprep.subr.bf16.mxu0 %v9014_v7 }
 0x1c0   : > { %7733 = vmatpush3.bf16.msra.mxu0 %v9014_v7  ;;  %v531_v7 = vrot.slane %v10198_v1, 1  ;;  %v9029_v1 = vld [vmem:[%s9631_s30 + $0x1d0] sm:$0xff]  }
 0x1c1   : > { %7734 = vmatprep.subr.bf16.mxu0 %v9015_v50 }
 0x1c3   : > { %7703 = vmatmul.mubr.bf16.gmra.mrb[8].mxu0 %v11510_v56 }
 0x1c4   : > { %7706 = vmatprep.mubr.bf16.mxu0 %v11511_v26  ;;  %7735 = vmatpush3.bf16.msra.mxu0 %v9015_v50  ;;  %v548_v50 = vsel %vm532_vm6, %v515_v6, %v531_v7 }
 0x1c5   : > { %7736 = vmatprep.subr.bf16.mxu0 %v9016_v8 }
 0x1c8   : > { %7737 = vmatpush3.bf16.msra.mxu0 %v9016_v8  ;;  %v564_v8 = vsel %vm532_vm6, %v531_v7, %v515_v6 }
 0x1c9   : > { %7738 = vmatprep.subr.bf16.mxu0 %v9017_v27 }
 0x1cb   : > { %7707 = vmatmul.mubr.bf16.gmra.mrb[12].mxu0 %v11512_v45 }
 0x1cc   : > { %7710 = vmatprep.mubr.bf16.mxu0 %v11513_v46  ;;  %7739 = vmatpush3.bf16.msra.mxu0 %v9017_v27  ;;  %v10304_v27 = vpack.c.bf16 %v564_v8, %v548_v50 }
 0x1cd   : > { %7740 = vmatprep.subr.bf16.mxu0 %v9018_v28 }
 0x1d0   : > { %7741 = vmatpush3.bf16.msra.mxu0 %v9018_v28  ;;  %v9030_v28 = vld [vmem:[%s9631_s30 + $0x1d8] sm:$0xff]  }
 0x1d1   : > { %7774 = vmatprep.subr.bf16.mxu0 %v9019_v47 }
 0x1d3   : > { %7711 = vmatmul.mubr.bf16.gmra.mrb[16].mxu0 %v11514_v61 }
 0x1d4   : > { %7714 = vmatprep.mubr.bf16.mxu0 %v11515_v32 }
 0x1db   : > { %7715 = vmatmul.mubr.bf16.gmra.mrb[20].mxu0 %v11516_v34 }
 0x1dc   : > { %7718 = vmatprep.mubr.bf16.mxu0 %v11517_v14 }
 0x1e3   : > { %7719 = vmatmul.mubr.bf16.gmra.mrb[24].mxu0 %v11518_v52 }
 0x1e4   : > { %7722 = vmatprep.mubr.bf16.mxu0 %v11519_v15 }
 0x1eb   : > { %7723 = vmatmul.mubr.bf16.gmra.mrb[28].mxu0 %v10242_v16 }
 0x1ec   : > { %7742 = vmatprep.mubr.msk.bf16.mxu0 %vm9645_vm2, %v9988_v48  ;;  %v9023_v48 = vld [vmem:[%s9631_s30 + $0x1a0] sm:$0xff]  }
 0x1f3   : > { %7743 = vmatmul.mubr.msk.bf16.vlgmr.msra.gmra.mrb[0].mxu0 %vm9645_vm2, %v9990_v39 }
 0x1f4   : > { %7775 = vmatpush3.bf16.msra.mxu0 %v9019_v47  ;;  %7746 = vmatprep.mubr.msk.bf16.mxu0 %vm9645_vm2, %v10012_v36 }
 0x1f5   : > { %7776 = vmatprep.subr.bf16.mxu0 %v9020_v62 }
 0x1f8   : > { %7777 = vmatpush3.bf16.msra.mxu0 %v9020_v62 }
 0x1f9   : > { %7778 = vmatprep.subr.bf16.mxu0 %v9021_v4 }
 0x1fb   : > { %7747 = vmatmul.mubr.msk.bf16.gmra.mrb[4].mxu0 %vm9645_vm2, %v10014_v19 }
 0x1fc   : > { %7750 = vmatprep.mubr.msk.bf16.mxu0 %vm9645_vm2, %v10036_v25  ;;  %7779 = vmatpush3.bf16.msra.mxu0 %v9021_v4  ;;  %v9052_v4 = vld [vmem:[%s10366_s9 + $0x8] sm:$0xff]  }
 0x1fd   : > { %7780 = vmatprep.subr.bf16.mxu0 %v9022_v53 }
 0x200   : > { %7781 = vmatpush3.bf16.msra.mxu0 %v9022_v53 }
 0x201   : > { %7782 = vmatprep.subr.bf16.mxu0 %v9023_v48 }
 0x203   : > { %7751 = vmatmul.mubr.msk.bf16.gmra.mrb[8].mxu0 %vm9645_vm2, %v10038_v49 }
 0x204   : > { %7754 = vmatprep.mubr.msk.bf16.mxu0 %vm9645_vm2, %v10060_v18  ;;  %7783 = vmatpush3.bf16.msra.mxu0 %v9023_v48 }
 0x205   : > { %7784 = vmatprep.subr.bf16.mxu0 %v9024_v54 }
 0x208   : > { %7785 = vmatpush3.bf16.msra.mxu0 %v9024_v54 }
 0x209   : > { %7786 = vmatprep.subr.bf16.mxu0 %v9025_v20 }
 0x20b   : > { %7755 = vmatmul.mubr.msk.bf16.gmra.mrb[12].mxu0 %vm9645_vm2, %v10062_v24 }
 0x20c   : > { %7758 = vmatprep.mubr.msk.bf16.mxu0 %vm9645_vm2, %v10084_v63  ;;  %7787 = vmatpush3.bf16.msra.mxu0 %v9025_v20 }
 0x20d   : > { %7788 = vmatprep.subr.bf16.mxu0 %v9026_v21 }
 0x210   : > { %7789 = vmatpush3.bf16.msra.mxu0 %v9026_v21 }
 0x211   : > { %7822 = vmatprep.subr.bf16.mxu0 %v9027_v5 }
 0x213   : > { %7759 = vmatmul.mubr.msk.bf16.gmra.mrb[16].mxu0 %vm9645_vm2, %v10086_v0 }
 0x214   : > { %7762 = vmatprep.mubr.msk.bf16.mxu0 %vm9645_vm2, %v10106_v23 }
 0x21b   : > { %7763 = vmatmul.mubr.msk.bf16.gmra.mrb[20].mxu0 %vm9645_vm2, %v10108_v55 }
 0x21c   : > { %7766 = vmatprep.mubr.msk.bf16.mxu0 %vm9645_vm2, %v10128_v29 }
 0x223   : > { %7767 = vmatmul.mubr.msk.bf16.gmra.mrb[24].mxu0 %vm9645_vm2, %v10130_v31 }
 0x224   : > { %7770 = vmatprep.mubr.msk.bf16.mxu0 %vm9645_vm2, %v10144_v13 }
 0x22b   : > { %7771 = vmatmul.mubr.msk.bf16.gmra.mrb[28].mxu0 %vm9645_vm2, %v10304_v27 }
 0x22c   : > { %7790 = vmatprep.mubr.msk.bf16.mxu0 %vm9811_vm5, %v9815_v59  ;;  %v9031_v59 = vld [vmem:[%s9631_s30 + $0x1e0] sm:$0xff]  }
 0x233   : > { %7791 = vmatmul.mubr.msk.bf16.vlgmr.msra.gmra.mrb[0].mxu0 %vm9811_vm5, %v9837_v17  ;;  %v9032_v17 = vld [vmem:[%s9631_s30 + $0x1e8] sm:$0xff]  }
 0x234   : > { %7823 = vmatpush3.bf16.msra.mxu0 %v9027_v5  ;;  %7794 = vmatprep.mubr.msk.bf16.mxu0 %vm9811_vm5, %v9839_v43  ;;  %v9033_v43 = vld [vmem:[%s9631_s30 + $0x1f0] sm:$0xff]  }
 0x235   : > { %7824 = vmatprep.subr.bf16.mxu0 %v9028_v10 }
 0x238   : > { %7825 = vmatpush3.bf16.msra.mxu0 %v9028_v10 }
 0x239   : > { %7826 = vmatprep.subr.bf16.mxu0 %v9029_v1 }
 0x23b   : > { %7795 = vmatmul.mubr.msk.bf16.gmra.mrb[4].mxu0 %vm9811_vm5, %v9861_v40  ;;  %v9034_v40 = vld [vmem:[%s9631_s30 + $0x1f8] sm:$0xff]  }
 0x23c   : > { %7798 = vmatprep.mubr.msk.bf16.mxu0 %vm9811_vm5, %v9863_v41  ;;  %7827 = vmatpush3.bf16.msra.mxu0 %v9029_v1  ;;  %v9035_v41 = vld [vmem:[%s9631_s30 + $0x200] sm:$0xff]  }
 0x23d   : > { %7828 = vmatprep.subr.bf16.mxu0 %v9030_v28 }
 0x240   : > { %7829 = vmatpush3.bf16.msra.mxu0 %v9030_v28 }
 0x241   : > { %7830 = vmatprep.subr.bf16.mxu0 %v9031_v59 }
 0x243   : > { %7799 = vmatmul.mubr.msk.bf16.gmra.mrb[8].mxu0 %vm9811_vm5, %v9885_v37  ;;  %v11520_v37 = vmov 0  }
 0x244   : > { %7802 = vmatprep.mubr.msk.bf16.mxu0 %vm9811_vm5, %v9887_v38  ;;  %7831 = vmatpush3.bf16.msra.mxu0 %v9031_v59  ;;  %v9043_v38 = vld [vmem:[%s10366_s9 + $0x40] sm:$0xff]  }
 0x245   : > { %7832 = vmatprep.subr.bf16.mxu0 %v9032_v17  ;;  %7918 = vmatprep.subr.bf16.mxu1 %v9043_v38 }
 0x246   : > { %7919 = vmatpush3.bf16.msra.mxu1 %v9043_v38 }
 0x248   : > { %7833 = vmatpush3.bf16.msra.mxu0 %v9032_v17 }
 0x249   : > { %7834 = vmatprep.subr.bf16.mxu0 %v9033_v43 }
 0x24b   : > { %7803 = vmatmul.mubr.msk.bf16.gmra.mrb[12].mxu0 %vm9811_vm5, %v9909_v3  ;;  %v9044_v3 = vld [vmem:[%s10366_s9 + $0x48] sm:$0xff]  }
 0x24c   : > { %7806 = vmatprep.mubr.msk.bf16.mxu0 %vm9811_vm5, %v9911_v9  ;;  %7835 = vmatpush3.bf16.msra.mxu0 %v9033_v43  ;;  %v9036_v9 = vld [vmem:[%s9631_s30 + $0x208] sm:$0xff]  }
 0x24d   : > { %7836 = vmatprep.subr.bf16.mxu0 %v9034_v40  ;;  %7920 = vmatprep.subr.bf16.mxu1 %v9044_v3 }
 0x24e   : > { %7921 = vmatpush3.bf16.msra.mxu1 %v9044_v3 }
 0x250   : > { %7837 = vmatpush3.bf16.msra.mxu0 %v9034_v40  ;;  %v9053_v40 = vld [vmem:[%s10366_s9 + $0x10] sm:$0xff]  }
 0x251   : > { %7870 = vmatprep.subr.bf16.mxu0 %v9035_v41 }
 0x253   : > { %7807 = vmatmul.mubr.msk.bf16.gmra.mrb[16].mxu0 %vm9811_vm5, %v9931_v33  ;;  %v9045_v33 = vld [vmem:[%s10366_s9 + $0x50] sm:$0xff]  }
 0x254   : > { %7810 = vmatprep.mubr.msk.bf16.mxu0 %vm9811_vm5, %v9933_v42  ;;  %v9046_v42 = vld [vmem:[%s10366_s9 + $0x58] sm:$0xff]   ;;  %7922 = vmatprep.subr.bf16.mxu1 %v9045_v33 }
 0x255   : > { %7923 = vmatpush3.bf16.msra.mxu1 %v9045_v33 }
 0x256   : > { %7924 = vmatprep.subr.bf16.mxu1 %v9046_v42 }
 0x259   : > { %7925 = vmatpush3.bf16.msra.mxu1 %v9046_v42 }
 0x25b   : > { %7811 = vmatmul.mubr.msk.bf16.gmra.mrb[20].mxu0 %vm9811_vm5, %v9953_v11  ;;  %v9038_v11 = vld [vmem:[%s9631_s30 + $0x218] sm:$0xff]  }
 0x25c   : > { %7814 = vmatprep.mubr.msk.bf16.mxu0 %vm9811_vm5, %v9955_v30  ;;  %v9047_v30 = vld [vmem:[%s10366_s9 + $0x60] sm:$0xff]  }
 0x25d   : > { %7926 = vmatprep.subr.bf16.mxu1 %v9047_v30 }
 0x25e   : > { %7927 = vmatpush3.bf16.msra.mxu1 %v9047_v30 }
 0x263   : > { %7815 = vmatmul.mubr.msk.bf16.gmra.mrb[24].mxu0 %vm9811_vm5, %v9969_v12  ;;  %v9048_v12 = vld [vmem:[%s10366_s9 + $0x68] sm:$0xff]  }
 0x264   : > { %7818 = vmatprep.mubr.msk.bf16.mxu0 %vm9811_vm5, %v10212_v22  ;;  %v9039_v22 = vld [vmem:[%s9631_s30 + $0x220] sm:$0xff]   ;;  %7928 = vmatprep.subr.bf16.mxu1 %v9048_v12 }
 0x265   : > { %7929 = vmatpush3.bf16.msra.mxu1 %v9048_v12 }
 0x26b   : > { %7819 = vmatmul.mubr.bf16.gmra.mrb[28].mxu0 %v11520_v37 }
 0x26c   : > { %7838 = vmatprep.mubr.bf16.mxu0 %v9664_v51  ;;  %v9037_v51 = vld [vmem:[%s9631_s30 + $0x210] sm:$0xff]  }
 0x273   : > { %7839 = vmatmul.mubr.bf16.vlgmr.msra.gmra.mrb[0].mxu0 %v9680_v58  ;;  %v9040_v58 = vld [vmem:[%s9631_s30 + $0x228] sm:$0xff]  }
 0x274   : > { %7871 = vmatpush3.bf16.msra.mxu0 %v9035_v41  ;;  %7842 = vmatprep.mubr.bf16.mxu0 %v9685_v60  ;;  %v9041_v60 = vld [vmem:[%s9631_s30 + $0x230] sm:$0xff]  }
 0x275   : > { %7872 = vmatprep.subr.bf16.mxu0 %v9036_v9 }
 0x278   : > { %7873 = vmatpush3.bf16.msra.mxu0 %v9036_v9 }
 0x279   : > { %7874 = vmatprep.subr.bf16.mxu0 %v9037_v51 }
 0x27b   : > { %7843 = vmatmul.mubr.bf16.gmra.mrb[4].mxu0 %v9700_v2  ;;  %v9042_v2 = vld [vmem:[%s9631_s30 + $0x238] sm:$0xff]  }
 0x27c   : > { %7846 = vmatprep.mubr.bf16.mxu0 %v11510_v56  ;;  %7875 = vmatpush3.bf16.msra.mxu0 %v9037_v51 }
 0x27d   : > { %7876 = vmatprep.subr.bf16.mxu0 %v9038_v11 }
 0x280   : > { %7877 = vmatpush3.bf16.msra.mxu0 %v9038_v11 }
 0x281   : > { %7878 = vmatprep.subr.bf16.mxu0 %v9039_v22 }
 0x283   : > { %7847 = vmatmul.mubr.bf16.gmra.mrb[8].mxu0 %v11511_v26 }
 0x284   : > { %7850 = vmatprep.mubr.bf16.mxu0 %v11512_v45  ;;  %7879 = vmatpush3.bf16.msra.mxu0 %v9039_v22 }
 0x285   : > { %7880 = vmatprep.subr.bf16.mxu0 %v9040_v58 }
 0x288   : > { %7881 = vmatpush3.bf16.msra.mxu0 %v9040_v58 }
 0x289   : > { %7882 = vmatprep.subr.bf16.mxu0 %v9041_v60 }
 0x28b   : > { %7851 = vmatmul.mubr.bf16.gmra.mrb[12].mxu0 %v11513_v46 }
 0x28c   : > { %7854 = vmatprep.mubr.bf16.mxu0 %v11514_v61  ;;  %7883 = vmatpush3.bf16.msra.mxu0 %v9041_v60 }
 0x28d   : > { %7884 = vmatprep.subr.bf16.mxu0 %v9042_v2 }
 0x290   : > { %7885 = vmatpush3.bf16.msra.mxu0 %v9042_v2 }
 0x293   : > { %7855 = vmatmul.mubr.bf16.gmra.mrb[16].mxu0 %v11515_v32 }
 0x294   : > { %7858 = vmatprep.mubr.bf16.mxu0 %v11516_v34 }
 0x29b   : > { %7859 = vmatmul.mubr.bf16.gmra.mrb[20].mxu0 %v11517_v14 }
 0x29c   : > { %7862 = vmatprep.mubr.bf16.mxu0 %v11518_v52 }
 0x2a3   : > { %7863 = vmatmul.mubr.bf16.gmra.mrb[24].mxu0 %v11519_v15 }
 0x2a4   : > { %7866 = vmatprep.mubr.bf16.mxu0 %v10242_v16 }
 0x2ab   : > { %7867 = vmatmul.mubr.bf16.gmra.mrb[28].mxu0 %v11520_v37 }
 0x2ac   : > { %7886 = vmatprep.mubr.msk.bf16.mxu0 %vm9645_vm2, %v9990_v39  ;;  %v9049_v39 = vld [vmem:[%s10366_s9 + $0x70] sm:$0xff]  }
 0x2ad   : > { %7930 = vmatprep.subr.bf16.mxu1 %v9049_v39 }
 0x2ae   : > { %7931 = vmatpush3.bf16.msra.mxu1 %v9049_v39 }
 0x2b3   : > { %7887 = vmatmul.mubr.msk.bf16.vlgmr.msra.gmra.mrb[0].mxu0 %vm9645_vm2, %v10012_v36  ;;  %v9050_v36 = vld [vmem:[%s10366_s9 + $0x78] sm:$0xff]  }
 0x2b4   : > { %7890 = vmatprep.mubr.msk.bf16.mxu0 %vm9645_vm2, %v10014_v19  ;;  %7932 = vmatprep.subr.bf16.mxu1 %v9050_v36  ;;  %v9051_v19 = vld [vmem:[%s10366_s9] sm:$0xff]  }
 0x2b5   : > { %7933 = vmatpush3.bf16.msra.mxu1 %v9050_v36 }
 0x2b6   : > { %7966 = vmatprep.subr.bf16.mxu1 %v9051_v19 }
 0x2bb   : > { %7891 = vmatmul.mubr.msk.bf16.gmra.mrb[4].mxu0 %vm9645_vm2, %v10036_v25  ;;  %v10449_v25 = vld [vmem:[%s3095_s26] ss:$0 sm:$0xff] }
 0x2bc   : > { %7894 = vmatprep.mubr.msk.bf16.mxu0 %vm9645_vm2, %v10038_v49 }
 0x2c3   : > { %7895 = vmatmul.mubr.msk.bf16.gmra.mrb[8].mxu0 %vm9645_vm2, %v10060_v18 }
 0x2c4   : > { %7898 = vmatprep.mubr.msk.bf16.mxu0 %vm9645_vm2, %v10062_v24 }
 0x2cb   : > { %7899 = vmatmul.mubr.msk.bf16.gmra.mrb[12].mxu0 %vm9645_vm2, %v10084_v63 }
 0x2cc   : > { %7902 = vmatprep.mubr.msk.bf16.mxu0 %vm9645_vm2, %v10086_v0 }
 0x2d3   : > { %7903 = vmatmul.mubr.msk.bf16.gmra.mrb[16].mxu0 %vm9645_vm2, %v10106_v23 }
 0x2d4   : > { %7906 = vmatprep.mubr.msk.bf16.mxu0 %vm9645_vm2, %v10108_v55 }
 0x2db   : > { %7907 = vmatmul.mubr.msk.bf16.gmra.mrb[20].mxu0 %vm9645_vm2, %v10128_v29 }
 0x2dc   : > { %7910 = vmatprep.mubr.msk.bf16.mxu0 %vm9645_vm2, %v10130_v31 }
 0x2e3   : > { %7911 = vmatmul.mubr.msk.bf16.gmra.mrb[24].mxu0 %vm9645_vm2, %v10144_v13 }
 0x2e4   : > { %7914 = vmatprep.mubr.msk.bf16.mxu0 %vm9645_vm2, %v10304_v27 }
 0x2eb   : > { %7915 = vmatmul.mubr.bf16.gmra.mrb[28].mxu0 %v11520_v37 }
 0x386   : > { %v7888_v49 = vpop.f32.mrb[0].mxu0 }
 0x387   : > { %v3105_v18 = vadd.f32 %v7888_v49, %v10449_v25  ;;  %v2936_v24 = vpop.f32.mrb[1].mxu0 }
 0x388   : > { %v3103_v63 = vadd.f32 %v10449_v25, %v2936_v24  ;;  %v7889_v0 = vpop.f32.mrb[2].mxu0  ;;  %v9054_v24 = vld [vmem:[%s10366_s9 + $0x18] sm:$0xff]  }
 0x389   : > { %v3137_v23 = vmax.f32 %v3105_v18, 0.0  ;;  %v3106_v55 = vadd.f32 %v7889_v0, %v10449_v25  ;;  %v2939_v29 = vpop.f32.mrb[3].mxu0 }
 0x38a   : > { %v3135_v31 = vmax.f32 %v3103_v63, 0.0  ;;  %v3104_v13 = vadd.f32 %v10449_v25, %v2939_v29 }
 0x38b   : > { %v3138_v56 = vmax.f32 %v3106_v55, 0.0  ;;  %v3168_v26 = vrot.slane %v3137_v23, 7  ;;  %v3264_v45 = vrot.slane %v3137_v23, 1 }
 0x38c   : > { %v3136_v46 = vmax.f32 %v3104_v13, 0.0  ;;  %v3167_v47 = vrot.slane %v3135_v31, 7  ;;  %v3263_v14 = vrot.slane %v3135_v31, 1 }
 0x38d   : > { %v3184_v61 = vrot.slane %v3138_v56, 7  ;;  %v3280_v32 = vrot.slane %v3138_v56, 1  ;;  %v10455_v34 = vpack.c.bf16 %v3138_v56, %v3137_v23 }
 0x38e   : > { %v3183_v52 = vrot.slane %v3136_v46, 7  ;;  %v3279_v15 = vrot.slane %v3136_v46, 1  ;;  %v7892_v16 = vpop.f32.mrb[4].mxu0  ;;  %v10457_v62 = vpack.c.bf16 %v3136_v46, %v3135_v31 }
 0x38f   : > { %v3109_v53 = vadd.f32 %v7892_v16, %v10449_v25  ;;  %v2952_v48 = vpop.f32.mrb[5].mxu0  ;;  %v3200_v54 = vsel %vm433_vm3, %v3168_v26, %v3184_v61  ;;  %v3216_v20 = vsel %vm433_vm3, %v3184_v61, %v3168_v26  ;;  %v3296_v21 = vsel %vm532_vm6, %v3264_v45, %v3280_v32  ;;  %v9055_v16 = vld [vmem:[%s10366_s9 + $0x20] sm:$0xff]  }
 0x390   : > { %v3199_v5 = vsel %vm433_vm3, %v3167_v47, %v3183_v52  ;;  %v3215_v6 = vsel %vm433_vm3, %v3183_v52, %v3167_v47  ;;  %v3295_v7 = vsel %vm532_vm6, %v3263_v14, %v3279_v15  ;;  %v3311_v50 = vsel %vm532_vm6, %v3279_v15, %v3263_v14  ;;  %v7893_v8 = vpop.f32.mrb[6].mxu0  ;;  %7935 = vmatmul.mubr.bf16.vlgmr.msra.gmra.mrb[0].mxu1 %v10457_v62 }
 0x391   : > { %v10476_v27 = vpack.c.bf16 %v3199_v5, %v3215_v6  ;;  %v10478_v10 = vpack.c.bf16 %v3311_v50, %v3295_v7  ;;  %v10480_v1 = vmax.f32 %v3109_v53, 0.0  ;;  %v3107_v28 = vadd.f32 %v10449_v25, %v2952_v48  ;;  %v2955_v59 = vpop.f32.mrb[7].mxu0  ;;  %7938 = vmatprep.mubr.bf16.mxu1 %v10455_v34  ;;  %7967 = vmatpush3.bf16.msra.mxu1 %v9051_v19 }
 0x392   : > { %v3110_v17 = vadd.f32 %v7893_v8, %v10449_v25  ;;  %v3108_v43 = vadd.f32 %v10449_v25, %v2955_v59  ;;  %7968 = vmatprep.subr.bf16.mxu1 %v9052_v4  ;;  %v10487_v41 = vpack.c.bf16 %v3200_v54, %v3216_v20  ;;  %v3312_v38 = vsel %vm532_vm6, %v3280_v32, %v3264_v45 }
 0x393   : > { %v3139_v3 = vmax.f32 %v3107_v28, 0.0  ;;  %v10491_v9 = vpack.c.bf16 %v3312_v38, %v3296_v21  ;;  %v3170_v51 = vrot.slane %v10480_v1, 7  ;;  %v3266_v11 = vrot.slane %v10480_v1, 1 }
 0x394   : > { %v3142_v33 = vmax.f32 %v3110_v17, 0.0  ;;  %v3140_v42 = vmax.f32 %v3108_v43, 0.0 }
 0x395   : > { %v3169_v30 = vrot.slane %v3139_v3, 7  ;;  %7969 = vmatpush3.bf16.msra.mxu1 %v9052_v4  ;;  %v3265_v12 = vrot.slane %v3139_v3, 1 }
 0x396   : > { %v3186_v22 = vrot.slane %v3142_v33, 7  ;;  %v3185_v58 = vrot.slane %v3140_v42, 7  ;;  %v3281_v60 = vrot.slane %v3140_v42, 1  ;;  %v7896_v2 = vpop.f32.mrb[8].mxu0  ;;  %7970 = vmatprep.subr.bf16.mxu1 %v9053_v40  ;;  %v3282_v39 = vrot.slane %v3142_v33, 1 }
 0x397   : > { %v3113_v36 = vadd.f32 %v7896_v2, %v10449_v25  ;;  %v2968_v19 = vpop.f32.mrb[9].mxu0  ;;  %v10496_v49 = vpack.c.bf16 %v3140_v42, %v3139_v3  ;;  %v10499_v18 = vpack.c.bf16 %v3142_v33, %v10480_v1 }
 0x398   : > { %v3111_v63 = vadd.f32 %v10449_v25, %v2968_v19  ;;  %v7897_v0 = vpop.f32.mrb[10].mxu0  ;;  %v3201_v23 = vsel %vm433_vm3, %v3169_v30, %v3185_v58  ;;  %v3217_v55 = vsel %vm433_vm3, %v3185_v58, %v3169_v30  ;;  %v3202_v29 = vsel %vm433_vm3, %v3170_v51, %v3186_v22 }
 0x399   : > { %v10509_v31 = vmax.f32 %v3113_v36, 0.0  ;;  %v3114_v13 = vadd.f32 %v7897_v0, %v10449_v25  ;;  %7939 = vmatmul.mubr.bf16.gmra.mrb[4].mxu1 %v10496_v49  ;;  %v2971_v56 = vpop.f32.mrb[11].mxu0  ;;  %v10513_v26 = vpack.c.bf16 %v3201_v23, %v3217_v55  ;;  %v3218_v45 = vsel %vm433_vm3, %v3186_v22, %v3170_v51  ;;  %v9057_v55 = vld [vmem:[%s10366_s9 + $0x30] sm:$0xff]  }
 0x39a   : > { %v3143_v46 = vmax.f32 %v3111_v63, 0.0  ;;  %v3112_v47 = vadd.f32 %v10449_v25, %v2971_v56  ;;  %7942 = vmatprep.mubr.bf16.mxu1 %v10499_v18  ;;  %7971 = vmatpush3.bf16.msra.mxu1 %v9053_v40  ;;  %v10519_v61 = vpack.c.bf16 %v3202_v29, %v3218_v45  ;;  %v3297_v32 = vsel %vm532_vm6, %v3265_v12, %v3281_v60  ;;  %v9056_v40 = vld [vmem:[%s10366_s9 + $0x28] sm:$0xff]  }
 0x39b   : > { %v3172_v14 = vrot.slane %v10509_v31, 7  ;;  %v3268_v52 = vrot.slane %v10509_v31, 1  ;;  %v3146_v15 = vmax.f32 %v3114_v13, 0.0  ;;  %7972 = vmatprep.subr.bf16.mxu1 %v9054_v24  ;;  %v3313_v4 = vsel %vm532_vm6, %v3281_v60, %v3265_v12 }
 0x39c   : > { %v3171_v53 = vrot.slane %v3143_v46, 7  ;;  %v3267_v48 = vrot.slane %v3143_v46, 1  ;;  %v3144_v54 = vmax.f32 %v3112_v47, 0.0  ;;  %v10528_v20 = vpack.c.bf16 %v3313_v4, %v3297_v32 }
 0x39d   : > { %v3188_v21 = vrot.slane %v3146_v15, 7  ;;  %v3284_v5 = vrot.slane %v3146_v15, 1  ;;  %v10531_v6 = vpack.c.bf16 %v3146_v15, %v10509_v31  ;;  %v3298_v7 = vsel %vm532_vm6, %v3266_v11, %v3282_v39 }
 0x39e   : > { %v3187_v50 = vrot.slane %v3144_v54, 7  ;;  %v3283_v8 = vrot.slane %v3144_v54, 1  ;;  %v7900_v1 = vpop.f32.mrb[12].mxu0  ;;  %v10535_v28 = vpack.c.bf16 %v3144_v54, %v3143_v46  ;;  %7973 = vmatpush3.bf16.msra.mxu1 %v9054_v24  ;;  %v3314_v59 = vsel %vm532_vm6, %v3282_v39, %v3266_v11 }
 0x39f   : > { %v3117_v17 = vadd.f32 %v7900_v1, %v10449_v25  ;;  %v2984_v43 = vpop.f32.mrb[13].mxu0  ;;  %7974 = vmatprep.subr.bf16.mxu1 %v9055_v16  ;;  %v3204_v38 = vsel %vm433_vm3, %v3172_v14, %v3188_v21  ;;  %v3220_v3 = vsel %vm433_vm3, %v3188_v21, %v3172_v14  ;;  %v10545_v33 = vpack.c.bf16 %v3314_v59, %v3298_v7  ;;  %v9058_v7 = vld [vmem:[%s10366_s9 + $0x38] sm:$0xff]  }
 0x3a0   : > { %v3115_v42 = vadd.f32 %v10449_v25, %v2984_v43  ;;  %v7901_v51 = vpop.f32.mrb[14].mxu0  ;;  %v3203_v30 = vsel %vm433_vm3, %v3171_v53, %v3187_v50  ;;  %v3219_v11 = vsel %vm433_vm3, %v3187_v50, %v3171_v53  ;;  %v10552_v12 = vpack.c.bf16 %v3204_v38, %v3220_v3 }
 0x3a1   : > { %v3149_v22 = vmax.f32 %v3117_v17, 0.0  ;;  %v3118_v58 = vadd.f32 %v7901_v51, %v10449_v25  ;;  %7943 = vmatmul.mubr.bf16.gmra.mrb[8].mxu1 %v10535_v28  ;;  %v2987_v60 = vpop.f32.mrb[15].mxu0  ;;  %v10556_v2 = vpack.c.bf16 %v3203_v30, %v3219_v11  ;;  %v3299_v39 = vsel %vm532_vm6, %v3267_v48, %v3283_v8 }
 0x3a2   : > { %v3147_v36 = vmax.f32 %v3115_v42, 0.0  ;;  %v3116_v19 = vadd.f32 %v10449_v25, %v2987_v60  ;;  %7946 = vmatprep.mubr.bf16.mxu1 %v10531_v6  ;;  %7975 = vmatpush3.bf16.msra.mxu1 %v9055_v16  ;;  %v3315_v24 = vsel %vm532_vm6, %v3283_v8, %v3267_v48  ;;  %v3300_v63 = vsel %vm532_vm6, %v3268_v52, %v3284_v5 }
 0x3a3   : > { %v3174_v0 = vrot.slane %v3149_v22, 7  ;;  %v3150_v23 = vmax.f32 %v3118_v58, 0.0  ;;  %7976 = vmatprep.subr.bf16.mxu1 %v9056_v40  ;;  %v10567_v29 = vpack.c.bf16 %v3315_v24, %v3299_v39  ;;  %v3270_v31 = vrot.slane %v3149_v22, 1  ;;  %v10605_v39 = vld [vmem:[%s10366_s9 + $0x80] sm:$0xff]  }
 0x3a4   : > { %v3173_v13 = vrot.slane %v3147_v36, 7  ;;  %v3148_v56 = vmax.f32 %v3116_v19, 0.0  ;;  %v3316_v45 = vsel %vm532_vm6, %v3284_v5, %v3268_v52  ;;  %v3269_v15 = vrot.slane %v3147_v36, 1 }
 0x3a5   : > { %v3190_v46 = vrot.slane %v3150_v23, 7  ;;  %v3286_v47 = vrot.slane %v3150_v23, 1  ;;  %v10571_v32 = vpack.c.bf16 %v3150_v23, %v3149_v22  ;;  %v10573_v14 = vpack.c.bf16 %v3316_v45, %v3300_v63 }
 0x3a6   : > { %v3189_v16 = vrot.slane %v3148_v56, 7  ;;  %v3285_v4 = vrot.slane %v3148_v56, 1  ;;  %v7904_v53 = vpop.f32.mrb[16].mxu0  ;;  %v10575_v48 = vpack.c.bf16 %v3148_v56, %v3147_v36  ;;  %7977 = vmatpush3.bf16.msra.mxu1 %v9056_v40 }
 0x3a7   : > { %v3121_v54 = vadd.f32 %v7904_v53, %v10449_v25  ;;  %v3000_v21 = vpop.f32.mrb[17].mxu0  ;;  %7978 = vmatprep.subr.bf16.mxu1 %v9057_v55  ;;  %v3206_v52 = vsel %vm433_vm3, %v3174_v0, %v3190_v46  ;;  %v3222_v5 = vsel %vm433_vm3, %v3190_v46, %v3174_v0  ;;  %v3302_v50 = vsel %vm532_vm6, %v3270_v31, %v3286_v47 }
 0x3a8   : > { %v3119_v8 = vadd.f32 %v10449_v25, %v3000_v21  ;;  %v7905_v1 = vpop.f32.mrb[18].mxu0  ;;  %v3205_v59 = vsel %vm433_vm3, %v3173_v13, %v3189_v16  ;;  %v3221_v17 = vsel %vm433_vm3, %v3189_v16, %v3173_v13  ;;  %v10590_v43 = vpack.c.bf16 %v3206_v52, %v3222_v5 }
 0x3a9   : > { %v3153_v40 = vmax.f32 %v3121_v54, 0.0  ;;  %v3122_v38 = vadd.f32 %v7905_v1, %v10449_v25  ;;  %7947 = vmatmul.mubr.bf16.gmra.mrb[12].mxu1 %v10575_v48  ;;  %v3003_v3 = vpop.f32.mrb[19].mxu0  ;;  %v10594_v42 = vpack.c.bf16 %v3205_v59, %v3221_v17  ;;  %v3301_v51 = vsel %vm532_vm6, %v3269_v15, %v3285_v4 }
 0x3aa   : > { %v3151_v30 = vmax.f32 %v3119_v8, 0.0  ;;  %v3120_v11 = vadd.f32 %v10449_v25, %v3003_v3  ;;  %7950 = vmatprep.mubr.bf16.mxu1 %v10571_v32  ;;  %7979 = vmatpush3.bf16.msra.mxu1 %v9057_v55  ;;  %v3317_v22 = vsel %vm532_vm6, %v3285_v4, %v3269_v15  ;;  %v3318_v58 = vsel %vm532_vm6, %v3286_v47, %v3270_v31 }
 0x3ab   : > { %v3154_v60 = vmax.f32 %v3122_v38, 0.0  ;;  %7980 = vmatprep.subr.bf16.mxu1 %v9058_v7  ;;  %v10607_v36 = vpack.c.bf16 %v3317_v22, %v3301_v51  ;;  %v3176_v19 = vrot.slane %v3153_v40, 7  ;;  %v3272_v24 = vrot.slane %v3153_v40, 1 }
 0x3ac   : > { %v3152_v63 = vmax.f32 %v3120_v11, 0.0  ;;  %v10609_v0 = vpack.c.bf16 %v3318_v58, %v3302_v50  ;;  %v3175_v23 = vrot.slane %v3151_v30, 7  ;;  %v3271_v45 = vrot.slane %v3151_v30, 1 }
 0x3ad   : > { %v3192_v13 = vrot.slane %v3154_v60, 7  ;;  %v3288_v55 = vrot.slane %v3154_v60, 1  ;;  %v10611_v56 = vpack.c.bf16 %v3154_v60, %v3153_v40 }
 0x3ae   : > { %v3191_v46 = vrot.slane %v3152_v63, 7  ;;  %v3287_v15 = vrot.slane %v3152_v63, 1  ;;  %v7908_v31 = vpop.f32.mrb[20].mxu0  ;;  %v10613_v47 = vpack.c.bf16 %v3152_v63, %v3151_v30  ;;  %7981 = vmatpush3.bf16.msra.mxu1 %v9058_v7 }
 0x3af   : > { %11521 = vst [vmem:[#allocation16_spill] sm:$0xff] %v10611_v56  ;;  %v3125_v16 = vadd.f32 %v7908_v31, %v10449_v25  ;;  %v3016_v4 = vpop.f32.mrb[21].mxu0  ;;  %8014 = vmatprep.subr.bf16.mxu1 %v10605_v39  ;;  %v3208_v53 = vsel %vm433_vm3, %v3176_v19, %v3192_v13  ;;  %v3224_v54 = vsel %vm433_vm3, %v3192_v13, %v3176_v19 }
 0x3b0   : > { %11522 = vst [vmem:[#allocation17_spill] sm:$0xff] %v10613_v47  ;;  %v3304_v21 = vsel %vm532_vm6, %v3272_v24, %v3288_v55  ;;  %v3123_v52 = vadd.f32 %v10449_v25, %v3016_v4  ;;  %v7909_v5 = vpop.f32.mrb[22].mxu0  ;;  %v3207_v7 = vsel %vm433_vm3, %v3175_v23, %v3191_v46  ;;  %v3223_v50 = vsel %vm433_vm3, %v3191_v46, %v3175_v23 }
 0x3b1   : > { %v10628_v8 = vpack.c.bf16 %v3208_v53, %v3224_v54  ;;  %v3157_v1 = vmax.f32 %v3125_v16, 0.0  ;;  %v3126_v59 = vadd.f32 %v7909_v5, %v10449_v25  ;;  %7951 = vmatmul.mubr.bf16.gmra.mrb[16].mxu1 %v10613_v47  ;;  %v3019_v17 = vpop.f32.mrb[23].mxu0  ;;  %v10632_v40 = vpack.c.bf16 %v3207_v7, %v3223_v50 }
 0x3b2   : > { %v3303_v38 = vsel %vm532_vm6, %v3271_v45, %v3287_v15  ;;  %v3155_v3 = vmax.f32 %v3123_v52, 0.0  ;;  %v3124_v51 = vadd.f32 %v10449_v25, %v3019_v17  ;;  %7954 = vmatprep.mubr.bf16.mxu1 %v10611_v56  ;;  %v3319_v30 = vsel %vm532_vm6, %v3287_v15, %v3271_v45 }
 0x3b3   : > { %v3320_v11 = vsel %vm532_vm6, %v3288_v55, %v3272_v24  ;;  %v3158_v22 = vmax.f32 %v3126_v59, 0.0  ;;  %v10642_v58 = vpack.c.bf16 %v3319_v30, %v3303_v38  ;;  %v3178_v60 = vrot.slane %v3157_v1, 7 }
 0x3b4   : > { %v3274_v19 = vrot.slane %v3157_v1, 1  ;;  %v3156_v63 = vmax.f32 %v3124_v51, 0.0  ;;  %v10644_v23 = vpack.c.bf16 %v3320_v11, %v3304_v21  ;;  %v3177_v13 = vrot.slane %v3155_v3, 7 }
 0x3b5   : > { %v3194_v46 = vrot.slane %v3158_v22, 7  ;;  %v3290_v31 = vrot.slane %v3158_v22, 1  ;;  %v10646_v16 = vpack.c.bf16 %v3158_v22, %v3157_v1  ;;  %v3273_v4 = vrot.slane %v3155_v3, 1 }
 0x3b6   : > { %v3193_v53 = vrot.slane %v3156_v63, 7  ;;  %v3289_v54 = vrot.slane %v3156_v63, 1  ;;  %v7912_v45 = vpop.f32.mrb[24].mxu0  ;;  %v10648_v15 = vpack.c.bf16 %v3156_v63, %v3155_v3 }
 0x3b7   : > { %11523 = vst [vmem:[#allocation18_spill] sm:$0xff] %v10646_v16  ;;  %v3129_v24 = vadd.f32 %v7912_v45, %v10449_v25  ;;  %v3032_v55 = vpop.f32.mrb[25].mxu0  ;;  %v3210_v52 = vsel %vm433_vm3, %v3178_v60, %v3194_v46  ;;  %v3226_v21 = vsel %vm433_vm3, %v3194_v46, %v3178_v60  ;;  %v3306_v5 = vsel %vm532_vm6, %v3274_v19, %v3290_v31 }
 0x3b8   : > { %11524 = vst [vmem:[#allocation19_spill] sm:$0xff] %v10648_v15  ;;  %v3127_v7 = vadd.f32 %v10449_v25, %v3032_v55  ;;  %v7913_v50 = vpop.f32.mrb[26].mxu0  ;;  %v3209_v1 = vsel %vm433_vm3, %v3177_v13, %v3193_v53  ;;  %v3225_v59 = vsel %vm433_vm3, %v3193_v53, %v3177_v13  ;;  %v10662_v17 = vpack.c.bf16 %v3210_v52, %v3226_v21 }
 0x3b9   : > { %v3161_v38 = vmax.f32 %v3129_v24, 0.0  ;;  %v3130_v3 = vadd.f32 %v7913_v50, %v10449_v25  ;;  %7955 = vmatmul.mubr.bf16.gmra.mrb[20].mxu1 %v10648_v15  ;;  %v3035_v51 = vpop.f32.mrb[27].mxu0  ;;  %v10666_v30 = vpack.c.bf16 %v3209_v1, %v3225_v59  ;;  %v3305_v11 = vsel %vm532_vm6, %v3273_v4, %v3289_v54 }
 0x3ba   : > { %v3159_v22 = vmax.f32 %v3127_v7, 0.0  ;;  %v3128_v60 = vadd.f32 %v10449_v25, %v3035_v51  ;;  %7958 = vmatprep.mubr.bf16.mxu1 %v10646_v16  ;;  %v3321_v63 = vsel %vm532_vm6, %v3289_v54, %v3273_v4  ;;  %v3322_v13 = vsel %vm532_vm6, %v3290_v31, %v3274_v19 }
 0x3bb   : > { %v3162_v46 = vmax.f32 %v3130_v3, 0.0  ;;  %v10676_v53 = vpack.c.bf16 %v3321_v63, %v3305_v11  ;;  %v3180_v45 = vrot.slane %v3161_v38, 7  ;;  %v3276_v24 = vrot.slane %v3161_v38, 1 }
 0x3bc   : > { %v3160_v55 = vmax.f32 %v3128_v60, 0.0  ;;  %v10678_v52 = vpack.c.bf16 %v3322_v13, %v3306_v5  ;;  %v3179_v21 = vrot.slane %v3159_v22, 7  ;;  %v3275_v59 = vrot.slane %v3159_v22, 1 }
 0x3bd   : > { %v3196_v7 = vrot.slane %v3162_v46, 7  ;;  %v3292_v50 = vrot.slane %v3162_v46, 1  ;;  %v10680_v1 = vpack.c.bf16 %v3162_v46, %v3161_v38 }
 0x3be   : > { %v3195_v51 = vrot.slane %v3160_v55, 7  ;;  %v3291_v16 = vrot.slane %v3160_v55, 1  ;;  %v7916_v4 = vpop.f32.mrb[28].mxu0  ;;  %v10682_v54 = vpack.c.bf16 %v3160_v55, %v3159_v22 }
 0x3bf   : > { %11525 = vst [vmem:[#allocation20_spill] sm:$0xff] %v10680_v1  ;;  %v3133_v19 = vadd.f32 %v7916_v4, %v10449_v25  ;;  %v3048_v31 = vpop.f32.mrb[29].mxu0  ;;  %v3212_v3 = vsel %vm433_vm3, %v3180_v45, %v3196_v7  ;;  %v3228_v5 = vsel %vm433_vm3, %v3196_v7, %v3180_v45  ;;  %v3308_v11 = vsel %vm532_vm6, %v3276_v24, %v3292_v50 }
 0x3c0   : > { %11526 = vst [vmem:[#allocation21_spill] sm:$0xff] %v10682_v54  ;;  %v3131_v38 = vadd.f32 %v10449_v25, %v3048_v31  ;;  %v7917_v60 = vpop.f32.mrb[30].mxu0  ;;  %v3211_v63 = vsel %vm433_vm3, %v3179_v21, %v3195_v51  ;;  %v3227_v22 = vsel %vm433_vm3, %v3195_v51, %v3179_v21  ;;  %v10696_v13 = vpack.c.bf16 %v3212_v3, %v3228_v5 }
 0x3c1   : > { %v3165_v46 = vmax.f32 %v3133_v19, 0.0  ;;  %v3134_v55 = vadd.f32 %v7917_v60, %v10449_v25  ;;  %7959 = vmatmul.mubr.bf16.gmra.mrb[24].mxu1 %v10682_v54  ;;  %v3051_v45 = vpop.f32.mrb[31].mxu0  ;;  %v10700_v7 = vpack.c.bf16 %v3211_v63, %v3227_v22  ;;  %v3307_v4 = vsel %vm532_vm6, %v3275_v59, %v3291_v16 }
 0x3c2   : > { %v3163_v31 = vmax.f32 %v3131_v38, 0.0  ;;  %v3132_v15 = vadd.f32 %v10449_v25, %v3051_v45  ;;  %7962 = vmatprep.mubr.bf16.mxu1 %v10680_v1  ;;  %v3323_v21 = vsel %vm532_vm6, %v3291_v16, %v3275_v59  ;;  %v3324_v51 = vsel %vm532_vm6, %v3292_v50, %v3276_v24 }
 0x3c3   : > { %v3166_v19 = vmax.f32 %v3134_v55, 0.0  ;;  %v10710_v3 = vpack.c.bf16 %v3323_v21, %v3307_v4  ;;  %v3182_v5 = vrot.slane %v3165_v46, 7  ;;  %v3278_v60 = vrot.slane %v3165_v46, 1 }
 0x3c4   : > { %v3164_v63 = vmax.f32 %v3132_v15, 0.0  ;;  %v10712_v22 = vpack.c.bf16 %v3324_v51, %v3308_v11  ;;  %v3181_v54 = vrot.slane %v3163_v31, 7  ;;  %v3277_v45 = vrot.slane %v3163_v31, 1 }
 0x3c5   : > { %v3198_v38 = vrot.slane %v3166_v19, 7  ;;  %v3294_v56 = vrot.slane %v3166_v19, 1  ;;  %v10714_v25 = vpack.c.bf16 %v3166_v19, %v3165_v46  ;;  %v9065_v19 = vld [vmem:[%s10366_s9 + $0xb0] sm:$0xff]  }
 0x3c6   : > { %v3197_v1 = vrot.slane %v3164_v63, 7  ;;  %v3293_v47 = vrot.slane %v3164_v63, 1  ;;  %v10716_v16 = vpack.c.bf16 %v3164_v63, %v3163_v31  ;;  %v9068_v63 = vld [vmem:[%s10366_s9 + $0xc8] sm:$0xff]  }
 0x3c7   : > { %v3214_v24 = vsel %vm433_vm3, %v3182_v5, %v3198_v38  ;;  %v3230_v50 = vsel %vm433_vm3, %v3198_v38, %v3182_v5  ;;  %v3310_v15 = vsel %vm532_vm6, %v3278_v60, %v3294_v56  ;;  %v3326_v59 = vsel %vm532_vm6, %v3294_v56, %v3278_v60  ;;  %v9066_v5 = vld [vmem:[%s10366_s9 + $0xb8] sm:$0xff]   ;;  %v9067_v60 = vld [vmem:[%s10366_s9 + $0xc0] sm:$0xff]   ;;  %v9069_v38 = vld [vmem:[%s10366_s9 + $0xd0] sm:$0xff]  }
 0x3c8   : > { %v3213_v11 = vsel %vm433_vm3, %v3181_v54, %v3197_v1  ;;  %v3229_v46 = vsel %vm433_vm3, %v3197_v1, %v3181_v54  ;;  %v3309_v55 = vsel %vm532_vm6, %v3277_v45, %v3293_v47  ;;  %v3325_v4 = vsel %vm532_vm6, %v3293_v47, %v3277_v45  ;;  %v9060_v1 = vld [vmem:[%s10366_s9 + $0x88] sm:$0xff]   ;;  %v9062_v47 = vld [vmem:[%s10366_s9 + $0x98] sm:$0xff]   ;;  %v9063_v54 = vld [vmem:[%s10366_s9 + $0xa0] sm:$0xff]  }
 0x3c9   : > { %7963 = vmatmul.mubr.bf16.gmra.mrb[28].mxu1 %v10716_v16  ;;  %v10735_v31 = vpack.c.bf16 %v3213_v11, %v3229_v46  ;;  %v10737_v21 = vpack.c.bf16 %v3325_v4, %v3309_v55  ;;  %v10739_v56 = vpack.c.bf16 %v3214_v24, %v3230_v50  ;;  %v10741_v51 = vpack.c.bf16 %v3326_v59, %v3310_v15  ;;  %v9070_v45 = vld [vmem:[%s10366_s9 + $0xd8] sm:$0xff]   ;;  %v9071_v24 = vld [vmem:[%s10366_s9 + $0xe0] sm:$0xff]   ;;  %v9072_v50 = vld [vmem:[%s10366_s9 + $0xe8] sm:$0xff]  }
 0x3ca   : > { %7982 = vmatprep.mubr.bf16.mxu1 %v11520_v37  ;;  %v9073_v15 = vld [vmem:[%s10366_s9 + $0xf0] sm:$0xff]   ;;  %v9074_v59 = vld [vmem:[%s10366_s9 + $0xf8] sm:$0xff]   ;;  %v9075_v11 = vld [vmem:[%s10366_s9 + $0x100] sm:$0xff]  }
 0x3cb   : > { %v9076_v46 = vld [vmem:[%s10366_s9 + $0x108] sm:$0xff]   ;;  %v9077_v55 = vld [vmem:[%s10366_s9 + $0x110] sm:$0xff]   ;;  %v9078_v4 = vld [vmem:[%s10366_s9 + $0x118] sm:$0xff]  }
 0x3d1   : > { %7983 = vmatmul.mubr.msk.bf16.vlgmr.msra.gmra.mrb[0].mxu1 %vm9811_vm5, %v10476_v27 }
 0x3d2   : > { %7986 = vmatprep.mubr.msk.bf16.mxu1 %vm9811_vm5, %v10487_v41  ;;  %8015 = vmatpush3.bf16.msra.mxu1 %v10605_v39  ;;  %v9064_v39 = vld [vmem:[%s10366_s9 + $0xa8] sm:$0xff]  }
 0x3d3   : > { %8016 = vmatprep.subr.bf16.mxu1 %v9060_v1 }
 0x3d6   : > { %8017 = vmatpush3.bf16.msra.mxu1 %v9060_v1  ;;  %v9080_v1 = vld [vmem:[%s10366_s9 + $0x128] sm:$0xff]  }
 0x3d7   : > { %8018 = vmatprep.subr.bf16.mxu1 %v9061_v35 }
 0x3d9   : > { %7987 = vmatmul.mubr.msk.bf16.gmra.mrb[4].mxu1 %vm9811_vm5, %v10513_v26 }
 0x3da   : > { %7990 = vmatprep.mubr.msk.bf16.mxu1 %vm9811_vm5, %v10519_v61  ;;  %8019 = vmatpush3.bf16.msra.mxu1 %v9061_v35  ;;  %v9081_v35 = vld [vmem:[%s10366_s9 + $0x130] sm:$0xff]  }
 0x3db   : > { %8020 = vmatprep.subr.bf16.mxu1 %v9062_v47 }
 0x3de   : > { %8021 = vmatpush3.bf16.msra.mxu1 %v9062_v47  ;;  %v9082_v47 = vld [vmem:[%s10366_s9 + $0x138] sm:$0xff]  }
 0x3df   : > { %8022 = vmatprep.subr.bf16.mxu1 %v9063_v54 }
 0x3e1   : > { %7991 = vmatmul.mubr.msk.bf16.gmra.mrb[8].mxu1 %vm9811_vm5, %v10556_v2 }
 0x3e2   : > { %7994 = vmatprep.mubr.msk.bf16.mxu1 %vm9811_vm5, %v10552_v12  ;;  %8023 = vmatpush3.bf16.msra.mxu1 %v9063_v54  ;;  %v9083_v54 = vld [vmem:[%s10366_s9 + $0x140] sm:$0xff]  }
 0x3e3   : > { %8024 = vmatprep.subr.bf16.mxu1 %v9064_v39 }
 0x3e6   : > { %8025 = vmatpush3.bf16.msra.mxu1 %v9064_v39  ;;  %v9084_v39 = vld [vmem:[%s10366_s9 + $0x148] sm:$0xff]  }
 0x3e7   : > { %8026 = vmatprep.subr.bf16.mxu1 %v9065_v19 }
 0x3e9   : > { %7995 = vmatmul.mubr.msk.bf16.gmra.mrb[12].mxu1 %vm9811_vm5, %v10594_v42 }
 0x3ea   : > { %7998 = vmatprep.mubr.msk.bf16.mxu1 %vm9811_vm5, %v10590_v43  ;;  %8027 = vmatpush3.bf16.msra.mxu1 %v9065_v19  ;;  %v9085_v19 = vld [vmem:[%s10366_s9 + $0x150] sm:$0xff]  }
 0x3eb   : > { %8028 = vmatprep.subr.bf16.mxu1 %v9066_v5 }
 0x3ee   : > { %8029 = vmatpush3.bf16.msra.mxu1 %v9066_v5  ;;  %v9086_v5 = vld [vmem:[%s10366_s9 + $0x158] sm:$0xff]  }
 0x3ef   : > { %8062 = vmatprep.subr.bf16.mxu1 %v9067_v60 }
 0x3f1   : > { %7999 = vmatmul.mubr.msk.bf16.gmra.mrb[16].mxu1 %vm9811_vm5, %v10632_v40 }
 0x3f2   : > { %8002 = vmatprep.mubr.msk.bf16.mxu1 %vm9811_vm5, %v10628_v8 }
 0x3f9   : > { %8003 = vmatmul.mubr.msk.bf16.gmra.mrb[20].mxu1 %vm9811_vm5, %v10666_v30 }
 0x3fa   : > { %8006 = vmatprep.mubr.msk.bf16.mxu1 %vm9811_vm5, %v10662_v17 }
 0x401   : > { %8007 = vmatmul.mubr.msk.bf16.gmra.mrb[24].mxu1 %vm9811_vm5, %v10700_v7 }
 0x402   : > { %8010 = vmatprep.mubr.msk.bf16.mxu1 %vm9811_vm5, %v10696_v13 }
 0x409   : > { %8011 = vmatmul.mubr.msk.bf16.gmra.mrb[28].mxu1 %vm9811_vm5, %v10735_v31 }
 0x40a   : > { %8030 = vmatprep.mubr.bf16.mxu1 %v11520_v37 }
 0x411   : > { %8031 = vmatmul.mubr.msk.bf16.vlgmr.msra.gmra.mrb[0].mxu1 %vm9645_vm2, %v10478_v10 }
 0x412   : > { %8034 = vmatprep.mubr.msk.bf16.mxu1 %vm9645_vm2, %v10491_v9  ;;  %8063 = vmatpush3.bf16.msra.mxu1 %v9067_v60  ;;  %v9088_v60 = vld [vmem:[%s10366_s9 + $0x168] sm:$0xff]  }
 0x413   : > { %8064 = vmatprep.subr.bf16.mxu1 %v9068_v63 }
 0x416   : > { %8065 = vmatpush3.bf16.msra.mxu1 %v9068_v63  ;;  %v9089_v63 = vld [vmem:[%s10366_s9 + $0x170] sm:$0xff]  }
 0x417   : > { %8066 = vmatprep.subr.bf16.mxu1 %v9069_v38 }
 0x419   : > { %8035 = vmatmul.mubr.msk.bf16.gmra.mrb[4].mxu1 %vm9645_vm2, %v10528_v20 }
 0x41a   : > { %8038 = vmatprep.mubr.msk.bf16.mxu1 %vm9645_vm2, %v10545_v33  ;;  %8067 = vmatpush3.bf16.msra.mxu1 %v9069_v38  ;;  %v9090_v38 = vld [vmem:[%s10366_s9 + $0x178] sm:$0xff]  }
 0x41b   : > { %8068 = vmatprep.subr.bf16.mxu1 %v9070_v45 }
 0x41e   : > { %8069 = vmatpush3.bf16.msra.mxu1 %v9070_v45  ;;  %v11527_v45 = vld [vmem:[#allocation17_spill] sm:$0xff] }
 0x41f   : > { %8070 = vmatprep.subr.bf16.mxu1 %v9071_v24 }
 0x421   : > { %8039 = vmatmul.mubr.msk.bf16.gmra.mrb[8].mxu1 %vm9645_vm2, %v10567_v29 }
 0x422   : > { %8042 = vmatprep.mubr.msk.bf16.mxu1 %vm9645_vm2, %v10573_v14  ;;  %8071 = vmatpush3.bf16.msra.mxu1 %v9071_v24  ;;  %v9091_v24 = vld [vmem:[%s10366_s9 + $0x180] sm:$0xff]  }
 0x423   : > { %8072 = vmatprep.subr.bf16.mxu1 %v9072_v50 }
 0x426   : > { %8073 = vmatpush3.bf16.msra.mxu1 %v9072_v50  ;;  %v11528_v50 = vld [vmem:[#allocation16_spill] sm:$0xff] }
 0x427   : > { %8074 = vmatprep.subr.bf16.mxu1 %v9073_v15 }
 0x429   : > { %8043 = vmatmul.mubr.msk.bf16.gmra.mrb[12].mxu1 %vm9645_vm2, %v10607_v36 }
 0x42a   : > { %8046 = vmatprep.mubr.msk.bf16.mxu1 %vm9645_vm2, %v10609_v0  ;;  %8075 = vmatpush3.bf16.msra.mxu1 %v9073_v15  ;;  %v11529_v15 = vld [vmem:[#allocation19_spill] sm:$0xff] }
 0x42b   : > { %8076 = vmatprep.subr.bf16.mxu1 %v9074_v59 }
 0x42e   : > { %8077 = vmatpush3.bf16.msra.mxu1 %v9074_v59  ;;  %v11530_v59 = vld [vmem:[#allocation18_spill] sm:$0xff] }
 0x42f   : > { %8110 = vmatprep.subr.bf16.mxu1 %v9075_v11 }
 0x431   : > { %8047 = vmatmul.mubr.msk.bf16.gmra.mrb[16].mxu1 %vm9645_vm2, %v10642_v58 }
 0x432   : > { %8050 = vmatprep.mubr.msk.bf16.mxu1 %vm9645_vm2, %v10644_v23 }
 0x439   : > { %8051 = vmatmul.mubr.msk.bf16.gmra.mrb[20].mxu1 %vm9645_vm2, %v10676_v53 }
 0x43a   : > { %8054 = vmatprep.mubr.msk.bf16.mxu1 %vm9645_vm2, %v10678_v52 }
 0x441   : > { %8055 = vmatmul.mubr.msk.bf16.gmra.mrb[24].mxu1 %vm9645_vm2, %v10710_v3 }
 0x442   : > { %8058 = vmatprep.mubr.msk.bf16.mxu1 %vm9645_vm2, %v10712_v22 }
 0x449   : > { %8059 = vmatmul.mubr.msk.bf16.gmra.mrb[28].mxu1 %vm9645_vm2, %v10737_v21 }
 0x44a   : > { %8078 = vmatprep.mubr.msk.bf16.mxu1 %vm9811_vm5, %v10476_v27  ;;  %v9079_v27 = vld [vmem:[%s10366_s9 + $0x120] sm:$0xff]  }
 0x451   : > { %8079 = vmatmul.mubr.msk.bf16.vlgmr.msra.gmra.mrb[0].mxu1 %vm9811_vm5, %v10487_v41 }
 0x452   : > { %8082 = vmatprep.mubr.msk.bf16.mxu1 %vm9811_vm5, %v10513_v26  ;;  %8111 = vmatpush3.bf16.msra.mxu1 %v9075_v11  ;;  %v11531_v11 = vld [vmem:[#allocation21_spill] sm:$0xff] }
 0x453   : > { %8112 = vmatprep.subr.bf16.mxu1 %v9076_v46 }
 0x456   : > { %8113 = vmatpush3.bf16.msra.mxu1 %v9076_v46  ;;  %v11532_v46 = vld [vmem:[#allocation20_spill] sm:$0xff] }
 0x457   : > { %8114 = vmatprep.subr.bf16.mxu1 %v9077_v55 }
 0x459   : > { %8083 = vmatmul.mubr.msk.bf16.gmra.mrb[4].mxu1 %vm9811_vm5, %v10519_v61 }
 0x45a   : > { %8086 = vmatprep.mubr.msk.bf16.mxu1 %vm9811_vm5, %v10556_v2  ;;  %8115 = vmatpush3.bf16.msra.mxu1 %v9077_v55  ;;  %v9092_v55 = vld [vmem:[%s10366_s9 + $0x188] sm:$0xff]  }
 0x45b   : > { %8116 = vmatprep.subr.bf16.mxu1 %v9078_v4 }
 0x45e   : > { %8117 = vmatpush3.bf16.msra.mxu1 %v9078_v4  ;;  %v9093_v4 = vld [vmem:[%s10366_s9 + $0x190] sm:$0xff]  }
 0x45f   : > { %8118 = vmatprep.subr.bf16.mxu1 %v9079_v27 }
 0x461   : > { %8087 = vmatmul.mubr.msk.bf16.gmra.mrb[8].mxu1 %vm9811_vm5, %v10552_v12 }
 0x462   : > { %8090 = vmatprep.mubr.msk.bf16.mxu1 %vm9811_vm5, %v10594_v42  ;;  %8119 = vmatpush3.bf16.msra.mxu1 %v9079_v27  ;;  %v9094_v27 = vld [vmem:[%s10366_s9 + $0x198] sm:$0xff]  }
 0x463   : > { %8120 = vmatprep.subr.bf16.mxu1 %v9080_v1 }
 0x466   : > { %8121 = vmatpush3.bf16.msra.mxu1 %v9080_v1  ;;  %v9096_v1 = vld [vmem:[%s10366_s9 + $0x1a8] sm:$0xff]  }
 0x467   : > { %8122 = vmatprep.subr.bf16.mxu1 %v9081_v35 }
 0x469   : > { %8091 = vmatmul.mubr.msk.bf16.gmra.mrb[12].mxu1 %vm9811_vm5, %v10590_v43 }
 0x46a   : > { %8094 = vmatprep.mubr.msk.bf16.mxu1 %vm9811_vm5, %v10632_v40  ;;  %8123 = vmatpush3.bf16.msra.mxu1 %v9081_v35  ;;  %v9097_v35 = vld [vmem:[%s10366_s9 + $0x1b0] sm:$0xff]  }
 0x46b   : > { %8124 = vmatprep.subr.bf16.mxu1 %v9082_v47 }
 0x46e   : > { %8125 = vmatpush3.bf16.msra.mxu1 %v9082_v47  ;;  %v9098_v47 = vld [vmem:[%s10366_s9 + $0x1b8] sm:$0xff]  }
 0x46f   : > { %8158 = vmatprep.subr.bf16.mxu1 %v9083_v54 }
 0x471   : > { %8095 = vmatmul.mubr.msk.bf16.gmra.mrb[16].mxu1 %vm9811_vm5, %v10628_v8 }
 0x472   : > { %8098 = vmatprep.mubr.msk.bf16.mxu1 %vm9811_vm5, %v10666_v30 }
 0x479   : > { %8099 = vmatmul.mubr.msk.bf16.gmra.mrb[20].mxu1 %vm9811_vm5, %v10662_v17 }
 0x47a   : > { %8102 = vmatprep.mubr.msk.bf16.mxu1 %vm9811_vm5, %v10700_v7 }
 0x481   : > { %8103 = vmatmul.mubr.msk.bf16.gmra.mrb[24].mxu1 %vm9811_vm5, %v10696_v13 }
 0x482   : > { %8106 = vmatprep.mubr.msk.bf16.mxu1 %vm9811_vm5, %v10735_v31 }
 0x489   : > { %8107 = vmatmul.mubr.msk.bf16.gmra.mrb[28].mxu1 %vm9811_vm5, %v10739_v56 }
 0x48a   : > { %8126 = vmatprep.mubr.bf16.mxu1 %v10457_v62  ;;  %v9087_v62 = vld [vmem:[%s10366_s9 + $0x160] sm:$0xff]  }
 0x491   : > { %8127 = vmatmul.mubr.bf16.vlgmr.msra.gmra.mrb[0].mxu1 %v10455_v34 }
 0x492   : > { %8130 = vmatprep.mubr.bf16.mxu1 %v10496_v49  ;;  %8159 = vmatpush3.bf16.msra.mxu1 %v9083_v54  ;;  %v9099_v54 = vld [vmem:[%s10366_s9 + $0x1c0] sm:$0xff]  }
 0x493   : > { %8160 = vmatprep.subr.bf16.mxu1 %v9084_v39 }
 0x496   : > { %8161 = vmatpush3.bf16.msra.mxu1 %v9084_v39  ;;  %v9100_v39 = vld [vmem:[%s10366_s9 + $0x1c8] sm:$0xff]  }
 0x497   : > { %8162 = vmatprep.subr.bf16.mxu1 %v9085_v19 }
 0x499   : > { %8131 = vmatmul.mubr.bf16.gmra.mrb[4].mxu1 %v10499_v18 }
 0x49a   : > { %8134 = vmatprep.mubr.bf16.mxu1 %v10535_v28  ;;  %8163 = vmatpush3.bf16.msra.mxu1 %v9085_v19  ;;  %v9101_v19 = vld [vmem:[%s10366_s9 + $0x1d0] sm:$0xff]  }
 0x49b   : > { %8164 = vmatprep.subr.bf16.mxu1 %v9086_v5 }
 0x49e   : > { %8165 = vmatpush3.bf16.msra.mxu1 %v9086_v5  ;;  %v9102_v5 = vld [vmem:[%s10366_s9 + $0x1d8] sm:$0xff]  }
 0x49f   : > { %8166 = vmatprep.subr.bf16.mxu1 %v9087_v62 }
 0x4a1   : > { %8135 = vmatmul.mubr.bf16.gmra.mrb[8].mxu1 %v10531_v6 }
 0x4a2   : > { %8138 = vmatprep.mubr.bf16.mxu1 %v10575_v48  ;;  %8167 = vmatpush3.bf16.msra.mxu1 %v9087_v62  ;;  %v9120_v62 = vld [vmem:[#allocation2 + $0x20] sm:$0xff] }
 0x4a3   : > { %8168 = vmatprep.subr.bf16.mxu1 %v9088_v60 }
 0x4a6   : > { %8169 = vmatpush3.bf16.msra.mxu1 %v9088_v60 }
 0x4a7   : > { %8170 = vmatprep.subr.bf16.mxu1 %v9089_v63 }
 0x4a9   : > { %8139 = vmatmul.mubr.bf16.gmra.mrb[12].mxu1 %v10571_v32 }
 0x4aa   : > { %8142 = vmatprep.mubr.bf16.mxu1 %v11527_v45  ;;  %8171 = vmatpush3.bf16.msra.mxu1 %v9089_v63 }
 0x4ab   : > { %8172 = vmatprep.subr.bf16.mxu1 %v9090_v38 }
 0x4ae   : > { %8173 = vmatpush3.bf16.msra.mxu1 %v9090_v38 }
 0x4af   : > { %8206 = vmatprep.subr.bf16.mxu1 %v9091_v24 }
 0x4b1   : > { %8143 = vmatmul.mubr.bf16.gmra.mrb[16].mxu1 %v11528_v50 }
 0x4b2   : > { %8146 = vmatprep.mubr.bf16.mxu1 %v11529_v15 }
 0x4b9   : > { %8147 = vmatmul.mubr.bf16.gmra.mrb[20].mxu1 %v11530_v59 }
 0x4ba   : > { %8150 = vmatprep.mubr.bf16.mxu1 %v11531_v11 }
 0x4c1   : > { %8151 = vmatmul.mubr.bf16.gmra.mrb[24].mxu1 %v11532_v46 }
 0x4c2   : > { %8154 = vmatprep.mubr.bf16.mxu1 %v10716_v16 }
 0x4c9   : > { %8155 = vmatmul.mubr.bf16.gmra.mrb[28].mxu1 %v10714_v25 }
 0x4ca   : > { %8174 = vmatprep.mubr.msk.bf16.mxu1 %vm9645_vm2, %v10478_v10  ;;  %v9095_v10 = vld [vmem:[%s10366_s9 + $0x1a0] sm:$0xff]  }
 0x4d1   : > { %8175 = vmatmul.mubr.msk.bf16.vlgmr.msra.gmra.mrb[0].mxu1 %vm9645_vm2, %v10491_v9 }
 0x4d2   : > { %8178 = vmatprep.mubr.msk.bf16.mxu1 %vm9645_vm2, %v10528_v20  ;;  %8207 = vmatpush3.bf16.msra.mxu1 %v9091_v24 }
 0x4d3   : > { %8208 = vmatprep.subr.bf16.mxu1 %v9092_v55 }
 0x4d6   : > { %8209 = vmatpush3.bf16.msra.mxu1 %v9092_v55 }
 0x4d7   : > { %8210 = vmatprep.subr.bf16.mxu1 %v9093_v4 }
 0x4d9   : > { %8179 = vmatmul.mubr.msk.bf16.gmra.mrb[4].mxu1 %vm9645_vm2, %v10545_v33 }
 0x4da   : > { %8182 = vmatprep.mubr.msk.bf16.mxu1 %vm9645_vm2, %v10567_v29  ;;  %8211 = vmatpush3.bf16.msra.mxu1 %v9093_v4 }
 0x4db   : > { %8212 = vmatprep.subr.bf16.mxu1 %v9094_v27 }
 0x4de   : > { %8213 = vmatpush3.bf16.msra.mxu1 %v9094_v27 }
 0x4df   : > { %8214 = vmatprep.subr.bf16.mxu1 %v9095_v10 }
 0x4e1   : > { %8183 = vmatmul.mubr.msk.bf16.gmra.mrb[8].mxu1 %vm9645_vm2, %v10573_v14 }
 0x4e2   : > { %8186 = vmatprep.mubr.msk.bf16.mxu1 %vm9645_vm2, %v10607_v36  ;;  %8215 = vmatpush3.bf16.msra.mxu1 %v9095_v10 }
 0x4e3   : > { %8216 = vmatprep.subr.bf16.mxu1 %v9096_v1 }
 0x4e6   : > { %8217 = vmatpush3.bf16.msra.mxu1 %v9096_v1 }
 0x4e7   : > { %8218 = vmatprep.subr.bf16.mxu1 %v9097_v35 }
 0x4e9   : > { %8187 = vmatmul.mubr.msk.bf16.gmra.mrb[12].mxu1 %vm9645_vm2, %v10609_v0 }
 0x4ea   : > { %8190 = vmatprep.mubr.msk.bf16.mxu1 %vm9645_vm2, %v10642_v58  ;;  %8219 = vmatpush3.bf16.msra.mxu1 %v9097_v35  ;;  %v9123_v35 = vld [vmem:[#allocation2 + $0x50] sm:$0xff] }
 0x4eb   : > { %8220 = vmatprep.subr.bf16.mxu1 %v9098_v47 }
 0x4ee   : > { %8221 = vmatpush3.bf16.msra.mxu1 %v9098_v47 }
 0x4ef   : > { %8254 = vmatprep.subr.bf16.mxu1 %v9099_v54 }
 0x4f1   : > { %8191 = vmatmul.mubr.msk.bf16.gmra.mrb[16].mxu1 %vm9645_vm2, %v10644_v23 }
 0x4f2   : > { %8194 = vmatprep.mubr.msk.bf16.mxu1 %vm9645_vm2, %v10676_v53 }
 0x4f9   : > { %8195 = vmatmul.mubr.msk.bf16.gmra.mrb[20].mxu1 %vm9645_vm2, %v10678_v52 }
 0x4fa   : > { %8198 = vmatprep.mubr.msk.bf16.mxu1 %vm9645_vm2, %v10710_v3 }
 0x501   : > { %8199 = vmatmul.mubr.msk.bf16.gmra.mrb[24].mxu1 %vm9645_vm2, %v10712_v22 }
 0x502   : > { %8202 = vmatprep.mubr.msk.bf16.mxu1 %vm9645_vm2, %v10737_v21 }
 0x509   : > { %8203 = vmatmul.mubr.msk.bf16.gmra.mrb[28].mxu1 %vm9645_vm2, %v10741_v51 }
 0x50a   : > { %8222 = vmatprep.mubr.msk.bf16.mxu1 %vm9811_vm5, %v10487_v41  ;;  %v9103_v41 = vld [vmem:[%s10366_s9 + $0x1e0] sm:$0xff]  }
 0x511   : > { %8223 = vmatmul.mubr.msk.bf16.vlgmr.msra.gmra.mrb[0].mxu1 %vm9811_vm5, %v10513_v26  ;;  %v9104_v26 = vld [vmem:[%s10366_s9 + $0x1e8] sm:$0xff]  }
 0x512   : > { %8226 = vmatprep.mubr.msk.bf16.mxu1 %vm9811_vm5, %v10519_v61  ;;  %8255 = vmatpush3.bf16.msra.mxu1 %v9099_v54  ;;  %v9105_v61 = vld [vmem:[%s10366_s9 + $0x1f0] sm:$0xff]  }
 0x513   : > { %8256 = vmatprep.subr.bf16.mxu1 %v9100_v39 }
 0x516   : > { %8257 = vmatpush3.bf16.msra.mxu1 %v9100_v39 }
 0x517   : > { %8258 = vmatprep.subr.bf16.mxu1 %v9101_v19 }
 0x519   : > { %8227 = vmatmul.mubr.msk.bf16.gmra.mrb[4].mxu1 %vm9811_vm5, %v10556_v2  ;;  %v9107_v2 = vld [vmem:[%s10366_s9 + $0x200] sm:$0xff]  }
 0x51a   : > { %8230 = vmatprep.mubr.msk.bf16.mxu1 %vm9811_vm5, %v10552_v12  ;;  %8259 = vmatpush3.bf16.msra.mxu1 %v9101_v19  ;;  %v9106_v12 = vld [vmem:[%s10366_s9 + $0x1f8] sm:$0xff]   ;;  %v9124_v19 = vld [vmem:[#allocation2 + $0x40] sm:$0xff] }
 0x51b   : > { %8260 = vmatprep.subr.bf16.mxu1 %v9102_v5 }
 0x51e   : > { %8261 = vmatpush3.bf16.msra.mxu1 %v9102_v5 }
 0x51f   : > { %8262 = vmatprep.subr.bf16.mxu1 %v9103_v41 }
 0x521   : > { %8231 = vmatmul.mubr.msk.bf16.gmra.mrb[8].mxu1 %vm9811_vm5, %v10594_v42  ;;  %v9109_v42 = vld [vmem:[%s10366_s9 + $0x210] sm:$0xff]  }
 0x522   : > { %8234 = vmatprep.mubr.msk.bf16.mxu1 %vm9811_vm5, %v10590_v43  ;;  %8263 = vmatpush3.bf16.msra.mxu1 %v9103_v41  ;;  %v9108_v43 = vld [vmem:[%s10366_s9 + $0x208] sm:$0xff]  }
 0x523   : > { %8264 = vmatprep.subr.bf16.mxu1 %v9104_v26 }
 0x526   : > { %8265 = vmatpush3.bf16.msra.mxu1 %v9104_v26 }
 0x527   : > { %8266 = vmatprep.subr.bf16.mxu1 %v9105_v61 }
 0x529   : > { %8235 = vmatmul.mubr.msk.bf16.gmra.mrb[12].mxu1 %vm9811_vm5, %v10632_v40 }
 0x52a   : > { %8238 = vmatprep.mubr.msk.bf16.mxu1 %vm9811_vm5, %v10628_v8  ;;  %8267 = vmatpush3.bf16.msra.mxu1 %v9105_v61  ;;  %v9110_v8 = vld [vmem:[%s10366_s9 + $0x218] sm:$0xff]  }
 0x52b   : > { %8268 = vmatprep.subr.bf16.mxu1 %v9106_v12  ;;  %v9125_v61 = vld [vmem:[#allocation2 + $0x58] sm:$0xff] }
 0x52e   : > { %8269 = vmatpush3.bf16.msra.mxu1 %v9106_v12 }
 0x52f   : > { %8302 = vmatprep.subr.bf16.mxu1 %v9107_v2 }
 0x531   : > { %8239 = vmatmul.mubr.msk.bf16.gmra.mrb[16].mxu1 %vm9811_vm5, %v10666_v30  ;;  %v9118_v30 = vld [vmem:[#allocation2 + $0x8] sm:$0xff] }
 0x532   : > { %8242 = vmatprep.mubr.msk.bf16.mxu1 %vm9811_vm5, %v10662_v17 }
 0x539   : > { %8243 = vmatmul.mubr.msk.bf16.gmra.mrb[20].mxu1 %vm9811_vm5, %v10700_v7 }
 0x53a   : > { %8246 = vmatprep.mubr.msk.bf16.mxu1 %vm9811_vm5, %v10696_v13 }
 0x541   : > { %8247 = vmatmul.mubr.msk.bf16.gmra.mrb[24].mxu1 %vm9811_vm5, %v10735_v31  ;;  %v9119_v31 = vld [vmem:[#allocation2 + $0x30] sm:$0xff] }
 0x542   : > { %8250 = vmatprep.mubr.msk.bf16.mxu1 %vm9811_vm5, %v10739_v56 }
 0x549   : > { %8251 = vmatmul.mubr.bf16.gmra.mrb[28].mxu1 %v11520_v37 }
 0x54a   : > { %8270 = vmatprep.mubr.bf16.mxu1 %v10455_v34  ;;  %v9112_v34 = vld [vmem:[%s10366_s9 + $0x228] sm:$0xff]  }
 0x551   : > { %8271 = vmatmul.mubr.bf16.vlgmr.msra.gmra.mrb[0].mxu1 %v10496_v49  ;;  %v9113_v49 = vld [vmem:[%s10366_s9 + $0x230] sm:$0xff]  }
 0x552   : > { %8274 = vmatprep.mubr.bf16.mxu1 %v10499_v18  ;;  %8303 = vmatpush3.bf16.msra.mxu1 %v9107_v2  ;;  %v9114_v18 = vld [vmem:[%s10366_s9 + $0x238] sm:$0xff]  }
 0x553   : > { %8304 = vmatprep.subr.bf16.mxu1 %v9108_v43 }
 0x556   : > { %8305 = vmatpush3.bf16.msra.mxu1 %v9108_v43  ;;  %v9126_v43 = vld [vmem:[#allocation2 + $0x48] sm:$0xff] }
 0x557   : > { %8306 = vmatprep.subr.bf16.mxu1 %v9109_v42 }
 0x559   : > { %8275 = vmatmul.mubr.bf16.gmra.mrb[4].mxu1 %v10535_v28 }
 0x55a   : > { %8278 = vmatprep.mubr.bf16.mxu1 %v10531_v6  ;;  %8307 = vmatpush3.bf16.msra.mxu1 %v9109_v42 }
 0x55b   : > { %8308 = vmatprep.subr.bf16.mxu1 %v9110_v8 }
 0x55e   : > { %8309 = vmatpush3.bf16.msra.mxu1 %v9110_v8 }
 0x55f   : > { %8310 = vmatprep.subr.bf16.mxu1 %v9111_v57 }
 0x561   : > { %8279 = vmatmul.mubr.bf16.gmra.mrb[8].mxu1 %v10575_v48 }
 0x562   : > { %8282 = vmatprep.mubr.bf16.mxu1 %v10571_v32  ;;  %8311 = vmatpush3.bf16.msra.mxu1 %v9111_v57  ;;  %v9115_v32 = vld [vmem:[#allocation2 + $0x10] sm:$0xff] }
 0x563   : > { %8312 = vmatprep.subr.bf16.mxu1 %v9112_v34 }
 0x566   : > { %8313 = vmatpush3.bf16.msra.mxu1 %v9112_v34 }
 0x567   : > { %8314 = vmatprep.subr.bf16.mxu1 %v9113_v49 }
 0x569   : > { %8283 = vmatmul.mubr.bf16.gmra.mrb[12].mxu1 %v11527_v45  ;;  %v9121_v45 = vld [vmem:[#allocation2 + $0x38] sm:$0xff] }
 0x56a   : > { %8286 = vmatprep.mubr.bf16.mxu1 %v11528_v50  ;;  %8315 = vmatpush3.bf16.msra.mxu1 %v9113_v49 }
 0x56b   : > { %8316 = vmatprep.subr.bf16.mxu1 %v9114_v18 }
 0x56e   : > { %8317 = vmatpush3.bf16.msra.mxu1 %v9114_v18 }
 0x571   : > { %8287 = vmatmul.mubr.bf16.gmra.mrb[16].mxu1 %v11529_v15  ;;  %v9122_v15 = vld [vmem:[#allocation2 + $0x28] sm:$0xff] }
 0x572   : > { %8290 = vmatprep.mubr.bf16.mxu1 %v11530_v59 }
 0x579   : > { %8291 = vmatmul.mubr.bf16.gmra.mrb[20].mxu1 %v11531_v11 }
 0x57a   : > { %8294 = vmatprep.mubr.bf16.mxu1 %v11532_v46 }
 0x581   : > { %8295 = vmatmul.mubr.bf16.gmra.mrb[24].mxu1 %v10716_v16 }
 0x582   : > { %8298 = vmatprep.mubr.bf16.mxu1 %v10714_v25 }
 0x589   : > { %8299 = vmatmul.mubr.bf16.gmra.mrb[28].mxu1 %v11520_v37 }
 0x58a   : > { %8318 = vmatprep.mubr.msk.bf16.mxu1 %vm9645_vm2, %v10491_v9  ;;  %v11115_v9 = vld [vmem:[%s5850_s11] ss:$0 sm:$0xff] }
 0x591   : > { %8319 = vmatmul.mubr.msk.bf16.vlgmr.msra.gmra.mrb[0].mxu1 %vm9645_vm2, %v10528_v20 }
 0x592   : > { %8322 = vmatprep.mubr.msk.bf16.mxu1 %vm9645_vm2, %v10545_v33 }
 0x599   : > { %8323 = vmatmul.mubr.msk.bf16.gmra.mrb[4].mxu1 %vm9645_vm2, %v10567_v29 }
 0x59a   : > { %8326 = vmatprep.mubr.msk.bf16.mxu1 %vm9645_vm2, %v10573_v14 }
 0x5a1   : > { %8327 = vmatmul.mubr.msk.bf16.gmra.mrb[8].mxu1 %vm9645_vm2, %v10607_v36 }
 0x5a2   : > { %8330 = vmatprep.mubr.msk.bf16.mxu1 %vm9645_vm2, %v10609_v0 }
 0x5a9   : > { %8331 = vmatmul.mubr.msk.bf16.gmra.mrb[12].mxu1 %vm9645_vm2, %v10642_v58  ;;  %v9117_v58 = vld [vmem:[#allocation2 + $0x18] sm:$0xff] }
 0x5aa   : > { %8334 = vmatprep.mubr.msk.bf16.mxu1 %vm9645_vm2, %v10644_v23 }
 0x5b1   : > { %8335 = vmatmul.mubr.msk.bf16.gmra.mrb[16].mxu1 %vm9645_vm2, %v10676_v53 }
 0x5b2   : > { %8338 = vmatprep.mubr.msk.bf16.mxu1 %vm9645_vm2, %v10678_v52 }
 0x5b9   : > { %8339 = vmatmul.mubr.msk.bf16.gmra.mrb[20].mxu1 %vm9645_vm2, %v10710_v3 }
 0x5ba   : > { %8342 = vmatprep.mubr.msk.bf16.mxu1 %vm9645_vm2, %v10712_v22 }
 0x5c1   : > { %8343 = vmatmul.mubr.msk.bf16.gmra.mrb[24].mxu1 %vm9645_vm2, %v10737_v21 }
 0x5c2   : > { %8346 = vmatprep.mubr.msk.bf16.mxu1 %vm9645_vm2, %v10741_v51 }
 0x5c9   : > { %8347 = vmatmul.mubr.bf16.gmra.mrb[28].mxu1 %v11520_v37  ;;  %v9116_v37 = vld [vmem:[#allocation2] sm:$0xff] }
 0x664   : > { %v8320_v20 = vpop.f32.mrb[0].mxu1 }
 0x665   : > { %v5860_v6 = vadd.f32 %v8320_v20, %v11115_v9  ;;  %v5691_v28 = vpop.f32.mrb[1].mxu1 }
 0x666   : > { %v5858_v33 = vadd.f32 %v11115_v9, %v5691_v28  ;;  %v8321_v29 = vpop.f32.mrb[2].mxu1  ;;  %v9127_v28 = vld [vmem:[#allocation2 + $0x70] sm:$0xff] }
 0x667   : > { %v11119_v14 = vadd.f32 %v9115_v32, %v5860_v6  ;;  %v5861_v44 = vadd.f32 %v8321_v29, %v11115_v9  ;;  %v5694_v48 = vpop.f32.mrb[3].mxu1 }
 0x668   : > { %v11122_v36 = vadd.f32 %v9116_v37, %v5858_v33  ;;  %v5859_v0 = vadd.f32 %v11115_v9, %v5694_v48 }
 0x669   : > { %v5924_v40 = vmax.f32 %v11119_v14, 0.0  ;;  %v11126_v23 = vadd.f32 %v9117_v58, %v5861_v44  ;;  %v9128_v44 = vld [vmem:[#allocation2 + $0x60] sm:$0xff]  ;;  %v9129_v58 = vld [vmem:[#allocation2 + $0x78] sm:$0xff] }
 0x66a   : > { %v5922_v17 = vmax.f32 %v11122_v36, 0.0  ;;  %v11129_v53 = vadd.f32 %v9118_v30, %v5859_v0 }
 0x66b   : > { %5956 = vst [vmem:[#allocation2 + $0x10] sm:$0xff] %v5924_v40  ;;  %v5925_v52 = vmax.f32 %v11126_v23, 0.0  ;;  %5992 = vst [vmem:[%s9591_s7 + $0x10] sm:$0xff] (!%p6308_p4), %v5924_v40 }
 0x66c   : > { %5954 = vst [vmem:[#allocation2] sm:$0xff] %v5922_v17  ;;  %v5923_v13 = vmax.f32 %v11129_v53, 0.0  ;;  %v8324_v7 = vpop.f32.mrb[4].mxu1  ;;  %5990 = vst [vmem:[%s9591_s7] sm:$0xff] (!%p6308_p4), %v5922_v17 }
 0x66d   : > { %5957 = vst [vmem:[#allocation2 + $0x18] sm:$0xff] %v5925_v52  ;;  %v5864_v3 = vadd.f32 %v8324_v7, %v11115_v9  ;;  %v5707_v22 = vpop.f32.mrb[5].mxu1  ;;  %5993 = vst [vmem:[%s9591_s7 + $0x18] sm:$0xff] (!%p6308_p4), %v5925_v52 }
 0x66e   : > { %5955 = vst [vmem:[#allocation2 + $0x8] sm:$0xff] %v5923_v13  ;;  %v5862_v25 = vadd.f32 %v11115_v9, %v5707_v22  ;;  %v8325_v16 = vpop.f32.mrb[6].mxu1  ;;  %5991 = vst [vmem:[%s9591_s7 + $0x8] sm:$0xff] (!%p6308_p4), %v5923_v13 }
 0x66f   : > { %v11143_v21 = vadd.f32 %v9119_v31, %v5864_v3  ;;  %v5865_v56 = vadd.f32 %v8325_v16, %v11115_v9  ;;  %v5710_v51 = vpop.f32.mrb[7].mxu1  ;;  %v9130_v3 = vld [vmem:[#allocation2 + $0x68] sm:$0xff] }
 0x670   : > { %v11146_v60 = vadd.f32 %v9120_v62, %v5862_v25  ;;  %v5863_v63 = vadd.f32 %v11115_v9, %v5710_v51 }
 0x671   : > { %v5928_v38 = vmax.f32 %v11143_v21, 0.0  ;;  %v11150_v24 = vadd.f32 %v9121_v45, %v5865_v56  ;;  %v9131_v45 = vld [vmem:[#allocation2 + $0x90] sm:$0xff] }
 0x672   : > { %v5926_v50 = vmax.f32 %v11146_v60, 0.0  ;;  %v11153_v59 = vadd.f32 %v9122_v15, %v5863_v63 }
 0x673   : > { %5960 = vst [vmem:[#allocation2 + $0x30] sm:$0xff] %v5928_v38  ;;  %v5929_v11 = vmax.f32 %v11150_v24, 0.0  ;;  %5996 = vst [vmem:[%s9591_s7 + $0x30] sm:$0xff] (!%p6308_p4), %v5928_v38 }
 0x674   : > { %5958 = vst [vmem:[#allocation2 + $0x20] sm:$0xff] %v5926_v50  ;;  %v5927_v46 = vmax.f32 %v11153_v59, 0.0  ;;  %v8328_v55 = vpop.f32.mrb[8].mxu1  ;;  %5994 = vst [vmem:[%s9591_s7 + $0x20] sm:$0xff] (!%p6308_p4), %v5926_v50 }
 0x675   : > { %5961 = vst [vmem:[#allocation2 + $0x38] sm:$0xff] %v5929_v11  ;;  %v5868_v4 = vadd.f32 %v8328_v55, %v11115_v9  ;;  %v5723_v27 = vpop.f32.mrb[9].mxu1  ;;  %5997 = vst [vmem:[%s9591_s7 + $0x38] sm:$0xff] (!%p6308_p4), %v5929_v11 }
 0x676   : > { %5959 = vst [vmem:[#allocation2 + $0x28] sm:$0xff] %v5927_v46  ;;  %v5866_v10 = vadd.f32 %v11115_v9, %v5723_v27  ;;  %v8329_v1 = vpop.f32.mrb[10].mxu1  ;;  %v9132_v27 = vld [vmem:[#allocation2 + $0x80] sm:$0xff]  ;;  %5995 = vst [vmem:[%s9591_s7 + $0x28] sm:$0xff] (!%p6308_p4), %v5927_v46 }
 0x677   : > { %v11167_v47 = vadd.f32 %v9123_v35, %v5868_v4  ;;  %v5869_v54 = vadd.f32 %v8329_v1, %v11115_v9  ;;  %v5726_v39 = vpop.f32.mrb[11].mxu1 }
 0x678   : > { %v11170_v5 = vadd.f32 %v9124_v19, %v5866_v10  ;;  %v5867_v41 = vadd.f32 %v11115_v9, %v5726_v39 }
 0x679   : > { %v5932_v26 = vmax.f32 %v11167_v47, 0.0  ;;  %v11174_v12 = vadd.f32 %v9125_v61, %v5869_v54  ;;  %v9133_v54 = vld [vmem:[#allocation2 + $0x98] sm:$0xff] }
 0x67a   : > { %v5930_v2 = vmax.f32 %v11170_v5, 0.0  ;;  %v11177_v42 = vadd.f32 %v9126_v43, %v5867_v41  ;;  %v9134_v41 = vld [vmem:[#allocation2 + $0x88] sm:$0xff] }
 0x67b   : > { %5964 = vst [vmem:[#allocation2 + $0x50] sm:$0xff] %v5932_v26  ;;  %v5933_v8 = vmax.f32 %v11174_v12, 0.0  ;;  %6000 = vst [vmem:[%s9591_s7 + $0x50] sm:$0xff] (!%p6308_p4), %v5932_v26 }
 0x67c   : > { %5962 = vst [vmem:[#allocation2 + $0x40] sm:$0xff] %v5930_v2  ;;  %v5931_v57 = vmax.f32 %v11177_v42, 0.0  ;;  %v8332_v34 = vpop.f32.mrb[12].mxu1  ;;  %5998 = vst [vmem:[%s9591_s7 + $0x40] sm:$0xff] (!%p6308_p4), %v5930_v2 }
 0x67d   : > { %5965 = vst [vmem:[#allocation2 + $0x58] sm:$0xff] %v5933_v8  ;;  %v5872_v49 = vadd.f32 %v8332_v34, %v11115_v9  ;;  %v5739_v18 = vpop.f32.mrb[13].mxu1  ;;  %6001 = vst [vmem:[%s9591_s7 + $0x58] sm:$0xff] (!%p6308_p4), %v5933_v8 }
 0x67e   : > { %5963 = vst [vmem:[#allocation2 + $0x48] sm:$0xff] %v5931_v57  ;;  %v5870_v20 = vadd.f32 %v11115_v9, %v5739_v18  ;;  %v8333_v6 = vpop.f32.mrb[14].mxu1  ;;  %5999 = vst [vmem:[%s9591_s7 + $0x48] sm:$0xff] (!%p6308_p4), %v5931_v57 }
 0x67f   : > { %v11191_v33 = vadd.f32 %v9127_v28, %v5872_v49  ;;  %v5873_v29 = vadd.f32 %v8333_v6, %v11115_v9  ;;  %v5742_v32 = vpop.f32.mrb[15].mxu1 }
 0x680   : > { %v11194_v48 = vadd.f32 %v9128_v44, %v5870_v20  ;;  %v5871_v37 = vadd.f32 %v11115_v9, %v5742_v32 }
 0x681   : > { %v5936_v0 = vmax.f32 %v11191_v33, 0.0  ;;  %v11198_v30 = vadd.f32 %v9129_v58, %v5873_v29  ;;  %v9135_v29 = vld [vmem:[#allocation2 + $0xb0] sm:$0xff]  ;;  %v9136_v58 = vld [vmem:[#allocation2 + $0xa0] sm:$0xff] }
 0x682   : > { %v5934_v7 = vmax.f32 %v11194_v48, 0.0  ;;  %v11201_v22 = vadd.f32 %v9130_v3, %v5871_v37 }
 0x683   : > { %5968 = vst [vmem:[#allocation2 + $0x70] sm:$0xff] %v5936_v0  ;;  %v5937_v25 = vmax.f32 %v11198_v30, 0.0  ;;  %6004 = vst [vmem:[%s9591_s7 + $0x70] sm:$0xff] (!%p6308_p4), %v5936_v0 }
 0x684   : > { %5966 = vst [vmem:[#allocation2 + $0x60] sm:$0xff] %v5934_v7  ;;  %v5935_v16 = vmax.f32 %v11201_v22, 0.0  ;;  %v8336_v31 = vpop.f32.mrb[16].mxu1  ;;  %6002 = vst [vmem:[%s9591_s7 + $0x60] sm:$0xff] (!%p6308_p4), %v5934_v7 }
 0x685   : > { %5969 = vst [vmem:[#allocation2 + $0x78] sm:$0xff] %v5937_v25  ;;  %v5876_v56 = vadd.f32 %v8336_v31, %v11115_v9  ;;  %v5755_v51 = vpop.f32.mrb[17].mxu1  ;;  %6005 = vst [vmem:[%s9591_s7 + $0x78] sm:$0xff] (!%p6308_p4), %v5937_v25 }
 0x686   : > { %5967 = vst [vmem:[#allocation2 + $0x68] sm:$0xff] %v5935_v16  ;;  %v5874_v62 = vadd.f32 %v11115_v9, %v5755_v51  ;;  %v8337_v63 = vpop.f32.mrb[18].mxu1  ;;  %v9137_v51 = vld [vmem:[#allocation2 + $0xb8] sm:$0xff]  ;;  %6003 = vst [vmem:[%s9591_s7 + $0x68] sm:$0xff] (!%p6308_p4), %v5935_v16 }
 0x687   : > { %v11215_v15 = vadd.f32 %v9131_v45, %v5876_v56  ;;  %v5877_v55 = vadd.f32 %v8337_v63, %v11115_v9  ;;  %v5758_v4 = vpop.f32.mrb[19].mxu1  ;;  %v9138_v45 = vld [vmem:[#allocation2 + $0xa8] sm:$0xff] }
 0x688   : > { %v11218_v10 = vadd.f32 %v9132_v27, %v5874_v62  ;;  %v5875_v1 = vadd.f32 %v11115_v9, %v5758_v4 }
 0x689   : > { %v11476_v35 = vmax.f32 %v11215_v15, 0.0  ;;  %v11222_v39 = vadd.f32 %v9133_v54, %v5877_v55  ;;  %v11534_v14 = vmax.f32 (!%p6308_p4), %v11215_v15, 0.0 }
 0x68a   : > { %v5938_v19 = vmax.f32 %v11218_v10, 0.0  ;;  %v11225_v61 = vadd.f32 %v9134_v41, %v5875_v1 }
 0x68b   : > { %5972 = vst [vmem:[#allocation2 + $0x90] sm:$0xff] %v11476_v35  ;;  %v11475_v43 = vmax.f32 %v11222_v39, 0.0  ;;  %v9146_v35 = vld [vmem:[#allocation2 + $0xe8] sm:$0xff]  ;;  %6008 = vst [vmem:[%s9591_s7 + $0x90] sm:$0xff] (!%p6308_p4), %v11534_v14  ;;  %v11535_v36 = vmax.f32 (!%p6308_p4), %v11222_v39, 0.0 }
 0x68c   : > { %5970 = vst [vmem:[#allocation2 + $0x80] sm:$0xff] %v5938_v19  ;;  %v11477_v34 = vmax.f32 %v11225_v61, 0.0  ;;  %v8340_v49 = vpop.f32.mrb[20].mxu1  ;;  %6006 = vst [vmem:[%s9591_s7 + $0x80] sm:$0xff] (!%p6308_p4), %v5938_v19 }
 0x68d   : > { %5973 = vst [vmem:[#allocation2 + $0x98] sm:$0xff] %v11475_v43  ;;  %v5880_v18 = vadd.f32 %v8340_v49, %v11115_v9  ;;  %v5771_v20 = vpop.f32.mrb[21].mxu1  ;;  %6009 = vst [vmem:[%s9591_s7 + $0x98] sm:$0xff] (!%p6308_p4), %v11535_v36 }
 0x68e   : > { %5971 = vst [vmem:[#allocation2 + $0x88] sm:$0xff] %v11477_v34  ;;  %v5878_v6 = vadd.f32 %v11115_v9, %v5771_v20  ;;  %v8341_v28 = vpop.f32.mrb[22].mxu1  ;;  %v9139_v20 = vld [vmem:[#allocation2 + $0xd0] sm:$0xff] }
 0x68f   : > { %v11239_v32 = vadd.f32 %v9135_v29, %v5880_v18  ;;  %v5881_v44 = vadd.f32 %v8341_v28, %v11115_v9  ;;  %v5774_v37 = vpop.f32.mrb[23].mxu1 }
 0x690   : > { %v11242_v3 = vadd.f32 %v9136_v58, %v5878_v6  ;;  %v5879_v31 = vadd.f32 %v11115_v9, %v5774_v37 }
 0x691   : > { %v11471_v56 = vmax.f32 %v11239_v32, 0.0  ;;  %v11246_v62 = vadd.f32 %v9137_v51, %v5881_v44  ;;  %v9140_v44 = vld [vmem:[#allocation2 + $0xc0] sm:$0xff]  ;;  %v9141_v51 = vld [vmem:[#allocation2 + $0xd8] sm:$0xff]  ;;  %v11538_v17 = vmax.f32 (!%p6308_p4), %v11239_v32, 0.0 }
 0x692   : > { %v11474_v63 = vmax.f32 %v11242_v3, 0.0  ;;  %v11249_v55 = vadd.f32 %v9138_v45, %v5879_v31  ;;  %v11536_v40 = vmax.f32 (!%p6308_p4), %v11242_v3, 0.0 }
 0x693   : > { %5976 = vst [vmem:[#allocation2 + $0xb0] sm:$0xff] %v11471_v56  ;;  %v11470_v4 = vmax.f32 %v11246_v62, 0.0  ;;  %v9144_v56 = vld [vmem:[#allocation2 + $0xe0] sm:$0xff]  ;;  %6012 = vst [vmem:[%s9591_s7 + $0xb0] sm:$0xff] (!%p6308_p4), %v11538_v17  ;;  %v11539_v53 = vmax.f32 (!%p6308_p4), %v11246_v62, 0.0 }
 0x694   : > { %5974 = vst [vmem:[#allocation2 + $0xa0] sm:$0xff] %v11474_v63  ;;  %v11473_v27 = vmax.f32 %v11249_v55, 0.0  ;;  %v8344_v1 = vpop.f32.mrb[24].mxu1  ;;  %6010 = vst [vmem:[%s9591_s7 + $0xa0] sm:$0xff] (!%p6308_p4), %v11536_v40  ;;  %v11537_v23 = vmax.f32 (!%p6308_p4), %v11249_v55, 0.0 }
 0x695   : > { %5977 = vst [vmem:[#allocation2 + $0xb8] sm:$0xff] %v11470_v4  ;;  %v5884_v54 = vadd.f32 %v8344_v1, %v11115_v9  ;;  %v5787_v41 = vpop.f32.mrb[25].mxu1  ;;  %6013 = vst [vmem:[%s9591_s7 + $0xb8] sm:$0xff] (!%p6308_p4), %v11539_v53 }
 0x696   : > { %5975 = vst [vmem:[#allocation2 + $0xa8] sm:$0xff] %v11473_v27  ;;  %v5882_v49 = vadd.f32 %v11115_v9, %v5787_v41  ;;  %v8345_v18 = vpop.f32.mrb[26].mxu1  ;;  %v9142_v41 = vld [vmem:[#allocation2 + $0xc8] sm:$0xff]  ;;  %6011 = vst [vmem:[%s9591_s7 + $0xa8] sm:$0xff] (!%p6308_p4), %v11537_v23 }
 0x697   : > { %v11263_v6 = vadd.f32 %v9139_v20, %v5884_v54  ;;  %v5885_v28 = vadd.f32 %v8345_v18, %v11115_v9  ;;  %v5790_v29 = vpop.f32.mrb[27].mxu1 }
 0x698   : > { %v11266_v37 = vadd.f32 %v9140_v44, %v5882_v49  ;;  %v5883_v58 = vadd.f32 %v11115_v9, %v5790_v29 }
 0x699   : > { %v11472_v31 = vmax.f32 %v11263_v6, 0.0  ;;  %v11270_v45 = vadd.f32 %v9141_v51, %v5885_v28  ;;  %v9143_v51 = vld [vmem:[#allocation2 + $0xf0] sm:$0xff]  ;;  %v11540_v52 = vmax.f32 (!%p6308_p4), %v11263_v6, 0.0 }
 0x69a   : > { %v5946_v1 = vmax.f32 %v11266_v37, 0.0  ;;  %v5915_v4 = vadd.f32 %v9142_v41, %v5883_v58 }
 0x69b   : > { %5980 = vst [vmem:[#allocation2 + $0xd0] sm:$0xff] %v11472_v31  ;;  %v5949_v54 = vmax.f32 %v11270_v45, 0.0  ;;  %6016 = vst [vmem:[%s9591_s7 + $0xd0] sm:$0xff] (!%p6308_p4), %v11540_v52 }
 0x69c   : > { %5978 = vst [vmem:[#allocation2 + $0xc0] sm:$0xff] %v5946_v1  ;;  %v5947_v18 = vmax.f32 %v5915_v4, 0.0  ;;  %v8348_v49 = vpop.f32.mrb[28].mxu1  ;;  %v9145_v4 = vld [vmem:[#allocation2 + $0xf8] sm:$0xff]  ;;  %6014 = vst [vmem:[%s9591_s7 + $0xc0] sm:$0xff] (!%p6308_p4), %v5946_v1 }
 0x69d   : > { %5981 = vst [vmem:[#allocation2 + $0xd8] sm:$0xff] %v5949_v54  ;;  %v5888_v20 = vadd.f32 %v8348_v49, %v11115_v9  ;;  %v5803_v29 = vpop.f32.mrb[29].mxu1  ;;  %6017 = vst [vmem:[%s9591_s7 + $0xd8] sm:$0xff] (!%p6308_p4), %v5949_v54 }
 0x69e   : > { %5979 = vst [vmem:[#allocation2 + $0xc8] sm:$0xff] %v5947_v18  ;;  %v5886_v28 = vadd.f32 %v11115_v9, %v5803_v29  ;;  %v8349_v44 = vpop.f32.mrb[30].mxu1  ;;  %6015 = vst [vmem:[%s9591_s7 + $0xc8] sm:$0xff] (!%p6308_p4), %v5947_v18 }
 0x69f   : > { %v5920_v37 = vadd.f32 %v9143_v51, %v5888_v20  ;;  %v5889_v58 = vadd.f32 %v8349_v44, %v11115_v9  ;;  %v5806_v41 = vpop.f32.mrb[31].mxu1 }
 0x6a0   : > { %v5918_v31 = vadd.f32 %v9144_v56, %v5886_v28  ;;  %v5887_v45 = vadd.f32 %v11115_v9, %v5806_v41  ;;  %5989 = sbr.rel (%p6308_p4) target bundleno = 1703 (0x6a7), region = 60  ;;  %v11533_v9 = vmax.f32 (!%p6308_p4), %v11225_v61, 0.0 }
 0x6a1   : > { %v5952_v27 = vmax.f32 %v5920_v37, 0.0  ;;  %v5921_v63 = vadd.f32 %v9145_v4, %v5889_v58 }
 0x6a2   : > { %v5950_v43 = vmax.f32 %v5918_v31, 0.0  ;;  %v5919_v49 = vadd.f32 %v9146_v35, %v5887_v45  ;;  %6007 = vst [vmem:[%s9591_s7 + $0x88] sm:$0xff] (!%p6308_p4), %v11533_v9 }
 0x6a3   : > { %5984 = vst [vmem:[#allocation2 + $0xf0] sm:$0xff] %v5952_v27  ;;  %v5953_v34 = vmax.f32 %v5921_v63, 0.0  ;;  %6020 = vst [vmem:[%s9591_s7 + $0xf0] sm:$0xff] (!%p6308_p4), %v5952_v27 }
 0x6a4   : > { %5982 = vst [vmem:[#allocation2 + $0xe0] sm:$0xff] %v5950_v43  ;;  %v5951_v29 = vmax.f32 %v5919_v49, 0.0  ;;  %6018 = vst [vmem:[%s9591_s7 + $0xe0] sm:$0xff] (!%p6308_p4), %v5950_v43 }
 0x6a5   : > { %5985 = vst [vmem:[#allocation2 + $0xf8] sm:$0xff] %v5953_v34  ;;  %6021 = vst [vmem:[%s9591_s7 + $0xf8] sm:$0xff] (!%p6308_p4), %v5953_v34 }
 0x6a6   : > { %5983 = vst [vmem:[#allocation2 + $0xe8] sm:$0xff] %v5951_v29  ;;  %6019 = vst [vmem:[%s9591_s7 + $0xe8] sm:$0xff] (!%p6308_p4), %v5951_v29 }
 0x6a7 PF: > { %s6317_s21 = sshll.u32 %s9323_s22, 12  ;;  %s6036_s12 = sshll.u32 %s9591_s7, 4  ;;  %s11370_s12 = int_to_ptr.vmem [resolvable:$true] %s6036_s12 }
 0x6a8   : > { %s11367_s10 = scalar_lea.hbm %s11429_s5, %s6317_s21  ;;  %s6023_s28 = scalar_lea.sflag [#allocation6], %s9577_s8 }
 0x6a9   : > { %s9233_s30 = scalar_lea.vmem %s11370_s12, 4096  ;;  %s9346_s9 = smov [#allocation10]  }
 0x6aa   : > { %p9234_p10 = scmp.ne.s32.totalorder %s11370_s12, %s9233_s30  ;;  %s9237_s18 = sshll.u32 %s9346_s9, 4  ;;  %s9238_s18 = int_to_ptr.vmem [resolvable:$false] %s9237_s18 }
 0x6ab   : > { %s9239_s22 = scalar_lea.vmem %s9238_s18, 8192  ;;  %p9240_p3 = scmp.lt.s32.totalorder %s11370_s12, %s9238_s18 }
 0x6ac   : > { %p9235_p8 = pnand %p9234_p10, %p9519_p6  ;;  %p9241_p7 = scmp.lt.s32.totalorder %s9239_s22, %s9233_s30 }
 0x6ae   : > { %p9236_p13 = pneg %p9235_p8  ;;  %p9242_p12 = por %p9241_p7, %p9240_p3 }
 0x6b0   : > { %p9243_p11 = pnand %p9242_p12, %p9236_p13 }
 0x6b2   : > { %9246 = shalt.err (!%p9243_p11)
}
 0x6b3   : > { %s9247_s7 = scalar_lea.hbm %s11367_s10, 4096  ;;  %s9251_s16 = scalar_lea.hbm %s11429_s5, 8192 }
 0x6b4   : > { %p9248_p1 = scmp.ne.s32.totalorder %s11367_s10, %s9247_s7  ;;  %p9252_p0 = scmp.lt.u32.totalorder %s11367_s10, %s11429_s5 }
 0x6b5   : > { %p9253_p2 = scmp.lt.u32.totalorder %s9251_s16, %s9247_s7  ;;  %p9255_p10 = scmp.lt.u32.totalorder %s9247_s7, %s11367_s10 }
 0x6b6   : > { %p9249_p5 = pnand %p9248_p1, %p9519_p6 }
 0x6b7   : > { %p9254_p4 = por %p9253_p2, %p9252_p0 }
 0x6b8   : > { %p9250_p9 = pneg %p9249_p5 }
 0x6b9   : > { %p9256_p8 = por %p9255_p10, %p9254_p4 }
 0x6bb   : > { %p9257_p13 = pnand %p9256_p8, %p9250_p9 }
 0x6bd   : > { %9260 = shalt.err (!%p9257_p13)
}
 0x6be   : > { %s9347_s21 = smov 128   ;;  %s9348_s27 = smov 8  }
 0x6bf   : > { %8872 = dma.vmem_to_hbm [thread:$0]  (%p9519_p6), %s11370_s12, 4096, %s11367_s10, %s6023_s28, %s9347_s21, %s9347_s21, %s9348_s27  }
 0x6c0 PF: > { %s11541_s29 = sld [smem:[#allocation14_spill]]  ;;  %s11542_s30 = sld [smem:[#allocation15_spill]] }
 0x6c1   : > { %p8896_p3 = scmp.ge.s32.totalorder %s9335_s25, 2 }
 0x6c6   : > { %s6051_s9 = sand.u32 1, %s11541_s29   ;;  %p11543_p7 = scmp.ne.s32.totalorder %s11542_s30, 0 }
 0x6c7   : > { %s6052_s18 = scalar_lea.sflag [#allocation6], %s6051_s9 }
 0x6c8   : > { %p8886_p12 = pnand %p8896_p3, %p11543_p7 }
 0x6ca   : > { %9302 = dma.done.wait (!%p8886_p12), %s6052_s18, 4096  }
 0x6cb   : > { %9304 = vsyncadd (!%p8886_p12), %s6052_s18, 4294963200  ;;  %s22_s25 = sadd.s32 1, %s9335_s25   ;;  %s11544_s18 = smov %s9311_s19 }
 0x6cc   : > { %p19_p11 = scmp.ge.s32.totalorder %s22_s25, 6   ;;  %s11545_s19 = smov %s9315_s20 }
 0x6cd   : > { %s11546_s20 = smov %s9542_s1  ;;  %s11547_s21 = smov %s9327_s23 }
 0x6ce   : > { %s11548_s22 = smov %s9331_s24  ;;  %s11549_s23 = smov %s11552_s14 }
 0x6cf   : > { %s11550_s24 = smov %s11556_s15  ;;  %21 = sbr.rel (!%p19_p11) target bundleno = 10 (0xa), region = 116 }
 0x6d6   :  { %6057 = vsyncpa [#allocation5], 1 }
 0x6d7   :  { %6059 = vsyncpa [#allocation5 + $0x1], 1 }
 0x6d8   :  { %6060 = vsyncpa [#allocation8], 1 }
 0x6d9   :  { %6061 = vsyncpa [#allocation6], 1 }
 0x6da   :  { %6063 = vsyncpa [#allocation6 + $0x1], 1 }

</bundles_post_ra>
